<compile_context>
chip_gen: v7x
topology: tpu7x:2x2x1
jax: 0.10.0
libtpu: 0.0.40
codegen_flags: <defaults>
</compile_context>

<pallas_src>
import functools

import jax
import jax.numpy as jnp
from jax.experimental import pallas as pl
from jax.experimental.pallas import tpu as pltpu


# ----------------------------- small helpers ------------------------------
def _round_up(x, m):
    return ((x + m - 1) // m) * m


def _pad2d(x, rows, cols):
    r, c = x.shape
    return jnp.zeros((rows, cols), x.dtype).at[:r, :c].set(x)


# ------------------------ fused matmul + bias (+ReLU) ----------------------
def _mm_kernel(a_ref, b_ref, bias_ref, o_ref, *, relu):
    acc = jnp.dot(a_ref[...], b_ref[...], preferred_element_type=jnp.float32)
    acc = acc + bias_ref[...]
    if relu:
        acc = jnp.maximum(acc, 0.0)
    o_ref[...] = acc


def matmul_bias(a, b, bias=None, relu=False, tm=512):
    """(M,K) @ (K,N) + bias (+ReLU).  bf16 MXU operands, f32 accumulation.

    Gridded over M ("parallel" -> uses both TCs on v7x); weight/bias blocks
    have constant index_maps so they stay resident across the M grid.
    """
    M, K = a.shape
    K2, N = b.shape
    assert K == K2
    Kp, Np = _round_up(K, 128), _round_up(N, 128)
    tm = min(tm, _round_up(M, 8))
    Mp = _round_up(M, tm)
    a_p = _pad2d(a.astype(jnp.float32), Mp, Kp).astype(jnp.bfloat16)
    b_p = _pad2d(b.astype(jnp.float32), Kp, Np).astype(jnp.bfloat16)
    if bias is None:
        bias = jnp.zeros((N,), jnp.float32)
    bias_p = _pad2d(bias.reshape(1, N).astype(jnp.float32), 1, Np)

    out = pl.pallas_call(
        functools.partial(_mm_kernel, relu=relu),
        out_shape=jax.ShapeDtypeStruct((Mp, Np), jnp.float32),
        grid_spec=pltpu.PrefetchScalarGridSpec(
            num_scalar_prefetch=0,
            grid=(Mp // tm,),
            in_specs=[pl.BlockSpec((tm, Kp), lambda i: (i, 0)),
                      pl.BlockSpec((Kp, Np), lambda i: (0, 0)),
                      pl.BlockSpec((1, Np), lambda i: (0, 0))],
            out_specs=pl.BlockSpec((tm, Np), lambda i: (i, 0))),
        compiler_params=pltpu.CompilerParams(
            dimension_semantics=("parallel",),
            vmem_limit_bytes=32 * 1024 * 1024),
    )(a_p, b_p, bias_p)
    return out[:M, :N]


# ------------------- fused 2-layer GRU + attention kernel ------------------
def _gru_attn_kernel(gi1_ref, whh1_ref, b1h_ref, wih2_ref, whh2_ref,
                     b2i_ref, b2h_ref, watt_ref, ctx_ref,
                     h1_ref, h2_ref, m_ref, l_ref, acc_ref):
    t = pl.program_id(0)
    T = pl.num_programs(0)
    H = 128

    @pl.when(t == 0)
    def _():
        h1_ref[...] = jnp.zeros_like(h1_ref)
        h2_ref[...] = jnp.zeros_like(h2_ref)
        m_ref[...] = jnp.full_like(m_ref, -jnp.inf)
        l_ref[...] = jnp.zeros_like(l_ref)
        acc_ref[...] = jnp.zeros_like(acc_ref)

    def gates(gi, gh, h):
        # PyTorch GRU semantics, gate order (r, z, n).
        r = jax.nn.sigmoid(gi[:, 0:H] + gh[:, 0:H])
        z = jax.nn.sigmoid(gi[:, H:2 * H] + gh[:, H:2 * H])
        n = jnp.tanh(gi[:, 2 * H:3 * H] + r * gh[:, 2 * H:3 * H])
        return (1.0 - z) * n + z * h

    # Layer 1: the input projection (x @ Wih1 + bih1) is precomputed outside
    # the serial loop; only the recurrent matmul remains here.
    h1 = h1_ref[...]
    gh1 = jnp.dot(h1.astype(jnp.bfloat16), whh1_ref[...],
                  preferred_element_type=jnp.float32) + b1h_ref[...]
    h1 = gates(gi1_ref[0], gh1, h1)
    h1_ref[...] = h1

    # Layer 2.
    h2 = h2_ref[...]
    gi2 = jnp.dot(h1.astype(jnp.bfloat16), wih2_ref[...],
                  preferred_element_type=jnp.float32) + b2i_ref[...]
    gh2 = jnp.dot(h2.astype(jnp.bfloat16), whh2_ref[...],
                  preferred_element_type=jnp.float32) + b2h_ref[...]
    h2 = gates(gi2, gh2, h2)
    h2_ref[...] = h2

    # Online-softmax attention over time.  The attention-layer bias is a
    # constant shift of the scores and cancels in the softmax, so it is dropped.
    e = jnp.sum(h2 * watt_ref[...], axis=1, keepdims=True)   # (Bp, 1)
    m_prev = m_ref[...]
    m_new = jnp.maximum(m_prev, e)
    scale = jnp.exp(m_prev - m_new)
    p = jnp.exp(e - m_new)
    l_ref[...] = scale * l_ref[...] + p
    acc_ref[...] = scale * acc_ref[...] + p * h2
    m_ref[...] = m_new

    @pl.when(t == T - 1)
    def _():
        ctx_ref[...] = acc_ref[...] / l_ref[...]


def gru_attention(gi1, params):
    """gi1: (B, T, 384) precomputed layer-1 gate inputs -> context (Bp, 128)."""
    B, T, G = gi1.shape
    Bp = _round_up(B, 8)

    x = jnp.zeros((T, Bp, G), jnp.float32)
    x = x.at[:, :B, :].set(jnp.transpose(gi1, (1, 0, 2)))

    whh1 = params['gru0_whh'].astype(jnp.bfloat16)
    b1h = params['gru0_bhh'].reshape(1, G).astype(jnp.float32)
    wih2 = params['gru1_wih'].astype(jnp.bfloat16)
    whh2 = params['gru1_whh'].astype(jnp.bfloat16)
    b2i = params['gru1_bih'].reshape(1, G).astype(jnp.float32)
    b2h = params['gru1_bhh'].reshape(1, G).astype(jnp.float32)
    watt = params['att_w'].reshape(1, 128).astype(jnp.float32)

    weights = (whh1, b1h, wih2, whh2, b2i, b2h, watt)
    ctx = pl.pallas_call(
        _gru_attn_kernel,
        out_shape=jax.ShapeDtypeStruct((Bp, 128), jnp.float32),
        grid_spec=pltpu.PrefetchScalarGridSpec(
            num_scalar_prefetch=0,
            grid=(T,),
            in_specs=[pl.BlockSpec((1, Bp, G), lambda t: (t, 0, 0))]
                     + [pl.BlockSpec(w.shape, lambda t: (0, 0))
                        for w in weights],
            out_specs=pl.BlockSpec((Bp, 128), lambda t: (0, 0)),
            scratch_shapes=[pltpu.VMEM((Bp, 128), jnp.float32),   # h1
                            pltpu.VMEM((Bp, 128), jnp.float32),   # h2
                            pltpu.VMEM((Bp, 1), jnp.float32),     # m (max)
                            pltpu.VMEM((Bp, 1), jnp.float32),     # l (denom)
                            pltpu.VMEM((Bp, 128), jnp.float32)]), # acc (numer)
        compiler_params=pltpu.CompilerParams(
            dimension_semantics=("arbitrary",)),
    )(x, *weights)
    return ctx


# --------------------- fused graph head: SAGE x2 + fc ----------------------
def _graph_head_kernel(adj_ref, x_ref, w1_ref, b1_ref, w2_ref, b2_ref,
                       wf_ref, bf_ref, o_ref, *, n_nodes):
    adj = adj_ref[...]

    def sage_relu(x, w_ref, b_ref):
        # GraphSAGE aggr='max':  relu(W_l * max_j x_j + b + W_r * x_i)
        agg = jnp.full(x.shape, -jnp.inf, jnp.float32)
        for s in range(n_nodes):                        # static unroll (tiny)
            msg = x[s:s + 1, :]                         # (1, F)
            has_edge = adj[:, s:s + 1] > 0.0            # (Np, 1)
            agg = jnp.where(has_edge, jnp.maximum(agg, msg), agg)
        # isolated / padded nodes -> 0 (done in f32 BEFORE the bf16 cast)
        agg = jnp.where(agg == -jnp.inf, 0.0, agg)
        cat = jnp.concatenate([agg, x], axis=1).astype(jnp.bfloat16)
        out = jnp.dot(cat, w_ref[...],
                      preferred_element_type=jnp.float32) + b_ref[...]
        return jnp.maximum(out, 0.0)                    # fused ReLU

    x1 = sage_relu(x_ref[...], w1_ref, b1_ref)          # (Np, 128); cols>=64 are 0
    x2 = sage_relu(x1, w2_ref, b2_ref)                  # (Np, 128); cols>=32 are 0
    o_ref[...] = jnp.dot(x2.astype(jnp.bfloat16), wf_ref[...],
                         preferred_element_type=jnp.float32) + bf_ref[...]


def graph_head(x, src, dst, params):
    """sage1(max)+ReLU -> sage2(max)+ReLU -> fc, fused in one pallas_call."""
    N, F = x.shape
    Np = _round_up(N, 8)
    F1p = _round_up(F, 128)                               # 256
    H1 = params['sage1_wl'].shape[1]                      # 64
    H2 = params['sage2_wl'].shape[1]                      # 32
    H1p, H2p = _round_up(H1, 128), _round_up(H2, 128)     # 128, 128

    x_p = _pad2d(x.astype(jnp.float32), Np, F1p)
    # dense adjacency mask: adj[d, s] = 1 iff edge s -> d   (lane-padded)
    adj = jnp.zeros((Np, _round_up(Np, 128)), jnp.float32)
    adj = adj.at[dst.astype(jnp.int32), src.astype(jnp.int32)].set(1.0)

    # fused weight stacks: [agg | x] @ [[Wl]; [Wr]]   (zero-padded cols stay 0)
    w1 = jnp.concatenate(
        [_pad2d(params['sage1_wl'].astype(jnp.float32), F1p, H1p),
         _pad2d(params['sage1_wr'].astype(jnp.float32), F1p, H1p)],
        axis=0).astype(jnp.bfloat16)                      # (2*F1p, H1p)
    b1 = _pad2d(params['sage1_b'].reshape(1, H1).astype(jnp.float32), 1, H1p)
    w2 = jnp.concatenate(
        [_pad2d(params['sage2_wl'].astype(jnp.float32), H1p, H2p),
         _pad2d(params['sage2_wr'].astype(jnp.float32), H1p, H2p)],
        axis=0).astype(jnp.bfloat16)                      # (2*H1p, H2p)
    b2 = _pad2d(params['sage2_b'].reshape(1, H2).astype(jnp.float32), 1, H2p)
    wf = _pad2d(params['fc_w'].astype(jnp.float32), H2p, 128).astype(jnp.bfloat16)
    bf = _pad2d(params['fc_b'].reshape(1, 1).astype(jnp.float32), 1, 128)

    out = pl.pallas_call(
        functools.partial(_graph_head_kernel, n_nodes=Np),
        out_shape=jax.ShapeDtypeStruct((Np, 128), jnp.float32),
    )(adj, x_p, w1, b1, w2, b2, wf, bf)
    return out[:N, :1]


# ----------------------------- CNN branch ----------------------------------
def conv3x3_im2col(x_nhwc):
    """3x3, stride 1, pad 1 im2col patches: (B*H*W, 9*C)."""
    B, H, W, C = x_nhwc.shape
    xp = jnp.pad(x_nhwc, ((0, 0), (1, 1), (1, 1), (0, 0)))
    cols = [xp[:, dh:dh + H, dw:dw + W, :]
            for dh in range(3) for dw in range(3)]
    # TODO(synk): patches could be built in-kernel from a padded NHWC VMEM tile
    # (shifted slices) to avoid the 9x HBM materialization; done once per conv
    # layer here (T and both branches folded), which removes the bulk of it.
    return jnp.concatenate(cols, axis=-1).reshape(B * H * W, 9 * C)


def maxpool2x2(x):
    B, H, W, C = x.shape
    return x.reshape(B, H // 2, 2, W // 2, 2, C).max(axis=(2, 4))


def avgpool_to_5(x):
    # AdaptiveAvgPool2d((5,5)); here H, W are exact multiples of 5.
    B, H, W, C = x.shape
    kh, kw = H // 5, W // 5
    return x.reshape(B, 5, kh, 5, kw, C).mean(axis=(2, 4))


def cnn_features(veg, cwsi, params):
    """veg (B,T,5,H,W), cwsi (B,T,1,H,W) -> combined CNN features (B,T,600)."""
    B, T = veg.shape[0], veg.shape[1]
    H, W = veg.shape[3], veg.shape[4]
    veg_x = jnp.transpose(veg.reshape(B * T, 5, H, W), (0, 2, 3, 1))   # NHWC
    cwsi_x = jnp.transpose(cwsi.reshape(B * T, 1, H, W), (0, 2, 3, 1))

    # conv1 (+ReLU): T folded into M, BOTH branches fused into ONE matmul via
    # a block-diagonal weight ([45+9] x [16+16]).
    pv = conv3x3_im2col(veg_x)                            # (M, 45)
    pc = conv3x3_im2col(cwsi_x)                           # (M, 9)
    M = pv.shape[0]
    a1 = jnp.zeros((2 * M, 54), jnp.float32)
    a1 = a1.at[:M, :45].set(pv).at[M:, 45:].set(pc)
    w1 = jnp.zeros((54, 32), jnp.float32)
    w1 = w1.at[:45, :16].set(params['veg1_w'].reshape(45, 16))
    w1 = w1.at[45:, 16:].set(params['cwsi1_w'].reshape(9, 16))
    b1 = jnp.concatenate([params['veg1_b'], params['cwsi1_b']])
    out1 = matmul_bias(a1, w1, b1, relu=True)             # (2M, 32)
    v1 = out1[:M, :16].reshape(B * T, H, W, 16)
    c1 = out1[M:, 16:32].reshape(B * T, H, W, 16)
    v1 = maxpool2x2(v1)
    c1 = maxpool2x2(c1)
    Hh, Wh = H // 2, W // 2

    # conv2 (+ReLU): both branches share K=144 -> single matmul with weights
    # concatenated along N (16+8=24) and inputs concatenated along M.
    pv2 = conv3x3_im2col(v1)
    pc2 = conv3x3_im2col(c1)
    patches = jnp.concatenate([pv2, pc2], axis=0)
    w2 = jnp.concatenate([params['veg2_w'].reshape(144, 16),
                          params['cwsi2_w'].reshape(144, 8)], axis=1)
    b2 = jnp.concatenate([params['veg2_b'], params['cwsi2_b']])
    out2 = matmul_bias(patches, w2, b2, relu=True)        # (2*B*T*Hh*Wh, 24)
    n_rows = B * T * Hh * Wh
    v2 = out2[:n_rows, :16].reshape(B * T, Hh, Wh, 16)
    c2 = out2[n_rows:, 16:24].reshape(B * T, Hh, Wh, 8)

    v2 = avgpool_to_5(v2)                                 # (B*T, 5, 5, 16)
    c2 = avgpool_to_5(c2)                                 # (B*T, 5, 5, 8)
    # flatten(1) like PyTorch (channel-major): NHWC -> NCHW -> flatten
    v_feat = jnp.transpose(v2, (0, 3, 1, 2)).reshape(B, T, 16 * 25)
    c_feat = jnp.transpose(c2, (0, 3, 1, 2)).reshape(B, T, 8 * 25)
    return jnp.concatenate([v_feat, c_feat], axis=-1)     # (B, T, 600)


# ----------------------------- full forward --------------------------------
def tsfn_forward(params, veg, cwsi, irrigation, edge_index):
    B, T = veg.shape[0], veg.shape[1]
    combined = cnn_features(veg, cwsi, params)                    # (B, T, 600)

    # GRU layer-1 input projection hoisted out of the serial time loop:
    # one gridded MXU pass over all B*T rows.
    gi1 = matmul_bias(combined.reshape(B * T, 600),
                      params['gru0_wih'], params['gru0_bih'])     # (B*T, 384)
    context = gru_attention(gi1.reshape(B, T, 384), params)[:B]   # (B, 128)

    irr = irrigation.reshape(-1).astype(jnp.int32)
    irr_feat = params['embed'][irr]                               # (B, 16)

    x = jnp.concatenate([context, irr_feat], axis=1)              # (B, 144)
    src, dst = edge_index[0], edge_index[1]
    return graph_head(x, src, dst, params)                        # (B, 1)


# ----------------------------- parameters ----------------------------------
def init_params(key):
    ks = iter(jax.random.split(key, 32))

    def nrm(shape, scale=0.05):
        return jax.random.normal(next(ks), shape, jnp.float32) * scale

    return dict(
        veg1_w=nrm((3, 3, 5, 16)), veg1_b=nrm((16,)),
        veg2_w=nrm((3, 3, 16, 16)), veg2_b=nrm((16,)),
        cwsi1_w=nrm((3, 3, 1, 16)), cwsi1_b=nrm((16,)),
        cwsi2_w=nrm((3, 3, 16, 8)), cwsi2_b=nrm((8,)),
        embed=nrm((3, 16)),
        gru0_wih=nrm((600, 384)), gru0_whh=nrm((128, 384)),
        gru0_bih=nrm((384,)), gru0_bhh=nrm((384,)),
        gru1_wih=nrm((128, 384)), gru1_whh=nrm((128, 384)),
        gru1_bih=nrm((384,)), gru1_bhh=nrm((384,)),
        att_w=nrm((128,)), att_b=nrm(()),
        sage1_wl=nrm((144, 64)), sage1_wr=nrm((144, 64)), sage1_b=nrm((64,)),
        sage2_wl=nrm((64, 32)), sage2_wr=nrm((64, 32)), sage2_b=nrm((32,)),
        fc_w=nrm((32, 1)), fc_b=nrm((1,)),
    )


# ----------------------------- main -----------------------------------------
if __name__ == "__main__":
    key = jax.random.PRNGKey(0)
    k_veg, k_cwsi, k_irr, k_params = jax.random.split(key, 4)

    B, T, H, W = 6, 4, 20, 20
    veg = jax.random.normal(k_veg, (B, T, 5, H, W), jnp.float32)
    cwsi = jax.random.normal(k_cwsi, (B, T, 1, H, W), jnp.float32)
    irrigation = jax.random.randint(k_irr, (B, 1), 0, 3, jnp.int32)
    # bidirectional ring graph over the B nodes: edge_index[0]=src, [1]=dst
    src = jnp.array([0, 1, 2, 3, 4, 5, 1, 2, 3, 4, 5, 0], jnp.int32)
    dst = jnp.array([1, 2, 3, 4, 5, 0, 0, 1, 2, 3, 4, 5], jnp.int32)
    edge_index = jnp.stack([src, dst])

    params = init_params(k_params)

    fwd = jax.jit(tsfn_forward)
    out = fwd(params, veg, cwsi, irrigation, edge_index)
    out = jax.block_until_ready(out)
    assert out.shape == (B, 1) and bool(jnp.all(jnp.isfinite(out)))
    print("KERNEL_OK")
</pallas_src>

<mosaic_0001>
module attributes {stable_mosaic.version = 11 : i64} {
  func.func @_mm_kernel(%arg0: i32, %arg1: memref<512x128xbf16, #tpu.memory_space<vmem>>, %arg2: memref<128x128xbf16, #tpu.memory_space<vmem>>, %arg3: memref<1x128xf32, #tpu.memory_space<vmem>>, %arg4: memref<512x128xf32, #tpu.memory_space<vmem>>) attributes {dimension_semantics = [#tpu.dimension_semantics<parallel>], iteration_bounds = array<i64: 38>, scalar_prefetch = 0 : i64, scratch_operands = 0 : i64, tpu.core_type = #tpu.core_type<tc>, window_params = [{transform_indices = @transform_0, window_bounds = array<i64: 512, 128>}, {pipeline_mode = #tpu.pipeline_mode<synchronous>, transform_indices = @transform_1, window_bounds = array<i64: 128, 128>}, {pipeline_mode = #tpu.pipeline_mode<synchronous>, transform_indices = @transform_2, window_bounds = array<i64: 1, 128>}, {transform_indices = @transform_3, window_bounds = array<i64: 512, 128>}]} {
    %c0 = arith.constant 0 : index
    %c0_0 = arith.constant 0 : index
    %0 = vector.load %arg1[%c0, %c0_0] : memref<512x128xbf16, #tpu.memory_space<vmem>>, vector<512x128xbf16>
    %c0_1 = arith.constant 0 : index
    %c0_2 = arith.constant 0 : index
    %1 = vector.load %arg2[%c0_1, %c0_2] : memref<128x128xbf16, #tpu.memory_space<vmem>>, vector<128x128xbf16>
    %cst = arith.constant dense<0.000000e+00> : vector<512x128xf32>
    %2 = tpu.matmul %0, %1, %cst {dimension_numbers = #tpu.dot_dimension_numbers<[1], [0], [0], [1], [0, 0, 1, 1], [], []>} : vector<512x128xbf16>, vector<128x128xbf16>, vector<512x128xf32> -> vector<512x128xf32>
    %c0_3 = arith.constant 0 : index
    %c0_4 = arith.constant 0 : index
    %3 = vector.load %arg3[%c0_3, %c0_4] : memref<1x128xf32, #tpu.memory_space<vmem>>, vector<1x128xf32>
    %4 = vector.broadcast %3 : vector<1x128xf32> to vector<512x128xf32>
    %5 = arith.addf %2, %4 : vector<512x128xf32>
    %cst_5 = arith.constant 0.000000e+00 : f32
    %6 = vector.broadcast %cst_5 : f32 to vector<512x128xf32>
    %7 = arith.maximumf %5, %6 : vector<512x128xf32>
    %c0_6 = arith.constant 0 : index
    %c0_7 = arith.constant 0 : index
    %8 = vector.load %arg4[%c0_6, %c0_7] : memref<512x128xf32, #tpu.memory_space<vmem>>, vector<512x128xf32>
    tpu.vector_store %arg4[%c0_6, %c0_7], %7 {strides = array<i32>} : memref<512x128xf32, #tpu.memory_space<vmem>>, vector<512x128xf32>,
    return
  }
  func.func @transform_0(%arg0: i32) -> (i32, i32) {
    %c0_i32 = arith.constant 0 : i32
    %c0_i32_0 = arith.constant 0 : i32
    return %arg0, %c0_i32 : i32, i32
  }
  func.func @transform_1(%arg0: i32) -> (i32, i32) {
    %c0_i32 = arith.constant 0 : i32
    %c0_i32_0 = arith.constant 0 : i32
    %c0_i32_1 = arith.constant 0 : i32
    return %c0_i32, %c0_i32_0 : i32, i32
  }
  func.func @transform_2(%arg0: i32) -> (i32, i32) {
    %c0_i32 = arith.constant 0 : i32
    %c0_i32_0 = arith.constant 0 : i32
    %c0_i32_1 = arith.constant 0 : i32
    return %c0_i32, %c0_i32_0 : i32, i32
  }
  func.func @transform_3(%arg0: i32) -> (i32, i32) {
    %c0_i32 = arith.constant 0 : i32
    %c0_i32_0 = arith.constant 0 : i32
    return %arg0, %c0_i32 : i32, i32
  }
}

module attributes {stable_mosaic.version = 11 : i64} {
  func.func @_mm_kernel(%arg0: i32, %arg1: memref<512x256xbf16, #tpu.memory_space<vmem>>, %arg2: memref<256x128xbf16, #tpu.memory_space<vmem>>, %arg3: memref<1x128xf32, #tpu.memory_space<vmem>>, %arg4: memref<512x128xf32, #tpu.memory_space<vmem>>) attributes {dimension_semantics = [#tpu.dimension_semantics<parallel>], iteration_bounds = array<i64: 10>, scalar_prefetch = 0 : i64, scratch_operands = 0 : i64, tpu.core_type = #tpu.core_type<tc>, window_params = [{transform_indices = @transform_0, window_bounds = array<i64: 512, 256>}, {pipeline_mode = #tpu.pipeline_mode<synchronous>, transform_indices = @transform_1, window_bounds = array<i64: 256, 128>}, {pipeline_mode = #tpu.pipeline_mode<synchronous>, transform_indices = @transform_2, window_bounds = array<i64: 1, 128>}, {transform_indices = @transform_3, window_bounds = array<i64: 512, 128>}]} {
    %c0 = arith.constant 0 : index
    %c0_0 = arith.constant 0 : index
    %0 = vector.load %arg1[%c0, %c0_0] : memref<512x256xbf16, #tpu.memory_space<vmem>>, vector<512x256xbf16>
    %c0_1 = arith.constant 0 : index
    %c0_2 = arith.constant 0 : index
    %1 = vector.load %arg2[%c0_1, %c0_2] : memref<256x128xbf16, #tpu.memory_space<vmem>>, vector<256x128xbf16>
    %cst = arith.constant dense<0.000000e+00> : vector<512x128xf32>
    %2 = tpu.matmul %0, %1, %cst {dimension_numbers = #tpu.dot_dimension_numbers<[1], [0], [0], [1], [0, 0, 1, 1], [], []>} : vector<512x256xbf16>, vector<256x128xbf16>, vector<512x128xf32> -> vector<512x128xf32>
    %c0_3 = arith.constant 0 : index
    %c0_4 = arith.constant 0 : index
    %3 = vector.load %arg3[%c0_3, %c0_4] : memref<1x128xf32, #tpu.memory_space<vmem>>, vector<1x128xf32>
    %4 = vector.broadcast %3 : vector<1x128xf32> to vector<512x128xf32>
    %5 = arith.addf %2, %4 : vector<512x128xf32>
    %cst_5 = arith.constant 0.000000e+00 : f32
    %6 = vector.broadcast %cst_5 : f32 to vector<512x128xf32>
    %7 = arith.maximumf %5, %6 : vector<512x128xf32>
    %c0_6 = arith.constant 0 : index
    %c0_7 = arith.constant 0 : index
    %8 = vector.load %arg4[%c0_6, %c0_7] : memref<512x128xf32, #tpu.memory_space<vmem>>, vector<512x128xf32>
    tpu.vector_store %arg4[%c0_6, %c0_7], %7 {strides = array<i32>} : memref<512x128xf32, #tpu.memory_space<vmem>>, vector<512x128xf32>,
    return
  }
  func.func @transform_0(%arg0: i32) -> (i32, i32) {
    %c0_i32 = arith.constant 0 : i32
    %c0_i32_0 = arith.constant 0 : i32
    return %arg0, %c0_i32 : i32, i32
  }
  func.func @transform_1(%arg0: i32) -> (i32, i32) {
    %c0_i32 = arith.constant 0 : i32
    %c0_i32_0 = arith.constant 0 : i32
    %c0_i32_1 = arith.constant 0 : i32
    return %c0_i32, %c0_i32_0 : i32, i32
  }
  func.func @transform_2(%arg0: i32) -> (i32, i32) {
    %c0_i32 = arith.constant 0 : i32
    %c0_i32_0 = arith.constant 0 : i32
    %c0_i32_1 = arith.constant 0 : i32
    return %c0_i32, %c0_i32_0 : i32, i32
  }
  func.func @transform_3(%arg0: i32) -> (i32, i32) {
    %c0_i32 = arith.constant 0 : i32
    %c0_i32_0 = arith.constant 0 : i32
    return %arg0, %c0_i32 : i32, i32
  }
}

module attributes {stable_mosaic.version = 11 : i64} {
  func.func @_mm_kernel(%arg0: i32, %arg1: memref<24x640xbf16, #tpu.memory_space<vmem>>, %arg2: memref<640x384xbf16, #tpu.memory_space<vmem>>, %arg3: memref<1x384xf32, #tpu.memory_space<vmem>>, %arg4: memref<24x384xf32, #tpu.memory_space<vmem>>) attributes {dimension_semantics = [#tpu.dimension_semantics<parallel>], iteration_bounds = array<i64: 1>, scalar_prefetch = 0 : i64, scratch_operands = 0 : i64, tpu.core_type = #tpu.core_type<tc>, window_params = [{transform_indices = @transform_0, window_bounds = array<i64: 24, 640>}, {pipeline_mode = #tpu.pipeline_mode<synchronous>, transform_indices = @transform_1, window_bounds = array<i64: 640, 384>}, {pipeline_mode = #tpu.pipeline_mode<synchronous>, transform_indices = @transform_2, window_bounds = array<i64: 1, 384>}, {transform_indices = @transform_3, window_bounds = array<i64: 24, 384>}]} {
    %c0 = arith.constant 0 : index
    %c0_0 = arith.constant 0 : index
    %0 = vector.load %arg1[%c0, %c0_0] : memref<24x640xbf16, #tpu.memory_space<vmem>>, vector<24x640xbf16>
    %c0_1 = arith.constant 0 : index
    %c0_2 = arith.constant 0 : index
    %1 = vector.load %arg2[%c0_1, %c0_2] : memref<640x384xbf16, #tpu.memory_space<vmem>>, vector<640x384xbf16>
    %cst = arith.constant dense<0.000000e+00> : vector<24x384xf32>
    %2 = tpu.matmul %0, %1, %cst {dimension_numbers = #tpu.dot_dimension_numbers<[1], [0], [0], [1], [0, 0, 1, 1], [], []>} : vector<24x640xbf16>, vector<640x384xbf16>, vector<24x384xf32> -> vector<24x384xf32>
    %c0_3 = arith.constant 0 : index
    %c0_4 = arith.constant 0 : index
    %3 = vector.load %arg3[%c0_3, %c0_4] : memref<1x384xf32, #tpu.memory_space<vmem>>, vector<1x384xf32>
    %4 = vector.broadcast %3 : vector<1x384xf32> to vector<24x384xf32>
    %5 = arith.addf %2, %4 : vector<24x384xf32>
    %c0_5 = arith.constant 0 : index
    %c0_6 = arith.constant 0 : index
    %6 = vector.load %arg4[%c0_5, %c0_6] : memref<24x384xf32, #tpu.memory_space<vmem>>, vector<24x384xf32>
    tpu.vector_store %arg4[%c0_5, %c0_6], %5 {strides = array<i32>} : memref<24x384xf32, #tpu.memory_space<vmem>>, vector<24x384xf32>,
    return
  }
  func.func @transform_0(%arg0: i32) -> (i32, i32) {
    %c0_i32 = arith.constant 0 : i32
    %c0_i32_0 = arith.constant 0 : i32
    return %arg0, %c0_i32 : i32, i32
  }
  func.func @transform_1(%arg0: i32) -> (i32, i32) {
    %c0_i32 = arith.constant 0 : i32
    %c0_i32_0 = arith.constant 0 : i32
    %c0_i32_1 = arith.constant 0 : i32
    return %c0_i32, %c0_i32_0 : i32, i32
  }
  func.func @transform_2(%arg0: i32) -> (i32, i32) {
    %c0_i32 = arith.constant 0 : i32
    %c0_i32_0 = arith.constant 0 : i32
    %c0_i32_1 = arith.constant 0 : i32
    return %c0_i32, %c0_i32_0 : i32, i32
  }
  func.func @transform_3(%arg0: i32) -> (i32, i32) {
    %c0_i32 = arith.constant 0 : i32
    %c0_i32_0 = arith.constant 0 : i32
    return %arg0, %c0_i32 : i32, i32
  }
}

module attributes {stable_mosaic.version = 11 : i64} {
  func.func @_gru_attn_kernel(%arg0: i32, %arg1: memref<1x8x384xf32, #tpu.memory_space<vmem>>, %arg2: memref<128x384xbf16, #tpu.memory_space<vmem>>, %arg3: memref<1x384xf32, #tpu.memory_space<vmem>>, %arg4: memref<128x384xbf16, #tpu.memory_space<vmem>>, %arg5: memref<128x384xbf16, #tpu.memory_space<vmem>>, %arg6: memref<1x384xf32, #tpu.memory_space<vmem>>, %arg7: memref<1x384xf32, #tpu.memory_space<vmem>>, %arg8: memref<1x128xf32, #tpu.memory_space<vmem>>, %arg9: memref<8x128xf32, #tpu.memory_space<vmem>>, %arg10: memref<8x128xf32, #tpu.memory_space<vmem>>, %arg11: memref<8x128xf32, #tpu.memory_space<vmem>>, %arg12: memref<8x1xf32, #tpu.memory_space<vmem>>, %arg13: memref<8x1xf32, #tpu.memory_space<vmem>>, %arg14: memref<8x128xf32, #tpu.memory_space<vmem>>) attributes {dimension_semantics = [#tpu.dimension_semantics<arbitrary>], iteration_bounds = array<i64: 4>, scalar_prefetch = 0 : i64, scratch_operands = 5 : i64, tpu.core_type = #tpu.core_type<tc>, window_params = [{transform_indices = @transform_0, window_bounds = array<i64: 1, 8, 384>}, {pipeline_mode = #tpu.pipeline_mode<synchronous>, transform_indices = @transform_1, window_bounds = array<i64: 128, 384>}, {pipeline_mode = #tpu.pipeline_mode<synchronous>, transform_indices = @transform_2, window_bounds = array<i64: 1, 384>}, {pipeline_mode = #tpu.pipeline_mode<synchronous>, transform_indices = @transform_3, window_bounds = array<i64: 128, 384>}, {pipeline_mode = #tpu.pipeline_mode<synchronous>, transform_indices = @transform_4, window_bounds = array<i64: 128, 384>}, {pipeline_mode = #tpu.pipeline_mode<synchronous>, transform_indices = @transform_5, window_bounds = array<i64: 1, 384>}, {pipeline_mode = #tpu.pipeline_mode<synchronous>, transform_indices = @transform_6, window_bounds = array<i64: 1, 384>}, {pipeline_mode = #tpu.pipeline_mode<synchronous>, transform_indices = @transform_7, window_bounds = array<i64: 1, 128>}, {pipeline_mode = #tpu.pipeline_mode<synchronous>, transform_indices = @transform_8, window_bounds = array<i64: 8, 128>}]} {
    %c0_i32 = arith.constant 0 : i32
    %0 = arith.cmpi eq, %arg0, %c0_i32 : i32
    %1 = arith.extui %0 : i1 to i32
    %c0_i32_0 = arith.constant 0 : i32
    %2 = arith.cmpi ne, %1, %c0_i32_0 : i32
    scf.if %2 {
      %cst_47 = arith.constant 0.000000e+00 : f32
      %105 = vector.broadcast %cst_47 : f32 to vector<8x128xf32>
      %c0_48 = arith.constant 0 : index
      %c0_49 = arith.constant 0 : index
      %106 = vector.load %arg10[%c0_48, %c0_49] : memref<8x128xf32, #tpu.memory_space<vmem>>, vector<8x128xf32>
      tpu.vector_store %arg10[%c0_48, %c0_49], %105 {strides = array<i32>} : memref<8x128xf32, #tpu.memory_space<vmem>>, vector<8x128xf32>,
      %cst_50 = arith.constant 0.000000e+00 : f32
      %107 = vector.broadcast %cst_50 : f32 to vector<8x128xf32>
      %c0_51 = arith.constant 0 : index
      %c0_52 = arith.constant 0 : index
      %108 = vector.load %arg11[%c0_51, %c0_52] : memref<8x128xf32, #tpu.memory_space<vmem>>, vector<8x128xf32>
      tpu.vector_store %arg11[%c0_51, %c0_52], %107 {strides = array<i32>} : memref<8x128xf32, #tpu.memory_space<vmem>>, vector<8x128xf32>,
      %cst_53 = arith.constant 0xFF800000 : f32
      %109 = vector.broadcast %cst_53 : f32 to vector<8x1xf32>
      %c0_54 = arith.constant 0 : index
      %c0_55 = arith.constant 0 : index
      %110 = vector.load %arg12[%c0_54, %c0_55] : memref<8x1xf32, #tpu.memory_space<vmem>>, vector<8x1xf32>
      tpu.vector_store %arg12[%c0_54, %c0_55], %109 {strides = array<i32>} : memref<8x1xf32, #tpu.memory_space<vmem>>, vector<8x1xf32>,
      %cst_56 = arith.constant 0.000000e+00 : f32
      %111 = vector.broadcast %cst_56 : f32 to vector<8x1xf32>
      %c0_57 = arith.constant 0 : index
      %c0_58 = arith.constant 0 : index
      %112 = vector.load %arg13[%c0_57, %c0_58] : memref<8x1xf32, #tpu.memory_space<vmem>>, vector<8x1xf32>
      tpu.vector_store %arg13[%c0_57, %c0_58], %111 {strides = array<i32>} : memref<8x1xf32, #tpu.memory_space<vmem>>, vector<8x1xf32>,
      %cst_59 = arith.constant 0.000000e+00 : f32
      %113 = vector.broadcast %cst_59 : f32 to vector<8x128xf32>
      %c0_60 = arith.constant 0 : index
      %c0_61 = arith.constant 0 : index
      %114 = vector.load %arg14[%c0_60, %c0_61] : memref<8x128xf32, #tpu.memory_space<vmem>>, vector<8x128xf32>
      tpu.vector_store %arg14[%c0_60, %c0_61], %113 {strides = array<i32>} : memref<8x128xf32, #tpu.memory_space<vmem>>, vector<8x128xf32>,
    } else {
    }
    %c0 = arith.constant 0 : index
    %c0_1 = arith.constant 0 : index
    %3 = vector.load %arg10[%c0, %c0_1] : memref<8x128xf32, #tpu.memory_space<vmem>>, vector<8x128xf32>
    %4 = arith.truncf %3 : vector<8x128xf32> to vector<8x128xbf16>
    %c0_2 = arith.constant 0 : index
    %c0_3 = arith.constant 0 : index
    %5 = vector.load %arg2[%c0_2, %c0_3] : memref<128x384xbf16, #tpu.memory_space<vmem>>, vector<128x384xbf16>
    %cst = arith.constant dense<0.000000e+00> : vector<8x384xf32>
    %6 = tpu.matmul %4, %5, %cst {dimension_numbers = #tpu.dot_dimension_numbers<[1], [0], [0], [1], [0, 0, 1, 1], [], []>} : vector<8x128xbf16>, vector<128x384xbf16>, vector<8x384xf32> -> vector<8x384xf32>
    %c0_4 = arith.constant 0 : index
    %c0_5 = arith.constant 0 : index
    %7 = vector.load %arg3[%c0_4, %c0_5] : memref<1x384xf32, #tpu.memory_space<vmem>>, vector<1x384xf32>
    %8 = vector.broadcast %7 : vector<1x384xf32> to vector<8x384xf32>
    %9 = arith.addf %6, %8 : vector<8x384xf32>
    %c0_6 = arith.constant 0 : index
    %c0_7 = arith.constant 0 : index
    %c0_8 = arith.constant 0 : index
    %10 = vector.load %arg1[%c0_6, %c0_7, %c0_8] : memref<1x8x384xf32, #tpu.memory_space<vmem>>, vector<1x8x384xf32>
    %11 = vector.shape_cast %10 : vector<1x8x384xf32> to vector<8x384xf32>
    %12 = vector.extract_strided_slice %11 {offsets = [0, 0], sizes = [8, 128], strides = [1, 1]} : vector<8x384xf32> to vector<8x128xf32>
    %13 = vector.extract_strided_slice %9 {offsets = [0, 0], sizes = [8, 128], strides = [1, 1]} : vector<8x384xf32> to vector<8x128xf32>
    %14 = arith.addf %12, %13 : vector<8x128xf32>
    %15 = arith.negf %14 : vector<8x128xf32>
    %16 = math.exp %15 : vector<8x128xf32>
    %cst_9 = arith.constant 1.000000e+00 : f32
    %17 = vector.broadcast %cst_9 : f32 to vector<8x128xf32>
    %18 = arith.addf %17, %16 : vector<8x128xf32>
    %19 = arith.divf %17, %18 : vector<8x128xf32>
    %20 = vector.extract_strided_slice %11 {offsets = [0, 128], sizes = [8, 128], strides = [1, 1]} : vector<8x384xf32> to vector<8x128xf32>
    %21 = vector.extract_strided_slice %9 {offsets = [0, 128], sizes = [8, 128], strides = [1, 1]} : vector<8x384xf32> to vector<8x128xf32>
    %22 = arith.addf %20, %21 : vector<8x128xf32>
    %23 = arith.negf %22 : vector<8x128xf32>
    %24 = math.exp %23 : vector<8x128xf32>
    %cst_10 = arith.constant 1.000000e+00 : f32
    %25 = vector.broadcast %cst_10 : f32 to vector<8x128xf32>
    %26 = arith.addf %25, %24 : vector<8x128xf32>
    %27 = arith.divf %25, %26 : vector<8x128xf32>
    %28 = vector.extract_strided_slice %11 {offsets = [0, 256], sizes = [8, 128], strides = [1, 1]} : vector<8x384xf32> to vector<8x128xf32>
    %29 = vector.extract_strided_slice %9 {offsets = [0, 256], sizes = [8, 128], strides = [1, 1]} : vector<8x384xf32> to vector<8x128xf32>
    %30 = arith.mulf %19, %29 : vector<8x128xf32>
    %31 = arith.addf %28, %30 : vector<8x128xf32>
    %32 = math.tanh %31 : vector<8x128xf32>
    %cst_11 = arith.constant 1.000000e+00 : f32
    %33 = vector.broadcast %cst_11 : f32 to vector<8x128xf32>
    %34 = arith.subf %33, %27 : vector<8x128xf32>
    %35 = arith.mulf %34, %32 : vector<8x128xf32>
    %36 = arith.mulf %27, %3 : vector<8x128xf32>
    %37 = arith.addf %35, %36 : vector<8x128xf32>
    %c0_12 = arith.constant 0 : index
    %c0_13 = arith.constant 0 : index
    %38 = vector.load %arg10[%c0_12, %c0_13] : memref<8x128xf32, #tpu.memory_space<vmem>>, vector<8x128xf32>
    tpu.vector_store %arg10[%c0_12, %c0_13], %37 {strides = array<i32>} : memref<8x128xf32, #tpu.memory_space<vmem>>, vector<8x128xf32>,
    %c0_14 = arith.constant 0 : index
    %c0_15 = arith.constant 0 : index
    %39 = vector.load %arg11[%c0_14, %c0_15] : memref<8x128xf32, #tpu.memory_space<vmem>>, vector<8x128xf32>
    %40 = arith.truncf %37 : vector<8x128xf32> to vector<8x128xbf16>
    %c0_16 = arith.constant 0 : index
    %c0_17 = arith.constant 0 : index
    %41 = vector.load %arg4[%c0_16, %c0_17] : memref<128x384xbf16, #tpu.memory_space<vmem>>, vector<128x384xbf16>
    %cst_18 = arith.constant dense<0.000000e+00> : vector<8x384xf32>
    %42 = tpu.matmul %40, %41, %cst_18 {dimension_numbers = #tpu.dot_dimension_numbers<[1], [0], [0], [1], [0, 0, 1, 1], [], []>} : vector<8x128xbf16>, vector<128x384xbf16>, vector<8x384xf32> -> vector<8x384xf32>
    %c0_19 = arith.constant 0 : index
    %c0_20 = arith.constant 0 : index
    %43 = vector.load %arg6[%c0_19, %c0_20] : memref<1x384xf32, #tpu.memory_space<vmem>>, vector<1x384xf32>
    %44 = vector.broadcast %43 : vector<1x384xf32> to vector<8x384xf32>
    %45 = arith.addf %42, %44 : vector<8x384xf32>
    %46 = arith.truncf %39 : vector<8x128xf32> to vector<8x128xbf16>
    %c0_21 = arith.constant 0 : index
    %c0_22 = arith.constant 0 : index
    %47 = vector.load %arg5[%c0_21, %c0_22] : memref<128x384xbf16, #tpu.memory_space<vmem>>, vector<128x384xbf16>
    %cst_23 = arith.constant dense<0.000000e+00> : vector<8x384xf32>
    %48 = tpu.matmul %46, %47, %cst_23 {dimension_numbers = #tpu.dot_dimension_numbers<[1], [0], [0], [1], [0, 0, 1, 1], [], []>} : vector<8x128xbf16>, vector<128x384xbf16>, vector<8x384xf32> -> vector<8x384xf32>
    %c0_24 = arith.constant 0 : index
    %c0_25 = arith.constant 0 : index
    %49 = vector.load %arg7[%c0_24, %c0_25] : memref<1x384xf32, #tpu.memory_space<vmem>>, vector<1x384xf32>
    %50 = vector.broadcast %49 : vector<1x384xf32> to vector<8x384xf32>
    %51 = arith.addf %48, %50 : vector<8x384xf32>
    %52 = vector.extract_strided_slice %45 {offsets = [0, 0], sizes = [8, 128], strides = [1, 1]} : vector<8x384xf32> to vector<8x128xf32>
    %53 = vector.extract_strided_slice %51 {offsets = [0, 0], sizes = [8, 128], strides = [1, 1]} : vector<8x384xf32> to vector<8x128xf32>
    %54 = arith.addf %52, %53 : vector<8x128xf32>
    %55 = arith.negf %54 : vector<8x128xf32>
    %56 = math.exp %55 : vector<8x128xf32>
    %cst_26 = arith.constant 1.000000e+00 : f32
    %57 = vector.broadcast %cst_26 : f32 to vector<8x128xf32>
    %58 = arith.addf %57, %56 : vector<8x128xf32>
    %59 = arith.divf %57, %58 : vector<8x128xf32>
    %60 = vector.extract_strided_slice %45 {offsets = [0, 128], sizes = [8, 128], strides = [1, 1]} : vector<8x384xf32> to vector<8x128xf32>
    %61 = vector.extract_strided_slice %51 {offsets = [0, 128], sizes = [8, 128], strides = [1, 1]} : vector<8x384xf32> to vector<8x128xf32>
    %62 = arith.addf %60, %61 : vector<8x128xf32>
    %63 = arith.negf %62 : vector<8x128xf32>
    %64 = math.exp %63 : vector<8x128xf32>
    %cst_27 = arith.constant 1.000000e+00 : f32
    %65 = vector.broadcast %cst_27 : f32 to vector<8x128xf32>
    %66 = arith.addf %65, %64 : vector<8x128xf32>
    %67 = arith.divf %65, %66 : vector<8x128xf32>
    %68 = vector.extract_strided_slice %45 {offsets = [0, 256], sizes = [8, 128], strides = [1, 1]} : vector<8x384xf32> to vector<8x128xf32>
    %69 = vector.extract_strided_slice %51 {offsets = [0, 256], sizes = [8, 128], strides = [1, 1]} : vector<8x384xf32> to vector<8x128xf32>
    %70 = arith.mulf %59, %69 : vector<8x128xf32>
    %71 = arith.addf %68, %70 : vector<8x128xf32>
    %72 = math.tanh %71 : vector<8x128xf32>
    %cst_28 = arith.constant 1.000000e+00 : f32
    %73 = vector.broadcast %cst_28 : f32 to vector<8x128xf32>
    %74 = arith.subf %73, %67 : vector<8x128xf32>
    %75 = arith.mulf %74, %72 : vector<8x128xf32>
    %76 = arith.mulf %67, %39 : vector<8x128xf32>
    %77 = arith.addf %75, %76 : vector<8x128xf32>
    %c0_29 = arith.constant 0 : index
    %c0_30 = arith.constant 0 : index
    %78 = vector.load %arg11[%c0_29, %c0_30] : memref<8x128xf32, #tpu.memory_space<vmem>>, vector<8x128xf32>
    tpu.vector_store %arg11[%c0_29, %c0_30], %77 {strides = array<i32>} : memref<8x128xf32, #tpu.memory_space<vmem>>, vector<8x128xf32>,
    %c0_31 = arith.constant 0 : index
    %c0_32 = arith.constant 0 : index
    %79 = vector.load %arg8[%c0_31, %c0_32] : memref<1x128xf32, #tpu.memory_space<vmem>>, vector<1x128xf32>
    %80 = vector.broadcast %79 : vector<1x128xf32> to vector<8x128xf32>
    %81 = arith.mulf %77, %80 : vector<8x128xf32>
    %cst_33 = arith.constant dense<0.000000e+00> : vector<8xf32>
    %82 = vector.multi_reduction <add>, %81, %cst_33 [1] : vector<8x128xf32> to vector<8xf32>
    %83 = vector.shape_cast %82 : vector<8xf32> to vector<8x1xf32>
    %c0_34 = arith.constant 0 : index
    %c0_35 = arith.constant 0 : index
    %84 = vector.load %arg12[%c0_34, %c0_35] : memref<8x1xf32, #tpu.memory_space<vmem>>, vector<8x1xf32>
    %85 = arith.maximumf %84, %83 : vector<8x1xf32>
    %86 = arith.subf %84, %85 : vector<8x1xf32>
    %87 = math.exp %86 : vector<8x1xf32>
    %88 = arith.subf %83, %85 : vector<8x1xf32>
    %89 = math.exp %88 : vector<8x1xf32>
    %c0_36 = arith.constant 0 : index
    %c0_37 = arith.constant 0 : index
    %90 = vector.load %arg13[%c0_36, %c0_37] : memref<8x1xf32, #tpu.memory_space<vmem>>, vector<8x1xf32>
    %91 = arith.mulf %87, %90 : vector<8x1xf32>
    %92 = arith.addf %91, %89 : vector<8x1xf32>
    %c0_38 = arith.constant 0 : index
    %c0_39 = arith.constant 0 : index
    %93 = vector.load %arg13[%c0_38, %c0_39] : memref<8x1xf32, #tpu.memory_space<vmem>>, vector<8x1xf32>
    tpu.vector_store %arg13[%c0_38, %c0_39], %92 {strides = array<i32>} : memref<8x1xf32, #tpu.memory_space<vmem>>, vector<8x1xf32>,
    %c0_40 = arith.constant 0 : index
    %c0_41 = arith.constant 0 : index
    %94 = vector.load %arg14[%c0_40, %c0_41] : memref<8x128xf32, #tpu.memory_space<vmem>>, vector<8x128xf32>
    %95 = vector.broadcast %87 : vector<8x1xf32> to vector<8x128xf32>
    %96 = arith.mulf %95, %94 : vector<8x128xf32>
    %97 = vector.broadcast %89 : vector<8x1xf32> to vector<8x128xf32>
    %98 = arith.mulf %97, %77 : vector<8x128xf32>
    %99 = arith.addf %96, %98 : vector<8x128xf32>
    %c0_42 = arith.constant 0 : index
    %c0_43 = arith.constant 0 : index
    %100 = vector.load %arg14[%c0_42, %c0_43] : memref<8x128xf32, #tpu.memory_space<vmem>>, vector<8x128xf32>
    tpu.vector_store %arg14[%c0_42, %c0_43], %99 {strides = array<i32>} : memref<8x128xf32, #tpu.memory_space<vmem>>, vector<8x128xf32>,
    %c0_44 = arith.constant 0 : index
    %c0_45 = arith.constant 0 : index
    %101 = vector.load %arg12[%c0_44, %c0_45] : memref<8x1xf32, #tpu.memory_space<vmem>>, vector<8x1xf32>
    tpu.vector_store %arg12[%c0_44, %c0_45], %85 {strides = array<i32>} : memref<8x1xf32, #tpu.memory_space<vmem>>, vector<8x1xf32>,
    %c3_i32 = arith.constant 3 : i32
    %102 = arith.cmpi eq, %arg0, %c3_i32 : i32
    %103 = arith.extui %102 : i1 to i32
    %c0_i32_46 = arith.constant 0 : i32
    %104 = arith.cmpi ne, %103, %c0_i32_46 : i32
    scf.if %104 {
      %c0_47 = arith.constant 0 : index
      %c0_48 = arith.constant 0 : index
      %105 = vector.load %arg14[%c0_47, %c0_48] : memref<8x128xf32, #tpu.memory_space<vmem>>, vector<8x128xf32>
      %c0_49 = arith.constant 0 : index
      %c0_50 = arith.constant 0 : index
      %106 = vector.load %arg13[%c0_49, %c0_50] : memref<8x1xf32, #tpu.memory_space<vmem>>, vector<8x1xf32>
      %107 = vector.broadcast %106 : vector<8x1xf32> to vector<8x128xf32>
      %108 = arith.divf %105, %107 : vector<8x128xf32>
      %c0_51 = arith.constant 0 : index
      %c0_52 = arith.constant 0 : index
      %109 = vector.load %arg9[%c0_51, %c0_52] : memref<8x128xf32, #tpu.memory_space<vmem>>, vector<8x128xf32>
      tpu.vector_store %arg9[%c0_51, %c0_52], %108 {strides = array<i32>} : memref<8x128xf32, #tpu.memory_space<vmem>>, vector<8x128xf32>,
    } else {
    }
    return
  }
  func.func @transform_0(%arg0: i32) -> (i32, i32, i32) {
    %c0_i32 = arith.constant 0 : i32
    %c0_i32_0 = arith.constant 0 : i32
    %c0_i32_1 = arith.constant 0 : i32
    return %arg0, %c0_i32, %c0_i32_0 : i32, i32, i32
  }
  func.func @transform_1(%arg0: i32) -> (i32, i32) {
    %c0_i32 = arith.constant 0 : i32
    %c0_i32_0 = arith.constant 0 : i32
    %c0_i32_1 = arith.constant 0 : i32
    return %c0_i32, %c0_i32_0 : i32, i32
  }
  func.func @transform_2(%arg0: i32) -> (i32, i32) {
    %c0_i32 = arith.constant 0 : i32
    %c0_i32_0 = arith.constant 0 : i32
    %c0_i32_1 = arith.constant 0 : i32
    return %c0_i32, %c0_i32_0 : i32, i32
  }
  func.func @transform_3(%arg0: i32) -> (i32, i32) {
    %c0_i32 = arith.constant 0 : i32
    %c0_i32_0 = arith.constant 0 : i32
    %c0_i32_1 = arith.constant 0 : i32
    return %c0_i32, %c0_i32_0 : i32, i32
  }
  func.func @transform_4(%arg0: i32) -> (i32, i32) {
    %c0_i32 = arith.constant 0 : i32
    %c0_i32_0 = arith.constant 0 : i32
    %c0_i32_1 = arith.constant 0 : i32
    return %c0_i32, %c0_i32_0 : i32, i32
  }
  func.func @transform_5(%arg0: i32) -> (i32, i32) {
    %c0_i32 = arith.constant 0 : i32
    %c0_i32_0 = arith.constant 0 : i32
    %c0_i32_1 = arith.constant 0 : i32
    return %c0_i32, %c0_i32_0 : i32, i32
  }
  func.func @transform_6(%arg0: i32) -> (i32, i32) {
    %c0_i32 = arith.constant 0 : i32
    %c0_i32_0 = arith.constant 0 : i32
    %c0_i32_1 = arith.constant 0 : i32
    return %c0_i32, %c0_i32_0 : i32, i32
  }
  func.func @transform_7(%arg0: i32) -> (i32, i32) {
    %c0_i32 = arith.constant 0 : i32
    %c0_i32_0 = arith.constant 0 : i32
    %c0_i32_1 = arith.constant 0 : i32
    return %c0_i32, %c0_i32_0 : i32, i32
  }
  func.func @transform_8(%arg0: i32) -> (i32, i32) {
    %c0_i32 = arith.constant 0 : i32
    %c0_i32_0 = arith.constant 0 : i32
    %c0_i32_1 = arith.constant 0 : i32
    return %c0_i32, %c0_i32_0 : i32, i32
  }
}

module attributes {stable_mosaic.version = 11 : i64} {
  func.func @_graph_head_kernel(%arg0: memref<8x128xf32, #tpu.memory_space<vmem>>, %arg1: memref<8x256xf32, #tpu.memory_space<vmem>>, %arg2: memref<512x128xbf16, #tpu.memory_space<vmem>>, %arg3: memref<1x128xf32, #tpu.memory_space<vmem>>, %arg4: memref<256x128xbf16, #tpu.memory_space<vmem>>, %arg5: memref<1x128xf32, #tpu.memory_space<vmem>>, %arg6: memref<128x128xbf16, #tpu.memory_space<vmem>>, %arg7: memref<1x128xf32, #tpu.memory_space<vmem>>, %arg8: memref<8x128xf32, #tpu.memory_space<vmem>>) attributes {dimension_semantics = [], scalar_prefetch = 0 : i64, scratch_operands = 0 : i64, tpu.core_type = #tpu.core_type<tc>} {
    %c0 = arith.constant 0 : index
    %c0_0 = arith.constant 0 : index
    %0 = vector.load %arg0[%c0, %c0_0] : memref<8x128xf32, #tpu.memory_space<vmem>>, vector<8x128xf32>
    %c0_1 = arith.constant 0 : index
    %c0_2 = arith.constant 0 : index
    %1 = vector.load %arg1[%c0_1, %c0_2] : memref<8x256xf32, #tpu.memory_space<vmem>>, vector<8x256xf32>
    %cst = arith.constant 0xFF800000 : f32
    %2 = vector.broadcast %cst : f32 to vector<8x256xf32>
    %3 = vector.extract_strided_slice %1 {offsets = [0, 0], sizes = [1, 256], strides = [1, 1]} : vector<8x256xf32> to vector<1x256xf32>
    %4 = vector.extract_strided_slice %0 {offsets = [0, 0], sizes = [8, 1], strides = [1, 1]} : vector<8x128xf32> to vector<8x1xf32>
    %cst_3 = arith.constant 0.000000e+00 : f32
    %5 = vector.broadcast %cst_3 : f32 to vector<8x1xf32>
    %6 = arith.cmpf ogt, %4, %5 : vector<8x1xf32>
    %7 = vector.broadcast %3 : vector<1x256xf32> to vector<8x256xf32>
    %8 = arith.maximumf %2, %7 : vector<8x256xf32>
    %9 = vector.shape_cast %6 : vector<8x1xi1> to vector<8x1xi1>
    %10 = vector.broadcast %9 : vector<8x1xi1> to vector<8x256xi1>
    %11 = arith.select %10, %8, %2 : vector<8x256xi1>, vector<8x256xf32>
    %12 = vector.extract_strided_slice %1 {offsets = [1, 0], sizes = [1, 256], strides = [1, 1]} : vector<8x256xf32> to vector<1x256xf32>
    %13 = vector.extract_strided_slice %0 {offsets = [0, 1], sizes = [8, 1], strides = [1, 1]} : vector<8x128xf32> to vector<8x1xf32>
    %cst_4 = arith.constant 0.000000e+00 : f32
    %14 = vector.broadcast %cst_4 : f32 to vector<8x1xf32>
    %15 = arith.cmpf ogt, %13, %14 : vector<8x1xf32>
    %16 = vector.broadcast %12 : vector<1x256xf32> to vector<8x256xf32>
    %17 = arith.maximumf %11, %16 : vector<8x256xf32>
    %18 = vector.shape_cast %15 : vector<8x1xi1> to vector<8x1xi1>
    %19 = vector.broadcast %18 : vector<8x1xi1> to vector<8x256xi1>
    %20 = arith.select %19, %17, %11 : vector<8x256xi1>, vector<8x256xf32>
    %21 = vector.extract_strided_slice %1 {offsets = [2, 0], sizes = [1, 256], strides = [1, 1]} : vector<8x256xf32> to vector<1x256xf32>
    %22 = vector.extract_strided_slice %0 {offsets = [0, 2], sizes = [8, 1], strides = [1, 1]} : vector<8x128xf32> to vector<8x1xf32>
    %cst_5 = arith.constant 0.000000e+00 : f32
    %23 = vector.broadcast %cst_5 : f32 to vector<8x1xf32>
    %24 = arith.cmpf ogt, %22, %23 : vector<8x1xf32>
    %25 = vector.broadcast %21 : vector<1x256xf32> to vector<8x256xf32>
    %26 = arith.maximumf %20, %25 : vector<8x256xf32>
    %27 = vector.shape_cast %24 : vector<8x1xi1> to vector<8x1xi1>
    %28 = vector.broadcast %27 : vector<8x1xi1> to vector<8x256xi1>
    %29 = arith.select %28, %26, %20 : vector<8x256xi1>, vector<8x256xf32>
    %30 = vector.extract_strided_slice %1 {offsets = [3, 0], sizes = [1, 256], strides = [1, 1]} : vector<8x256xf32> to vector<1x256xf32>
    %31 = vector.extract_strided_slice %0 {offsets = [0, 3], sizes = [8, 1], strides = [1, 1]} : vector<8x128xf32> to vector<8x1xf32>
    %cst_6 = arith.constant 0.000000e+00 : f32
    %32 = vector.broadcast %cst_6 : f32 to vector<8x1xf32>
    %33 = arith.cmpf ogt, %31, %32 : vector<8x1xf32>
    %34 = vector.broadcast %30 : vector<1x256xf32> to vector<8x256xf32>
    %35 = arith.maximumf %29, %34 : vector<8x256xf32>
    %36 = vector.shape_cast %33 : vector<8x1xi1> to vector<8x1xi1>
    %37 = vector.broadcast %36 : vector<8x1xi1> to vector<8x256xi1>
    %38 = arith.select %37, %35, %29 : vector<8x256xi1>, vector<8x256xf32>
    %39 = vector.extract_strided_slice %1 {offsets = [4, 0], sizes = [1, 256], strides = [1, 1]} : vector<8x256xf32> to vector<1x256xf32>
    %40 = vector.extract_strided_slice %0 {offsets = [0, 4], sizes = [8, 1], strides = [1, 1]} : vector<8x128xf32> to vector<8x1xf32>
    %cst_7 = arith.constant 0.000000e+00 : f32
    %41 = vector.broadcast %cst_7 : f32 to vector<8x1xf32>
    %42 = arith.cmpf ogt, %40, %41 : vector<8x1xf32>
    %43 = vector.broadcast %39 : vector<1x256xf32> to vector<8x256xf32>
    %44 = arith.maximumf %38, %43 : vector<8x256xf32>
    %45 = vector.shape_cast %42 : vector<8x1xi1> to vector<8x1xi1>
    %46 = vector.broadcast %45 : vector<8x1xi1> to vector<8x256xi1>
    %47 = arith.select %46, %44, %38 : vector<8x256xi1>, vector<8x256xf32>
    %48 = vector.extract_strided_slice %1 {offsets = [5, 0], sizes = [1, 256], strides = [1, 1]} : vector<8x256xf32> to vector<1x256xf32>
    %49 = vector.extract_strided_slice %0 {offsets = [0, 5], sizes = [8, 1], strides = [1, 1]} : vector<8x128xf32> to vector<8x1xf32>
    %cst_8 = arith.constant 0.000000e+00 : f32
    %50 = vector.broadcast %cst_8 : f32 to vector<8x1xf32>
    %51 = arith.cmpf ogt, %49, %50 : vector<8x1xf32>
    %52 = vector.broadcast %48 : vector<1x256xf32> to vector<8x256xf32>
    %53 = arith.maximumf %47, %52 : vector<8x256xf32>
    %54 = vector.shape_cast %51 : vector<8x1xi1> to vector<8x1xi1>
    %55 = vector.broadcast %54 : vector<8x1xi1> to vector<8x256xi1>
    %56 = arith.select %55, %53, %47 : vector<8x256xi1>, vector<8x256xf32>
    %57 = vector.extract_strided_slice %1 {offsets = [6, 0], sizes = [1, 256], strides = [1, 1]} : vector<8x256xf32> to vector<1x256xf32>
    %58 = vector.extract_strided_slice %0 {offsets = [0, 6], sizes = [8, 1], strides = [1, 1]} : vector<8x128xf32> to vector<8x1xf32>
    %cst_9 = arith.constant 0.000000e+00 : f32
    %59 = vector.broadcast %cst_9 : f32 to vector<8x1xf32>
    %60 = arith.cmpf ogt, %58, %59 : vector<8x1xf32>
    %61 = vector.broadcast %57 : vector<1x256xf32> to vector<8x256xf32>
    %62 = arith.maximumf %56, %61 : vector<8x256xf32>
    %63 = vector.shape_cast %60 : vector<8x1xi1> to vector<8x1xi1>
    %64 = vector.broadcast %63 : vector<8x1xi1> to vector<8x256xi1>
    %65 = arith.select %64, %62, %56 : vector<8x256xi1>, vector<8x256xf32>
    %66 = vector.extract_strided_slice %1 {offsets = [7, 0], sizes = [1, 256], strides = [1, 1]} : vector<8x256xf32> to vector<1x256xf32>
    %67 = vector.extract_strided_slice %0 {offsets = [0, 7], sizes = [8, 1], strides = [1, 1]} : vector<8x128xf32> to vector<8x1xf32>
    %cst_10 = arith.constant 0.000000e+00 : f32
    %68 = vector.broadcast %cst_10 : f32 to vector<8x1xf32>
    %69 = arith.cmpf ogt, %67, %68 : vector<8x1xf32>
    %70 = vector.broadcast %66 : vector<1x256xf32> to vector<8x256xf32>
    %71 = arith.maximumf %65, %70 : vector<8x256xf32>
    %72 = vector.shape_cast %69 : vector<8x1xi1> to vector<8x1xi1>
    %73 = vector.broadcast %72 : vector<8x1xi1> to vector<8x256xi1>
    %74 = arith.select %73, %71, %65 : vector<8x256xi1>, vector<8x256xf32>
    %cst_11 = arith.constant 0xFF800000 : f32
    %75 = vector.broadcast %cst_11 : f32 to vector<8x256xf32>
    %76 = arith.cmpf oeq, %74, %75 : vector<8x256xf32>
    %cst_12 = arith.constant 0.000000e+00 : f32
    %77 = vector.broadcast %cst_12 : f32 to vector<8x256xf32>
    %78 = arith.select %76, %77, %74 : vector<8x256xi1>, vector<8x256xf32>
    %79 = tpu.concatenate %78, %1 in 1 : vector<8x256xf32>, vector<8x256xf32> -> vector<8x512xf32>
    %80 = arith.truncf %79 : vector<8x512xf32> to vector<8x512xbf16>
    %c0_13 = arith.constant 0 : index
    %c0_14 = arith.constant 0 : index
    %81 = vector.load %arg2[%c0_13, %c0_14] : memref<512x128xbf16, #tpu.memory_space<vmem>>, vector<512x128xbf16>
    %cst_15 = arith.constant dense<0.000000e+00> : vector<8x128xf32>
    %82 = tpu.matmul %80, %81, %cst_15 {dimension_numbers = #tpu.dot_dimension_numbers<[1], [0], [0], [1], [0, 0, 1, 1], [], []>} : vector<8x512xbf16>, vector<512x128xbf16>, vector<8x128xf32> -> vector<8x128xf32>
    %c0_16 = arith.constant 0 : index
    %c0_17 = arith.constant 0 : index
    %83 = vector.load %arg3[%c0_16, %c0_17] : memref<1x128xf32, #tpu.memory_space<vmem>>, vector<1x128xf32>
    %84 = vector.broadcast %83 : vector<1x128xf32> to vector<8x128xf32>
    %85 = arith.addf %82, %84 : vector<8x128xf32>
    %cst_18 = arith.constant 0.000000e+00 : f32
    %86 = vector.broadcast %cst_18 : f32 to vector<8x128xf32>
    %87 = arith.maximumf %85, %86 : vector<8x128xf32>
    %cst_19 = arith.constant 0xFF800000 : f32
    %88 = vector.broadcast %cst_19 : f32 to vector<8x128xf32>
    %89 = vector.extract_strided_slice %87 {offsets = [0, 0], sizes = [1, 128], strides = [1, 1]} : vector<8x128xf32> to vector<1x128xf32>
    %90 = vector.extract_strided_slice %0 {offsets = [0, 0], sizes = [8, 1], strides = [1, 1]} : vector<8x128xf32> to vector<8x1xf32>
    %cst_20 = arith.constant 0.000000e+00 : f32
    %91 = vector.broadcast %cst_20 : f32 to vector<8x1xf32>
    %92 = arith.cmpf ogt, %90, %91 : vector<8x1xf32>
    %93 = vector.broadcast %89 : vector<1x128xf32> to vector<8x128xf32>
    %94 = arith.maximumf %88, %93 : vector<8x128xf32>
    %95 = vector.shape_cast %92 : vector<8x1xi1> to vector<8x1xi1>
    %96 = vector.broadcast %95 : vector<8x1xi1> to vector<8x128xi1>
    %97 = arith.select %96, %94, %88 : vector<8x128xi1>, vector<8x128xf32>
    %98 = vector.extract_strided_slice %87 {offsets = [1, 0], sizes = [1, 128], strides = [1, 1]} : vector<8x128xf32> to vector<1x128xf32>
    %99 = vector.extract_strided_slice %0 {offsets = [0, 1], sizes = [8, 1], strides = [1, 1]} : vector<8x128xf32> to vector<8x1xf32>
    %cst_21 = arith.constant 0.000000e+00 : f32
    %100 = vector.broadcast %cst_21 : f32 to vector<8x1xf32>
    %101 = arith.cmpf ogt, %99, %100 : vector<8x1xf32>
    %102 = vector.broadcast %98 : vector<1x128xf32> to vector<8x128xf32>
    %103 = arith.maximumf %97, %102 : vector<8x128xf32>
    %104 = vector.shape_cast %101 : vector<8x1xi1> to vector<8x1xi1>
    %105 = vector.broadcast %104 : vector<8x1xi1> to vector<8x128xi1>
    %106 = arith.select %105, %103, %97 : vector<8x128xi1>, vector<8x128xf32>
    %107 = vector.extract_strided_slice %87 {offsets = [2, 0], sizes = [1, 128], strides = [1, 1]} : vector<8x128xf32> to vector<1x128xf32>
    %108 = vector.extract_strided_slice %0 {offsets = [0, 2], sizes = [8, 1], strides = [1, 1]} : vector<8x128xf32> to vector<8x1xf32>
    %cst_22 = arith.constant 0.000000e+00 : f32
    %109 = vector.broadcast %cst_22 : f32 to vector<8x1xf32>
    %110 = arith.cmpf ogt, %108, %109 : vector<8x1xf32>
    %111 = vector.broadcast %107 : vector<1x128xf32> to vector<8x128xf32>
    %112 = arith.maximumf %106, %111 : vector<8x128xf32>
    %113 = vector.shape_cast %110 : vector<8x1xi1> to vector<8x1xi1>
    %114 = vector.broadcast %113 : vector<8x1xi1> to vector<8x128xi1>
    %115 = arith.select %114, %112, %106 : vector<8x128xi1>, vector<8x128xf32>
    %116 = vector.extract_strided_slice %87 {offsets = [3, 0], sizes = [1, 128], strides = [1, 1]} : vector<8x128xf32> to vector<1x128xf32>
    %117 = vector.extract_strided_slice %0 {offsets = [0, 3], sizes = [8, 1], strides = [1, 1]} : vector<8x128xf32> to vector<8x1xf32>
    %cst_23 = arith.constant 0.000000e+00 : f32
    %118 = vector.broadcast %cst_23 : f32 to vector<8x1xf32>
    %119 = arith.cmpf ogt, %117, %118 : vector<8x1xf32>
    %120 = vector.broadcast %116 : vector<1x128xf32> to vector<8x128xf32>
    %121 = arith.maximumf %115, %120 : vector<8x128xf32>
    %122 = vector.shape_cast %119 : vector<8x1xi1> to vector<8x1xi1>
    %123 = vector.broadcast %122 : vector<8x1xi1> to vector<8x128xi1>
    %124 = arith.select %123, %121, %115 : vector<8x128xi1>, vector<8x128xf32>
    %125 = vector.extract_strided_slice %87 {offsets = [4, 0], sizes = [1, 128], strides = [1, 1]} : vector<8x128xf32> to vector<1x128xf32>
    %126 = vector.extract_strided_slice %0 {offsets = [0, 4], sizes = [8, 1], strides = [1, 1]} : vector<8x128xf32> to vector<8x1xf32>
    %cst_24 = arith.constant 0.000000e+00 : f32
    %127 = vector.broadcast %cst_24 : f32 to vector<8x1xf32>
    %128 = arith.cmpf ogt, %126, %127 : vector<8x1xf32>
    %129 = vector.broadcast %125 : vector<1x128xf32> to vector<8x128xf32>
    %130 = arith.maximumf %124, %129 : vector<8x128xf32>
    %131 = vector.shape_cast %128 : vector<8x1xi1> to vector<8x1xi1>
    %132 = vector.broadcast %131 : vector<8x1xi1> to vector<8x128xi1>
    %133 = arith.select %132, %130, %124 : vector<8x128xi1>, vector<8x128xf32>
    %134 = vector.extract_strided_slice %87 {offsets = [5, 0], sizes = [1, 128], strides = [1, 1]} : vector<8x128xf32> to vector<1x128xf32>
    %135 = vector.extract_strided_slice %0 {offsets = [0, 5], sizes = [8, 1], strides = [1, 1]} : vector<8x128xf32> to vector<8x1xf32>
    %cst_25 = arith.constant 0.000000e+00 : f32
    %136 = vector.broadcast %cst_25 : f32 to vector<8x1xf32>
    %137 = arith.cmpf ogt, %135, %136 : vector<8x1xf32>
    %138 = vector.broadcast %134 : vector<1x128xf32> to vector<8x128xf32>
    %139 = arith.maximumf %133, %138 : vector<8x128xf32>
    %140 = vector.shape_cast %137 : vector<8x1xi1> to vector<8x1xi1>
    %141 = vector.broadcast %140 : vector<8x1xi1> to vector<8x128xi1>
    %142 = arith.select %141, %139, %133 : vector<8x128xi1>, vector<8x128xf32>
    %143 = vector.extract_strided_slice %87 {offsets = [6, 0], sizes = [1, 128], strides = [1, 1]} : vector<8x128xf32> to vector<1x128xf32>
    %144 = vector.extract_strided_slice %0 {offsets = [0, 6], sizes = [8, 1], strides = [1, 1]} : vector<8x128xf32> to vector<8x1xf32>
    %cst_26 = arith.constant 0.000000e+00 : f32
    %145 = vector.broadcast %cst_26 : f32 to vector<8x1xf32>
    %146 = arith.cmpf ogt, %144, %145 : vector<8x1xf32>
    %147 = vector.broadcast %143 : vector<1x128xf32> to vector<8x128xf32>
    %148 = arith.maximumf %142, %147 : vector<8x128xf32>
    %149 = vector.shape_cast %146 : vector<8x1xi1> to vector<8x1xi1>
    %150 = vector.broadcast %149 : vector<8x1xi1> to vector<8x128xi1>
    %151 = arith.select %150, %148, %142 : vector<8x128xi1>, vector<8x128xf32>
    %152 = vector.extract_strided_slice %87 {offsets = [7, 0], sizes = [1, 128], strides = [1, 1]} : vector<8x128xf32> to vector<1x128xf32>
    %153 = vector.extract_strided_slice %0 {offsets = [0, 7], sizes = [8, 1], strides = [1, 1]} : vector<8x128xf32> to vector<8x1xf32>
    %cst_27 = arith.constant 0.000000e+00 : f32
    %154 = vector.broadcast %cst_27 : f32 to vector<8x1xf32>
    %155 = arith.cmpf ogt, %153, %154 : vector<8x1xf32>
    %156 = vector.broadcast %152 : vector<1x128xf32> to vector<8x128xf32>
    %157 = arith.maximumf %151, %156 : vector<8x128xf32>
    %158 = vector.shape_cast %155 : vector<8x1xi1> to vector<8x1xi1>
    %159 = vector.broadcast %158 : vector<8x1xi1> to vector<8x128xi1>
    %160 = arith.select %159, %157, %151 : vector<8x128xi1>, vector<8x128xf32>
    %cst_28 = arith.constant 0xFF800000 : f32
    %161 = vector.broadcast %cst_28 : f32 to vector<8x128xf32>
    %162 = arith.cmpf oeq, %160, %161 : vector<8x128xf32>
    %cst_29 = arith.constant 0.000000e+00 : f32
    %163 = vector.broadcast %cst_29 : f32 to vector<8x128xf32>
    %164 = arith.select %162, %163, %160 : vector<8x128xi1>, vector<8x128xf32>
    %165 = tpu.concatenate %164, %87 in 1 : vector<8x128xf32>, vector<8x128xf32> -> vector<8x256xf32>
    %166 = arith.truncf %165 : vector<8x256xf32> to vector<8x256xbf16>
    %c0_30 = arith.constant 0 : index
    %c0_31 = arith.constant 0 : index
    %167 = vector.load %arg4[%c0_30, %c0_31] : memref<256x128xbf16, #tpu.memory_space<vmem>>, vector<256x128xbf16>
    %cst_32 = arith.constant dense<0.000000e+00> : vector<8x128xf32>
    %168 = tpu.matmul %166, %167, %cst_32 {dimension_numbers = #tpu.dot_dimension_numbers<[1], [0], [0], [1], [0, 0, 1, 1], [], []>} : vector<8x256xbf16>, vector<256x128xbf16>, vector<8x128xf32> -> vector<8x128xf32>
    %c0_33 = arith.constant 0 : index
    %c0_34 = arith.constant 0 : index
    %169 = vector.load %arg5[%c0_33, %c0_34] : memref<1x128xf32, #tpu.memory_space<vmem>>, vector<1x128xf32>
    %170 = vector.broadcast %169 : vector<1x128xf32> to vector<8x128xf32>
    %171 = arith.addf %168, %170 : vector<8x128xf32>
    %cst_35 = arith.constant 0.000000e+00 : f32
    %172 = vector.broadcast %cst_35 : f32 to vector<8x128xf32>
    %173 = arith.maximumf %171, %172 : vector<8x128xf32>
    %174 = arith.truncf %173 : vector<8x128xf32> to vector<8x128xbf16>
    %c0_36 = arith.constant 0 : index
    %c0_37 = arith.constant 0 : index
    %175 = vector.load %arg6[%c0_36, %c0_37] : memref<128x128xbf16, #tpu.memory_space<vmem>>, vector<128x128xbf16>
    %cst_38 = arith.constant dense<0.000000e+00> : vector<8x128xf32>
    %176 = tpu.matmul %174, %175, %cst_38 {dimension_numbers = #tpu.dot_dimension_numbers<[1], [0], [0], [1], [0, 0, 1, 1], [], []>} : vector<8x128xbf16>, vector<128x128xbf16>, vector<8x128xf32> -> vector<8x128xf32>
    %c0_39 = arith.constant 0 : index
    %c0_40 = arith.constant 0 : index
    %177 = vector.load %arg7[%c0_39, %c0_40] : memref<1x128xf32, #tpu.memory_space<vmem>>, vector<1x128xf32>
    %178 = vector.broadcast %177 : vector<1x128xf32> to vector<8x128xf32>
    %179 = arith.addf %176, %178 : vector<8x128xf32>
    %c0_41 = arith.constant 0 : index
    %c0_42 = arith.constant 0 : index
    %180 = vector.load %arg8[%c0_41, %c0_42] : memref<8x128xf32, #tpu.memory_space<vmem>>, vector<8x128xf32>
    tpu.vector_store %arg8[%c0_41, %c0_42], %179 {strides = array<i32>} : memref<8x128xf32, #tpu.memory_space<vmem>>, vector<8x128xf32>,
    return
  }
}

</mosaic_0001>

<bundles_post_ra>
// kernel: tsfn_forward.5
= control target key start
LH: loop header
LB: loop body
LE: loop exit
PB: predicated region body
PF: predicated region fallthrough
CT: control target
= control target key end

     0   :  { %s1239_s12 = smov 0   ;;  %s1453_s0 = inlined_call_operand.vmem [shape: bf16[19456,128], index: 0, kind: input, shape index: {}]   ;;  %s1454_s1 = inlined_call_operand.vmem [shape: bf16[128,128], index: 1, kind: input, shape index: {}]   ;;  %s1455_s2 = inlined_call_operand.vmem [shape: f32[1,128], index: 2, kind: input, shape index: {}]   ;;  %s1456_s3 = inlined_call_operand.vmem [shape: f32[19456,128], index: 3, kind: output, shape index: {}]  }
   0x1 LB: > { %s975_s13 = sadd.s32 4294967295, %s1217_s12   ;;  %p979_p0 = scmp.ge.s32.totalorder %s1217_s12, 1  ;;  %s1217_s12 = sphi %s1239_s12, %s13_s12  }
   0x2   : > { %p138_p1 = scmp.lt.s32.totalorder %s1217_s12, 39 }
   0x4   : > { %p139_p2 = pnand %p979_p0, %p138_p1 }
   0x5   : > { %v1171_v0 = vld [vmem:[%s1454_s1] sm:$0xff] (!%p139_p2)   ;;  %s980_s16 = sshll.u32 (!%p139_p2), %s975_s13, 6  ;;  %v1172_v1 = vld [vmem:[%s1454_s1 + $0x8] sm:$0xff] (!%p139_p2)   ;;  %v1173_v2 = vld [vmem:[%s1454_s1 + $0x10] sm:$0xff] (!%p139_p2)  }
   0x6   : > { %142 = sbr.rel (%p139_p2) target bundleno = 314 (0x13a), region = 32  ;;  %p163_p3 = scmp.lt.s32.totalorder (!%p139_p2), %s980_s16, 2431  ;;  %1067 = vmatprep.subr.bf16.mxu0 (!%p139_p2), %v1171_v0  ;;  %1147 = vmatprep.subr.bf16.mxu1 (!%p139_p2), %v1171_v0  ;;  %v1174_v3 = vld [vmem:[%s1454_s1 + $0x18] sm:$0xff] (!%p139_p2)   ;;  %v1175_v6 = vld [vmem:[%s1454_s1 + $0x20] sm:$0xff] (!%p139_p2)   ;;  %v1176_v7 = vld [vmem:[%s1454_s1 + $0x28] sm:$0xff] (!%p139_p2)  }
   0x7   : > { %1068 = vmatpush3.bf16.msra.mxu0 (!%p139_p2), %v1171_v0  ;;  %1155 = vmatpush3.bf16.msra.mxu1 (!%p139_p2), %v1171_v0  ;;  %v1177_v8 = vld [vmem:[%s1454_s1 + $0x30] sm:$0xff] (!%p139_p2)   ;;  %v1178_v9 = vld [vmem:[%s1454_s1 + $0x38] sm:$0xff] (!%p139_p2)   ;;  %v1314_v40 = vld [vmem:[%s1455_s2] ss:$0 sm:$0xff] (!%p139_p2) }
   0x8   : > { %1069 = vmatprep.subr.bf16.mxu0 (!%p139_p2), %v1172_v1  ;;  %1148 = vmatprep.subr.bf16.mxu1 (!%p139_p2), %v1172_v1 }
   0xb   : > { %1070 = vmatpush3.bf16.msra.mxu0 (!%p139_p2), %v1172_v1  ;;  %1156 = vmatpush3.bf16.msra.mxu1 (!%p139_p2), %v1172_v1 }
   0xc   : > { %1071 = vmatprep.subr.bf16.mxu0 (!%p139_p2), %v1173_v2  ;;  %1149 = vmatprep.subr.bf16.mxu1 (!%p139_p2), %v1173_v2 }
   0xd   : > { %s1458_s16 = smov (!%p163_p3, %s980_s16), 2431 }
   0xe   : > { %s981_s21 = sshll.u32 %s1458_s16, 2  ;;  %s983_s10 = sshll.u32 %s1458_s16, 3 }
   0xf   : > { %s1262_s24 = scalar_lea.vmem %s1453_s0, %s981_s21  ;;  %1072 = vmatpush3.bf16.msra.mxu0 %v1173_v2  ;;  %1157 = vmatpush3.bf16.msra.mxu1 %v1173_v2  ;;  %s1322_s14 = scalar_lea.vmem %s1456_s3, %s983_s10 }
  0x10   : > { %v1179_v4 = vld [vmem:[%s1262_s24] sm:$0xff]   ;;  %1073 = vmatprep.subr.bf16.mxu0 %v1174_v3  ;;  %1150 = vmatprep.subr.bf16.mxu1 %v1174_v3  ;;  %v1181_v10 = vld [vmem:[%s1262_s24 + $0x8] sm:$0xff]   ;;  %v1183_v12 = vld [vmem:[%s1262_s24 + $0x10] sm:$0xff]  }
  0x11   : > { %v1180_v5 = vld [vmem:[%s1262_s24 + $0x80] sm:$0xff]   ;;  %1083 = vmatprep.mubr.bf16.mxu0 %v1179_v4  ;;  %v1182_v11 = vld [vmem:[%s1262_s24 + $0x88] sm:$0xff]   ;;  %v1184_v13 = vld [vmem:[%s1262_s24 + $0x90] sm:$0xff]  }
  0x12   : > { %1115 = vmatprep.mubr.bf16.mxu1 %v1180_v5  ;;  %v1185_v14 = vld [vmem:[%s1262_s24 + $0x18] sm:$0xff]   ;;  %v1187_v16 = vld [vmem:[%s1262_s24 + $0x20] sm:$0xff]   ;;  %v1189_v18 = vld [vmem:[%s1262_s24 + $0x28] sm:$0xff]  }
  0x13   : > { %1074 = vmatpush3.bf16.msra.mxu0 %v1174_v3  ;;  %1158 = vmatpush3.bf16.msra.mxu1 %v1174_v3  ;;  %v1186_v15 = vld [vmem:[%s1262_s24 + $0x98] sm:$0xff]   ;;  %v1188_v17 = vld [vmem:[%s1262_s24 + $0xa0] sm:$0xff]   ;;  %v1190_v19 = vld [vmem:[%s1262_s24 + $0xa8] sm:$0xff]  }
  0x14   : > { %1075 = vmatprep.subr.bf16.mxu0 %v1175_v6  ;;  %1151 = vmatprep.subr.bf16.mxu1 %v1175_v6  ;;  %v1191_v20 = vld [vmem:[%s1262_s24 + $0x30] sm:$0xff]   ;;  %v1193_v22 = vld [vmem:[%s1262_s24 + $0x38] sm:$0xff]   ;;  %v1195_v24 = vld [vmem:[%s1262_s24 + $0x40] sm:$0xff]  }
  0x15   : > { %v1192_v21 = vld [vmem:[%s1262_s24 + $0xb0] sm:$0xff]   ;;  %v1194_v23 = vld [vmem:[%s1262_s24 + $0xb8] sm:$0xff]   ;;  %v1196_v25 = vld [vmem:[%s1262_s24 + $0xc0] sm:$0xff]  }
  0x16   : > { %v1197_v26 = vld [vmem:[%s1262_s24 + $0x48] sm:$0xff]   ;;  %v1199_v28 = vld [vmem:[%s1262_s24 + $0x50] sm:$0xff]   ;;  %v1201_v30 = vld [vmem:[%s1262_s24 + $0x58] sm:$0xff]  }
  0x17   : > { %1076 = vmatpush3.bf16.msra.mxu0 %v1175_v6  ;;  %1159 = vmatpush3.bf16.msra.mxu1 %v1175_v6  ;;  %v1198_v27 = vld [vmem:[%s1262_s24 + $0xc8] sm:$0xff]   ;;  %v1200_v29 = vld [vmem:[%s1262_s24 + $0xd0] sm:$0xff]   ;;  %v1202_v31 = vld [vmem:[%s1262_s24 + $0xd8] sm:$0xff]  }
  0x18   : > { %1077 = vmatprep.subr.bf16.mxu0 %v1176_v7  ;;  %1152 = vmatprep.subr.bf16.mxu1 %v1176_v7  ;;  %v1203_v32 = vld [vmem:[%s1262_s24 + $0x60] sm:$0xff]   ;;  %v1205_v34 = vld [vmem:[%s1262_s24 + $0x68] sm:$0xff]   ;;  %v1207_v36 = vld [vmem:[%s1262_s24 + $0x70] sm:$0xff]  }
  0x19   : > { %v1204_v33 = vld [vmem:[%s1262_s24 + $0xe0] sm:$0xff]   ;;  %v1206_v35 = vld [vmem:[%s1262_s24 + $0xe8] sm:$0xff]   ;;  %v1208_v37 = vld [vmem:[%s1262_s24 + $0xf0] sm:$0xff]  }
  0x1a   : > { %v1209_v38 = vld [vmem:[%s1262_s24 + $0x78] sm:$0xff]  }
  0x1b   : > { %1078 = vmatpush3.bf16.msra.mxu0 %v1176_v7  ;;  %1160 = vmatpush3.bf16.msra.mxu1 %v1176_v7  ;;  %v1210_v39 = vld [vmem:[%s1262_s24 + $0xf8] sm:$0xff]  }
  0x1c   : > { %1079 = vmatprep.subr.bf16.mxu0 %v1177_v8  ;;  %1153 = vmatprep.subr.bf16.mxu1 %v1177_v8 }
  0x1f   : > { %1080 = vmatpush3.bf16.msra.mxu0 %v1177_v8  ;;  %1161 = vmatpush3.bf16.msra.mxu1 %v1177_v8 }
  0x20   : > { %1081 = vmatprep.subr.bf16.mxu0 %v1178_v9  ;;  %1154 = vmatprep.subr.bf16.mxu1 %v1178_v9 }
  0x23   : > { %1082 = vmatpush3.bf16.msra.mxu0 %v1178_v9  ;;  %1162 = vmatpush3.bf16.msra.mxu1 %v1178_v9 }
  0x26   : > { %1084 = vmatmul.mubr.bf16.vlgmr.msra.gmra.mrb[0].mxu0 %v1181_v10  ;;  %1116 = vmatmul.mubr.bf16.vlgmr.msra.gmra.mrb[0].mxu1 %v1182_v11 }
  0x27   : > { %1087 = vmatprep.mubr.bf16.mxu0 %v1183_v12  ;;  %1119 = vmatprep.mubr.bf16.mxu1 %v1184_v13 }
  0x2e   : > { %1088 = vmatmul.mubr.bf16.gmra.mrb[4].mxu0 %v1185_v14  ;;  %1120 = vmatmul.mubr.bf16.gmra.mrb[4].mxu1 %v1186_v15 }
  0x2f   : > { %1091 = vmatprep.mubr.bf16.mxu0 %v1187_v16  ;;  %1123 = vmatprep.mubr.bf16.mxu1 %v1188_v17 }
  0x36   : > { %1092 = vmatmul.mubr.bf16.gmra.mrb[8].mxu0 %v1189_v18  ;;  %1124 = vmatmul.mubr.bf16.gmra.mrb[8].mxu1 %v1190_v19 }
  0x37   : > { %1095 = vmatprep.mubr.bf16.mxu0 %v1191_v20  ;;  %1127 = vmatprep.mubr.bf16.mxu1 %v1192_v21 }
  0x3e   : > { %1096 = vmatmul.mubr.bf16.gmra.mrb[12].mxu0 %v1193_v22  ;;  %1128 = vmatmul.mubr.bf16.gmra.mrb[12].mxu1 %v1194_v23 }
  0x3f   : > { %1099 = vmatprep.mubr.bf16.mxu0 %v1195_v24  ;;  %1131 = vmatprep.mubr.bf16.mxu1 %v1196_v25 }
  0x46   : > { %1100 = vmatmul.mubr.bf16.gmra.mrb[16].mxu0 %v1197_v26  ;;  %1132 = vmatmul.mubr.bf16.gmra.mrb[16].mxu1 %v1198_v27 }
  0x47   : > { %1103 = vmatprep.mubr.bf16.mxu0 %v1199_v28  ;;  %1135 = vmatprep.mubr.bf16.mxu1 %v1200_v29 }
  0x4e   : > { %1104 = vmatmul.mubr.bf16.gmra.mrb[20].mxu0 %v1201_v30  ;;  %1136 = vmatmul.mubr.bf16.gmra.mrb[20].mxu1 %v1202_v31 }
  0x4f   : > { %1107 = vmatprep.mubr.bf16.mxu0 %v1203_v32  ;;  %1139 = vmatprep.mubr.bf16.mxu1 %v1204_v33 }
  0x56   : > { %1108 = vmatmul.mubr.bf16.gmra.mrb[24].mxu0 %v1205_v34  ;;  %1140 = vmatmul.mubr.bf16.gmra.mrb[24].mxu1 %v1206_v35 }
  0x57   : > { %1111 = vmatprep.mubr.bf16.mxu0 %v1207_v36  ;;  %1143 = vmatprep.mubr.bf16.mxu1 %v1208_v37 }
  0x5e   : > { %1112 = vmatmul.mubr.bf16.gmra.mrb[28].mxu0 %v1209_v38  ;;  %1144 = vmatmul.mubr.bf16.gmra.mrb[28].mxu1 %v1210_v39 }
  0xf9   : > { %v1085_v41 = vpop.f32.mrb[0].mxu0  ;;  %v1117_v42 = vpop.f32.mrb[0].mxu1 }
  0xfa   : > { %v545_v43 = vadd.f32 %v1085_v41, %v1314_v40  ;;  %v673_v44 = vadd.f32 %v1117_v42, %v1314_v40  ;;  %v536_v45 = vpop.f32.mrb[1].mxu0  ;;  %v664_v46 = vpop.f32.mrb[1].mxu1 }
  0xfb   : > { %v537_v47 = vadd.f32 %v1314_v40, %v536_v45  ;;  %v665_v48 = vadd.f32 %v1314_v40, %v664_v46  ;;  %v1086_v49 = vpop.f32.mrb[2].mxu0  ;;  %v1118_v50 = vpop.f32.mrb[2].mxu1 }
  0xfc   : > { %v793_v51 = vmax.f32 %v545_v43, 0.0  ;;  %v825_v52 = vmax.f32 %v673_v44, 0.0  ;;  %v548_v53 = vadd.f32 %v1086_v49, %v1314_v40  ;;  %v676_v54 = vadd.f32 %v1118_v50, %v1314_v40  ;;  %v539_v55 = vpop.f32.mrb[3].mxu0  ;;  %v667_v56 = vpop.f32.mrb[3].mxu1 }
  0xfd   : > { %v791_v57 = vmax.f32 %v537_v47, 0.0  ;;  %v823_v58 = vmax.f32 %v665_v48, 0.0  ;;  %v540_v59 = vadd.f32 %v1314_v40, %v539_v55  ;;  %v668_v60 = vadd.f32 %v1314_v40, %v667_v56 }
  0xfe   : > { %857 = vst [vmem:[%s1322_s14 + $0x10] sm:$0xff] %v793_v51  ;;  %889 = vst [vmem:[%s1322_s14 + $0x110] sm:$0xff] %v825_v52  ;;  %v794_v61 = vmax.f32 %v548_v53, 0.0  ;;  %v826_v62 = vmax.f32 %v676_v54, 0.0 }
  0xff   : > { %855 = vst [vmem:[%s1322_s14] sm:$0xff] %v791_v57  ;;  %887 = vst [vmem:[%s1322_s14 + $0x100] sm:$0xff] %v823_v58  ;;  %v792_v63 = vmax.f32 %v540_v59, 0.0  ;;  %v824_v0 = vmax.f32 %v668_v60, 0.0 }
 0x100   : > { %858 = vst [vmem:[%s1322_s14 + $0x18] sm:$0xff] %v794_v61  ;;  %890 = vst [vmem:[%s1322_s14 + $0x118] sm:$0xff] %v826_v62 }
 0x101   : > { %856 = vst [vmem:[%s1322_s14 + $0x8] sm:$0xff] %v792_v63  ;;  %888 = vst [vmem:[%s1322_s14 + $0x108] sm:$0xff] %v824_v0  ;;  %v1089_v1 = vpop.f32.mrb[4].mxu0  ;;  %v1121_v2 = vpop.f32.mrb[4].mxu1 }
 0x102   : > { %v561_v3 = vadd.f32 %v1089_v1, %v1314_v40  ;;  %v689_v4 = vadd.f32 %v1121_v2, %v1314_v40  ;;  %v552_v5 = vpop.f32.mrb[5].mxu0  ;;  %v680_v6 = vpop.f32.mrb[5].mxu1 }
 0x103   : > { %v553_v7 = vadd.f32 %v1314_v40, %v552_v5  ;;  %v681_v8 = vadd.f32 %v1314_v40, %v680_v6  ;;  %v1090_v9 = vpop.f32.mrb[6].mxu0  ;;  %v1122_v10 = vpop.f32.mrb[6].mxu1 }
 0x104   : > { %v797_v11 = vmax.f32 %v561_v3, 0.0  ;;  %v829_v12 = vmax.f32 %v689_v4, 0.0  ;;  %v564_v13 = vadd.f32 %v1090_v9, %v1314_v40  ;;  %v692_v14 = vadd.f32 %v1122_v10, %v1314_v40  ;;  %v555_v15 = vpop.f32.mrb[7].mxu0  ;;  %v683_v16 = vpop.f32.mrb[7].mxu1 }
 0x105   : > { %v795_v17 = vmax.f32 %v553_v7, 0.0  ;;  %v827_v18 = vmax.f32 %v681_v8, 0.0  ;;  %v556_v19 = vadd.f32 %v1314_v40, %v555_v15  ;;  %v684_v20 = vadd.f32 %v1314_v40, %v683_v16 }
 0x106   : > { %861 = vst [vmem:[%s1322_s14 + $0x30] sm:$0xff] %v797_v11  ;;  %893 = vst [vmem:[%s1322_s14 + $0x130] sm:$0xff] %v829_v12  ;;  %v798_v21 = vmax.f32 %v564_v13, 0.0  ;;  %v830_v22 = vmax.f32 %v692_v14, 0.0 }
 0x107   : > { %859 = vst [vmem:[%s1322_s14 + $0x20] sm:$0xff] %v795_v17  ;;  %891 = vst [vmem:[%s1322_s14 + $0x120] sm:$0xff] %v827_v18  ;;  %v796_v23 = vmax.f32 %v556_v19, 0.0  ;;  %v828_v24 = vmax.f32 %v684_v20, 0.0 }
 0x108   : > { %862 = vst [vmem:[%s1322_s14 + $0x38] sm:$0xff] %v798_v21  ;;  %894 = vst [vmem:[%s1322_s14 + $0x138] sm:$0xff] %v830_v22 }
 0x109   : > { %860 = vst [vmem:[%s1322_s14 + $0x28] sm:$0xff] %v796_v23  ;;  %892 = vst [vmem:[%s1322_s14 + $0x128] sm:$0xff] %v828_v24  ;;  %v1093_v25 = vpop.f32.mrb[8].mxu0  ;;  %v1125_v26 = vpop.f32.mrb[8].mxu1 }
 0x10a   : > { %v577_v27 = vadd.f32 %v1093_v25, %v1314_v40  ;;  %v705_v28 = vadd.f32 %v1125_v26, %v1314_v40  ;;  %v568_v29 = vpop.f32.mrb[9].mxu0  ;;  %v696_v30 = vpop.f32.mrb[9].mxu1 }
 0x10b   : > { %v569_v31 = vadd.f32 %v1314_v40, %v568_v29  ;;  %v697_v32 = vadd.f32 %v1314_v40, %v696_v30  ;;  %v1094_v33 = vpop.f32.mrb[10].mxu0  ;;  %v1126_v34 = vpop.f32.mrb[10].mxu1 }
 0x10c   : > { %v801_v35 = vmax.f32 %v577_v27, 0.0  ;;  %v833_v36 = vmax.f32 %v705_v28, 0.0  ;;  %v580_v37 = vadd.f32 %v1094_v33, %v1314_v40  ;;  %v708_v38 = vadd.f32 %v1126_v34, %v1314_v40  ;;  %v571_v39 = vpop.f32.mrb[11].mxu0  ;;  %v699_v41 = vpop.f32.mrb[11].mxu1 }
 0x10d   : > { %v799_v42 = vmax.f32 %v569_v31, 0.0  ;;  %v831_v43 = vmax.f32 %v697_v32, 0.0  ;;  %v572_v44 = vadd.f32 %v1314_v40, %v571_v39  ;;  %v700_v45 = vadd.f32 %v1314_v40, %v699_v41 }
 0x10e   : > { %865 = vst [vmem:[%s1322_s14 + $0x50] sm:$0xff] %v801_v35  ;;  %897 = vst [vmem:[%s1322_s14 + $0x150] sm:$0xff] %v833_v36  ;;  %v802_v46 = vmax.f32 %v580_v37, 0.0  ;;  %v834_v47 = vmax.f32 %v708_v38, 0.0 }
 0x10f   : > { %863 = vst [vmem:[%s1322_s14 + $0x40] sm:$0xff] %v799_v42  ;;  %895 = vst [vmem:[%s1322_s14 + $0x140] sm:$0xff] %v831_v43  ;;  %v800_v48 = vmax.f32 %v572_v44, 0.0  ;;  %v832_v49 = vmax.f32 %v700_v45, 0.0 }
 0x110   : > { %866 = vst [vmem:[%s1322_s14 + $0x58] sm:$0xff] %v802_v46  ;;  %898 = vst [vmem:[%s1322_s14 + $0x158] sm:$0xff] %v834_v47 }
 0x111   : > { %864 = vst [vmem:[%s1322_s14 + $0x48] sm:$0xff] %v800_v48  ;;  %896 = vst [vmem:[%s1322_s14 + $0x148] sm:$0xff] %v832_v49  ;;  %v1097_v50 = vpop.f32.mrb[12].mxu0  ;;  %v1129_v51 = vpop.f32.mrb[12].mxu1 }
 0x112   : > { %v593_v52 = vadd.f32 %v1097_v50, %v1314_v40  ;;  %v721_v53 = vadd.f32 %v1129_v51, %v1314_v40  ;;  %v584_v54 = vpop.f32.mrb[13].mxu0  ;;  %v712_v55 = vpop.f32.mrb[13].mxu1 }
 0x113   : > { %v585_v56 = vadd.f32 %v1314_v40, %v584_v54  ;;  %v713_v57 = vadd.f32 %v1314_v40, %v712_v55  ;;  %v1098_v58 = vpop.f32.mrb[14].mxu0  ;;  %v1130_v59 = vpop.f32.mrb[14].mxu1 }
 0x114   : > { %v805_v60 = vmax.f32 %v593_v52, 0.0  ;;  %v837_v61 = vmax.f32 %v721_v53, 0.0  ;;  %v596_v62 = vadd.f32 %v1098_v58, %v1314_v40  ;;  %v724_v63 = vadd.f32 %v1130_v59, %v1314_v40  ;;  %v587_v0 = vpop.f32.mrb[15].mxu0  ;;  %v715_v1 = vpop.f32.mrb[15].mxu1 }
 0x115   : > { %v803_v2 = vmax.f32 %v585_v56, 0.0  ;;  %v835_v3 = vmax.f32 %v713_v57, 0.0  ;;  %v588_v4 = vadd.f32 %v1314_v40, %v587_v0  ;;  %v716_v5 = vadd.f32 %v1314_v40, %v715_v1 }
 0x116   : > { %869 = vst [vmem:[%s1322_s14 + $0x70] sm:$0xff] %v805_v60  ;;  %901 = vst [vmem:[%s1322_s14 + $0x170] sm:$0xff] %v837_v61  ;;  %v806_v6 = vmax.f32 %v596_v62, 0.0  ;;  %v838_v7 = vmax.f32 %v724_v63, 0.0 }
 0x117   : > { %867 = vst [vmem:[%s1322_s14 + $0x60] sm:$0xff] %v803_v2  ;;  %899 = vst [vmem:[%s1322_s14 + $0x160] sm:$0xff] %v835_v3  ;;  %v804_v8 = vmax.f32 %v588_v4, 0.0  ;;  %v836_v9 = vmax.f32 %v716_v5, 0.0 }
 0x118   : > { %870 = vst [vmem:[%s1322_s14 + $0x78] sm:$0xff] %v806_v6  ;;  %902 = vst [vmem:[%s1322_s14 + $0x178] sm:$0xff] %v838_v7 }
 0x119   : > { %868 = vst [vmem:[%s1322_s14 + $0x68] sm:$0xff] %v804_v8  ;;  %900 = vst [vmem:[%s1322_s14 + $0x168] sm:$0xff] %v836_v9  ;;  %v1101_v10 = vpop.f32.mrb[16].mxu0  ;;  %v1133_v11 = vpop.f32.mrb[16].mxu1 }
 0x11a   : > { %v609_v12 = vadd.f32 %v1101_v10, %v1314_v40  ;;  %v737_v13 = vadd.f32 %v1133_v11, %v1314_v40  ;;  %v600_v14 = vpop.f32.mrb[17].mxu0  ;;  %v728_v15 = vpop.f32.mrb[17].mxu1 }
 0x11b   : > { %v601_v16 = vadd.f32 %v1314_v40, %v600_v14  ;;  %v729_v17 = vadd.f32 %v1314_v40, %v728_v15  ;;  %v1102_v18 = vpop.f32.mrb[18].mxu0  ;;  %v1134_v19 = vpop.f32.mrb[18].mxu1 }
 0x11c   : > { %v809_v20 = vmax.f32 %v609_v12, 0.0  ;;  %v841_v21 = vmax.f32 %v737_v13, 0.0  ;;  %v612_v22 = vadd.f32 %v1102_v18, %v1314_v40  ;;  %v740_v23 = vadd.f32 %v1134_v19, %v1314_v40  ;;  %v603_v24 = vpop.f32.mrb[19].mxu0  ;;  %v731_v25 = vpop.f32.mrb[19].mxu1 }
 0x11d   : > { %v807_v26 = vmax.f32 %v601_v16, 0.0  ;;  %v839_v27 = vmax.f32 %v729_v17, 0.0  ;;  %v604_v28 = vadd.f32 %v1314_v40, %v603_v24  ;;  %v732_v29 = vadd.f32 %v1314_v40, %v731_v25 }
 0x11e   : > { %873 = vst [vmem:[%s1322_s14 + $0x90] sm:$0xff] %v809_v20  ;;  %905 = vst [vmem:[%s1322_s14 + $0x190] sm:$0xff] %v841_v21  ;;  %v810_v30 = vmax.f32 %v612_v22, 0.0  ;;  %v842_v31 = vmax.f32 %v740_v23, 0.0 }
 0x11f   : > { %871 = vst [vmem:[%s1322_s14 + $0x80] sm:$0xff] %v807_v26  ;;  %903 = vst [vmem:[%s1322_s14 + $0x180] sm:$0xff] %v839_v27  ;;  %v808_v32 = vmax.f32 %v604_v28, 0.0  ;;  %v840_v33 = vmax.f32 %v732_v29, 0.0 }
 0x120   : > { %874 = vst [vmem:[%s1322_s14 + $0x98] sm:$0xff] %v810_v30  ;;  %906 = vst [vmem:[%s1322_s14 + $0x198] sm:$0xff] %v842_v31 }
 0x121   : > { %872 = vst [vmem:[%s1322_s14 + $0x88] sm:$0xff] %v808_v32  ;;  %904 = vst [vmem:[%s1322_s14 + $0x188] sm:$0xff] %v840_v33  ;;  %v1105_v34 = vpop.f32.mrb[20].mxu0  ;;  %v1137_v35 = vpop.f32.mrb[20].mxu1 }
 0x122   : > { %v625_v36 = vadd.f32 %v1105_v34, %v1314_v40  ;;  %v753_v37 = vadd.f32 %v1137_v35, %v1314_v40  ;;  %v616_v38 = vpop.f32.mrb[21].mxu0  ;;  %v744_v39 = vpop.f32.mrb[21].mxu1 }
 0x123   : > { %v617_v41 = vadd.f32 %v1314_v40, %v616_v38  ;;  %v745_v42 = vadd.f32 %v1314_v40, %v744_v39  ;;  %v1106_v43 = vpop.f32.mrb[22].mxu0  ;;  %v1138_v44 = vpop.f32.mrb[22].mxu1 }
 0x124   : > { %v813_v45 = vmax.f32 %v625_v36, 0.0  ;;  %v845_v46 = vmax.f32 %v753_v37, 0.0  ;;  %v628_v47 = vadd.f32 %v1106_v43, %v1314_v40  ;;  %v756_v48 = vadd.f32 %v1138_v44, %v1314_v40  ;;  %v619_v49 = vpop.f32.mrb[23].mxu0  ;;  %v747_v50 = vpop.f32.mrb[23].mxu1 }
 0x125   : > { %v811_v51 = vmax.f32 %v617_v41, 0.0  ;;  %v843_v52 = vmax.f32 %v745_v42, 0.0  ;;  %v620_v53 = vadd.f32 %v1314_v40, %v619_v49  ;;  %v748_v54 = vadd.f32 %v1314_v40, %v747_v50 }
 0x126   : > { %877 = vst [vmem:[%s1322_s14 + $0xb0] sm:$0xff] %v813_v45  ;;  %909 = vst [vmem:[%s1322_s14 + $0x1b0] sm:$0xff] %v845_v46  ;;  %v814_v55 = vmax.f32 %v628_v47, 0.0  ;;  %v846_v56 = vmax.f32 %v756_v48, 0.0 }
 0x127   : > { %875 = vst [vmem:[%s1322_s14 + $0xa0] sm:$0xff] %v811_v51  ;;  %907 = vst [vmem:[%s1322_s14 + $0x1a0] sm:$0xff] %v843_v52  ;;  %v812_v57 = vmax.f32 %v620_v53, 0.0  ;;  %v844_v58 = vmax.f32 %v748_v54, 0.0 }
 0x128   : > { %878 = vst [vmem:[%s1322_s14 + $0xb8] sm:$0xff] %v814_v55  ;;  %910 = vst [vmem:[%s1322_s14 + $0x1b8] sm:$0xff] %v846_v56 }
 0x129   : > { %876 = vst [vmem:[%s1322_s14 + $0xa8] sm:$0xff] %v812_v57  ;;  %908 = vst [vmem:[%s1322_s14 + $0x1a8] sm:$0xff] %v844_v58  ;;  %v1109_v59 = vpop.f32.mrb[24].mxu0  ;;  %v1141_v60 = vpop.f32.mrb[24].mxu1 }
 0x12a   : > { %v641_v61 = vadd.f32 %v1109_v59, %v1314_v40  ;;  %v769_v62 = vadd.f32 %v1141_v60, %v1314_v40  ;;  %v632_v63 = vpop.f32.mrb[25].mxu0  ;;  %v760_v0 = vpop.f32.mrb[25].mxu1 }
 0x12b   : > { %v633_v1 = vadd.f32 %v1314_v40, %v632_v63  ;;  %v761_v2 = vadd.f32 %v1314_v40, %v760_v0  ;;  %v1110_v3 = vpop.f32.mrb[26].mxu0  ;;  %v1142_v4 = vpop.f32.mrb[26].mxu1 }
 0x12c   : > { %v817_v5 = vmax.f32 %v641_v61, 0.0  ;;  %v849_v6 = vmax.f32 %v769_v62, 0.0  ;;  %v644_v7 = vadd.f32 %v1110_v3, %v1314_v40  ;;  %v772_v8 = vadd.f32 %v1142_v4, %v1314_v40  ;;  %v635_v9 = vpop.f32.mrb[27].mxu0  ;;  %v763_v10 = vpop.f32.mrb[27].mxu1 }
 0x12d   : > { %v815_v11 = vmax.f32 %v633_v1, 0.0  ;;  %v847_v12 = vmax.f32 %v761_v2, 0.0  ;;  %v636_v13 = vadd.f32 %v1314_v40, %v635_v9  ;;  %v764_v14 = vadd.f32 %v1314_v40, %v763_v10 }
 0x12e   : > { %881 = vst [vmem:[%s1322_s14 + $0xd0] sm:$0xff] %v817_v5  ;;  %913 = vst [vmem:[%s1322_s14 + $0x1d0] sm:$0xff] %v849_v6  ;;  %v818_v15 = vmax.f32 %v644_v7, 0.0  ;;  %v850_v16 = vmax.f32 %v772_v8, 0.0 }
 0x12f   : > { %879 = vst [vmem:[%s1322_s14 + $0xc0] sm:$0xff] %v815_v11  ;;  %911 = vst [vmem:[%s1322_s14 + $0x1c0] sm:$0xff] %v847_v12  ;;  %v816_v17 = vmax.f32 %v636_v13, 0.0  ;;  %v848_v18 = vmax.f32 %v764_v14, 0.0 }
 0x130   : > { %882 = vst [vmem:[%s1322_s14 + $0xd8] sm:$0xff] %v818_v15  ;;  %914 = vst [vmem:[%s1322_s14 + $0x1d8] sm:$0xff] %v850_v16 }
 0x131   : > { %880 = vst [vmem:[%s1322_s14 + $0xc8] sm:$0xff] %v816_v17  ;;  %912 = vst [vmem:[%s1322_s14 + $0x1c8] sm:$0xff] %v848_v18  ;;  %v1113_v19 = vpop.f32.mrb[28].mxu0  ;;  %v1145_v20 = vpop.f32.mrb[28].mxu1 }
 0x132   : > { %v657_v21 = vadd.f32 %v1113_v19, %v1314_v40  ;;  %v785_v22 = vadd.f32 %v1145_v20, %v1314_v40  ;;  %v648_v23 = vpop.f32.mrb[29].mxu0  ;;  %v776_v24 = vpop.f32.mrb[29].mxu1 }
 0x133   : > { %v649_v25 = vadd.f32 %v1314_v40, %v648_v23  ;;  %v777_v26 = vadd.f32 %v1314_v40, %v776_v24  ;;  %v1114_v27 = vpop.f32.mrb[30].mxu0  ;;  %v1146_v28 = vpop.f32.mrb[30].mxu1 }
 0x134   : > { %v821_v29 = vmax.f32 %v657_v21, 0.0  ;;  %v853_v30 = vmax.f32 %v785_v22, 0.0  ;;  %v660_v31 = vadd.f32 %v1114_v27, %v1314_v40  ;;  %v788_v32 = vadd.f32 %v1146_v28, %v1314_v40  ;;  %v651_v33 = vpop.f32.mrb[31].mxu0  ;;  %v779_v34 = vpop.f32.mrb[31].mxu1 }
 0x135   : > { %v819_v35 = vmax.f32 %v649_v25, 0.0  ;;  %v851_v36 = vmax.f32 %v777_v26, 0.0  ;;  %v652_v37 = vadd.f32 %v1314_v40, %v651_v33  ;;  %v780_v38 = vadd.f32 %v1314_v40, %v779_v34 }
 0x136   : > { %885 = vst [vmem:[%s1322_s14 + $0xf0] sm:$0xff] %v821_v29  ;;  %917 = vst [vmem:[%s1322_s14 + $0x1f0] sm:$0xff] %v853_v30  ;;  %v822_v39 = vmax.f32 %v660_v31, 0.0  ;;  %v854_v41 = vmax.f32 %v788_v32, 0.0 }
 0x137   : > { %883 = vst [vmem:[%s1322_s14 + $0xe0] sm:$0xff] %v819_v35  ;;  %915 = vst [vmem:[%s1322_s14 + $0x1e0] sm:$0xff] %v851_v36  ;;  %v820_v42 = vmax.f32 %v652_v37, 0.0  ;;  %v852_v43 = vmax.f32 %v780_v38, 0.0 }
 0x138   : > { %886 = vst [vmem:[%s1322_s14 + $0xf8] sm:$0xff] %v822_v39  ;;  %918 = vst [vmem:[%s1322_s14 + $0x1f8] sm:$0xff] %v854_v41 }
 0x139   : > { %884 = vst [vmem:[%s1322_s14 + $0xe8] sm:$0xff] %v820_v42  ;;  %916 = vst [vmem:[%s1322_s14 + $0x1e8] sm:$0xff] %v852_v43 }
 0x13a PF: > { %s13_s12 = sadd.s32 1, %s1217_s12  }
 0x13b   : > { %p10_p4 = scmp.ge.s32.totalorder %s13_s12, 40  }
 0x13d   :  { %12 = sbr.rel (!%p10_p4) target bundleno = 1 (0x1), region = 62 }

// kernel: tsfn_forward.6
= control target key start
LH: loop header
LB: loop body
LE: loop exit
PB: predicated region body
PF: predicated region fallthrough
CT: control target
= control target key end

     0   :  { %s1446_s12 = smov 0   ;;  %s1751_s0 = inlined_call_operand.vmem [shape: bf16[5120,256], index: 0, kind: input, shape index: {}]   ;;  %s1752_s1 = inlined_call_operand.vmem [shape: bf16[256,128], index: 1, kind: input, shape index: {}]   ;;  %s1753_s2 = inlined_call_operand.vmem [shape: f32[1,128], index: 2, kind: input, shape index: {}]   ;;  %s1754_s3 = inlined_call_operand.vmem [shape: f32[5120,128], index: 3, kind: output, shape index: {}]  }
   0x1 LB: > { %s1170_s13 = sadd.s32 4294967295, %s1423_s12   ;;  %p1174_p0 = scmp.ge.s32.totalorder %s1423_s12, 1  ;;  %s1423_s12 = sphi %s1446_s12, %s13_s12  }
   0x2   : > { %p139_p1 = scmp.lt.s32.totalorder %s1423_s12, 11 }
   0x4   : > { %p140_p2 = pnand %p1174_p0, %p139_p1 }
   0x5   : > { %v1305_v0 = vld [vmem:[%s1752_s1] sm:$0xff] (!%p140_p2)   ;;  %v1425_v1 = vmov (!%p140_p2), 0   ;;  %s1175_s16 = sshll.u32 (!%p140_p2), %s1170_s13, 6  ;;  %v1306_v2 = vld [vmem:[%s1752_s1 + $0x8] sm:$0xff] (!%p140_p2)   ;;  %v1307_v3 = vld [vmem:[%s1752_s1 + $0x10] sm:$0xff] (!%p140_p2)  }
   0x6   : > { %143 = sbr.rel (%p140_p2) target bundleno = 409 (0x199), region = 32  ;;  %697 = vmatprep.subr.bf16.mxu0 (!%p140_p2), %v1425_v1  ;;  %1264 = vmatprep.subr.bf16.mxu1 (!%p140_p2), %v1425_v1  ;;  %p165_p3 = scmp.lt.s32.totalorder (!%p140_p2), %s1175_s16, 639  ;;  %v1308_v4 = vld [vmem:[%s1752_s1 + $0x18] sm:$0xff] (!%p140_p2)   ;;  %v1309_v5 = vld [vmem:[%s1752_s1 + $0x20] sm:$0xff] (!%p140_p2)   ;;  %v1310_v7 = vld [vmem:[%s1752_s1 + $0x28] sm:$0xff] (!%p140_p2)  }
   0x7   : > { %698 = vmatpush1.bf16.msra.mxu0 (!%p140_p2), %v1305_v0  ;;  %1280 = vmatpush1.bf16.msra.mxu1 (!%p140_p2), %v1305_v0  ;;  %v1311_v9 = vld [vmem:[%s1752_s1 + $0x30] sm:$0xff] (!%p140_p2)   ;;  %v1312_v10 = vld [vmem:[%s1752_s1 + $0x38] sm:$0xff] (!%p140_p2)   ;;  %v1313_v11 = vld [vmem:[%s1752_s1 + $0x40] sm:$0xff] (!%p140_p2)  }
   0x8   : > { %699 = vmatprep.subr.bf16.mxu0 (!%p140_p2), %v1425_v1  ;;  %1265 = vmatprep.subr.bf16.mxu1 (!%p140_p2), %v1425_v1  ;;  %v1314_v12 = vld [vmem:[%s1752_s1 + $0x48] sm:$0xff] (!%p140_p2)   ;;  %v1315_v13 = vld [vmem:[%s1752_s1 + $0x50] sm:$0xff] (!%p140_p2)   ;;  %v1316_v14 = vld [vmem:[%s1752_s1 + $0x58] sm:$0xff] (!%p140_p2)  }
   0x9   : > { %v1317_v15 = vld [vmem:[%s1752_s1 + $0x60] sm:$0xff] (!%p140_p2)   ;;  %v1318_v16 = vld [vmem:[%s1752_s1 + $0x68] sm:$0xff] (!%p140_p2)   ;;  %v1319_v17 = vld [vmem:[%s1752_s1 + $0x70] sm:$0xff] (!%p140_p2)  }
   0xa   : > { %v1320_v18 = vld [vmem:[%s1752_s1 + $0x78] sm:$0xff] (!%p140_p2)  }
   0xb   : > { %700 = vmatpush1.bf16.msra.mxu0 (!%p140_p2), %v1306_v2  ;;  %1281 = vmatpush1.bf16.msra.mxu1 (!%p140_p2), %v1306_v2 }
   0xc   : > { %701 = vmatprep.subr.bf16.mxu0 (!%p140_p2), %v1425_v1  ;;  %1266 = vmatprep.subr.bf16.mxu1 (!%p140_p2), %v1425_v1 }
   0xd   : > { %s1756_s16 = smov (!%p165_p3, %s1175_s16), 639 }
   0xe   : > { %s1263_s23 = sshll.u32 %s1756_s16, 3 }
   0xf   : > { %702 = vmatpush1.bf16.msra.mxu0 %v1307_v3  ;;  %1282 = vmatpush1.bf16.msra.mxu1 %v1307_v3  ;;  %s1485_s28 = scalar_lea.vmem %s1751_s0, %s1263_s23 }
  0x10   : > { %703 = vmatprep.subr.bf16.mxu0 %v1425_v1  ;;  %1267 = vmatprep.subr.bf16.mxu1 %v1425_v1  ;;  %v1323_v6 = vld [vmem:[%s1485_s28 + $0x4] ss:$8 sps:$4 sm:$0xff]   ;;  %v1321_v19 = vld [vmem:[%s1485_s28] ss:$8 sps:$4 sm:$0xff]   ;;  %v1327_v21 = vld [vmem:[%s1485_s28 + $0x14] ss:$8 sps:$4 sm:$0xff]  }
  0x11   : > { %v1326_v8 = vld [vmem:[%s1485_s28 + $0x104] ss:$8 sps:$4 sm:$0xff]   ;;  %729 = vmatprep.mubr.bf16.mxu0 %v1323_v6  ;;  %v1324_v20 = vld [vmem:[%s1485_s28 + $0x100] ss:$8 sps:$4 sm:$0xff]   ;;  %v1329_v22 = vld [vmem:[%s1485_s28 + $0x114] ss:$8 sps:$4 sm:$0xff]  }
  0x12   : > { %857 = vmatprep.mubr.bf16.mxu1 %v1326_v8  ;;  %v1331_v23 = vld [vmem:[%s1485_s28 + $0x10] ss:$8 sps:$4 sm:$0xff]   ;;  %v1333_v25 = vld [vmem:[%s1485_s28 + $0x24] ss:$8 sps:$4 sm:$0xff]   ;;  %v1337_v27 = vld [vmem:[%s1485_s28 + $0x20] ss:$8 sps:$4 sm:$0xff]  }
  0x13   : > { %704 = vmatpush1.bf16.msra.mxu0 %v1308_v4  ;;  %1283 = vmatpush1.bf16.msra.mxu1 %v1308_v4  ;;  %v1332_v24 = vld [vmem:[%s1485_s28 + $0x110] ss:$8 sps:$4 sm:$0xff]   ;;  %v1335_v26 = vld [vmem:[%s1485_s28 + $0x124] ss:$8 sps:$4 sm:$0xff]   ;;  %v1338_v28 = vld [vmem:[%s1485_s28 + $0x120] ss:$8 sps:$4 sm:$0xff]  }
  0x14   : > { %705 = vmatprep.subr.bf16.mxu0 %v1425_v1  ;;  %1268 = vmatprep.subr.bf16.mxu1 %v1425_v1  ;;  %v1339_v29 = vld [vmem:[%s1485_s28 + $0x34] ss:$8 sps:$4 sm:$0xff]   ;;  %v1343_v31 = vld [vmem:[%s1485_s28 + $0x30] ss:$8 sps:$4 sm:$0xff]   ;;  %v1345_v33 = vld [vmem:[%s1485_s28 + $0x44] ss:$8 sps:$4 sm:$0xff]  }
  0x15   : > { %v1341_v30 = vld [vmem:[%s1485_s28 + $0x134] ss:$8 sps:$4 sm:$0xff]   ;;  %v1344_v32 = vld [vmem:[%s1485_s28 + $0x130] ss:$8 sps:$4 sm:$0xff]   ;;  %v1347_v34 = vld [vmem:[%s1485_s28 + $0x144] ss:$8 sps:$4 sm:$0xff]  }
  0x16   : > { %v1349_v35 = vld [vmem:[%s1485_s28 + $0x40] ss:$8 sps:$4 sm:$0xff]   ;;  %v1351_v37 = vld [vmem:[%s1485_s28 + $0x54] ss:$8 sps:$4 sm:$0xff]   ;;  %v1355_v39 = vld [vmem:[%s1485_s28 + $0x50] ss:$8 sps:$4 sm:$0xff]  }
  0x17   : > { %706 = vmatpush1.bf16.msra.mxu0 %v1309_v5  ;;  %1284 = vmatpush1.bf16.msra.mxu1 %v1309_v5  ;;  %v1350_v36 = vld [vmem:[%s1485_s28 + $0x140] ss:$8 sps:$4 sm:$0xff]   ;;  %v1353_v38 = vld [vmem:[%s1485_s28 + $0x154] ss:$8 sps:$4 sm:$0xff]   ;;  %v1356_v40 = vld [vmem:[%s1485_s28 + $0x150] ss:$8 sps:$4 sm:$0xff]  }
  0x18   : > { %707 = vmatprep.subr.bf16.mxu0 %v1425_v1  ;;  %1269 = vmatprep.subr.bf16.mxu1 %v1425_v1  ;;  %v1357_v41 = vld [vmem:[%s1485_s28 + $0x64] ss:$8 sps:$4 sm:$0xff]   ;;  %v1361_v43 = vld [vmem:[%s1485_s28 + $0x60] ss:$8 sps:$4 sm:$0xff]   ;;  %v1363_v45 = vld [vmem:[%s1485_s28 + $0x74] ss:$8 sps:$4 sm:$0xff]  }
  0x19   : > { %v1359_v42 = vld [vmem:[%s1485_s28 + $0x164] ss:$8 sps:$4 sm:$0xff]   ;;  %v1362_v44 = vld [vmem:[%s1485_s28 + $0x160] ss:$8 sps:$4 sm:$0xff]   ;;  %v1365_v46 = vld [vmem:[%s1485_s28 + $0x174] ss:$8 sps:$4 sm:$0xff]  }
  0x1a   : > { %v1367_v47 = vld [vmem:[%s1485_s28 + $0x70] ss:$8 sps:$4 sm:$0xff]   ;;  %v1369_v49 = vld [vmem:[%s1485_s28 + $0x84] ss:$8 sps:$4 sm:$0xff]   ;;  %v1373_v51 = vld [vmem:[%s1485_s28 + $0x80] ss:$8 sps:$4 sm:$0xff]  }
  0x1b   : > { %708 = vmatpush1.bf16.msra.mxu0 %v1310_v7  ;;  %1285 = vmatpush1.bf16.msra.mxu1 %v1310_v7  ;;  %v1368_v48 = vld [vmem:[%s1485_s28 + $0x170] ss:$8 sps:$4 sm:$0xff]   ;;  %v1371_v50 = vld [vmem:[%s1485_s28 + $0x184] ss:$8 sps:$4 sm:$0xff]   ;;  %v1374_v52 = vld [vmem:[%s1485_s28 + $0x180] ss:$8 sps:$4 sm:$0xff]  }
  0x1c   : > { %709 = vmatprep.subr.bf16.mxu0 %v1425_v1  ;;  %1270 = vmatprep.subr.bf16.mxu1 %v1425_v1  ;;  %v1375_v53 = vld [vmem:[%s1485_s28 + $0x94] ss:$8 sps:$4 sm:$0xff]   ;;  %v1379_v55 = vld [vmem:[%s1485_s28 + $0x90] ss:$8 sps:$4 sm:$0xff]   ;;  %v1381_v57 = vld [vmem:[%s1485_s28 + $0xa4] ss:$8 sps:$4 sm:$0xff]  }
  0x1d   : > { %v1377_v54 = vld [vmem:[%s1485_s28 + $0x194] ss:$8 sps:$4 sm:$0xff]   ;;  %v1380_v56 = vld [vmem:[%s1485_s28 + $0x190] ss:$8 sps:$4 sm:$0xff]   ;;  %v1383_v58 = vld [vmem:[%s1485_s28 + $0x1a4] ss:$8 sps:$4 sm:$0xff]  }
  0x1e   : > { %v1385_v59 = vld [vmem:[%s1485_s28 + $0xa0] ss:$8 sps:$4 sm:$0xff]   ;;  %v1387_v61 = vld [vmem:[%s1485_s28 + $0xb4] ss:$8 sps:$4 sm:$0xff]   ;;  %v1391_v63 = vld [vmem:[%s1485_s28 + $0xb0] ss:$8 sps:$4 sm:$0xff]  }
  0x1f   : > { %710 = vmatpush1.bf16.msra.mxu0 %v1311_v9  ;;  %1286 = vmatpush1.bf16.msra.mxu1 %v1311_v9  ;;  %v1386_v60 = vld [vmem:[%s1485_s28 + $0x1a0] ss:$8 sps:$4 sm:$0xff]   ;;  %v1389_v62 = vld [vmem:[%s1485_s28 + $0x1b4] ss:$8 sps:$4 sm:$0xff]   ;;  %v1392_v0 = vld [vmem:[%s1485_s28 + $0x1b0] ss:$8 sps:$4 sm:$0xff]  }
  0x20   : > { %711 = vmatprep.subr.bf16.mxu0 %v1425_v1  ;;  %1271 = vmatprep.subr.bf16.mxu1 %v1425_v1  ;;  %v1395_v2 = vld [vmem:[%s1485_s28 + $0x1c4] ss:$8 sps:$4 sm:$0xff]   ;;  %v1397_v3 = vld [vmem:[%s1485_s28 + $0xc0] ss:$8 sps:$4 sm:$0xff]   ;;  %v1399_v5 = vld [vmem:[%s1485_s28 + $0xd4] ss:$8 sps:$4 sm:$0xff]  }
  0x21   : > { %v1398_v4 = vld [vmem:[%s1485_s28 + $0x1c0] ss:$8 sps:$4 sm:$0xff]   ;;  %v1401_v6 = vld [vmem:[%s1485_s28 + $0x1d4] ss:$8 sps:$4 sm:$0xff]   ;;  %v1403_v7 = vld [vmem:[%s1485_s28 + $0xd0] ss:$8 sps:$4 sm:$0xff]  }
  0x22   : > { %v1404_v8 = vld [vmem:[%s1485_s28 + $0x1d0] ss:$8 sps:$4 sm:$0xff]   ;;  %v1405_v9 = vld [vmem:[%s1485_s28 + $0xe4] ss:$8 sps:$4 sm:$0xff]  }
  0x23   : > { %712 = vmatpush1.bf16.msra.mxu0 %v1312_v10  ;;  %1287 = vmatpush1.bf16.msra.mxu1 %v1312_v10  ;;  %v1407_v10 = vld [vmem:[%s1485_s28 + $0x1e4] ss:$8 sps:$4 sm:$0xff]  }
  0x24   : > { %713 = vmatprep.subr.bf16.mxu0 %v1425_v1  ;;  %1272 = vmatprep.subr.bf16.mxu1 %v1425_v1 }
  0x27   : > { %714 = vmatpush1.bf16.msra.mxu0 %v1313_v11  ;;  %1288 = vmatpush1.bf16.msra.mxu1 %v1313_v11  ;;  %v1409_v11 = vld [vmem:[%s1485_s28 + $0xe0] ss:$8 sps:$4 sm:$0xff]  }
  0x28   : > { %715 = vmatprep.subr.bf16.mxu0 %v1425_v1  ;;  %1273 = vmatprep.subr.bf16.mxu1 %v1425_v1 }
  0x2b   : > { %716 = vmatpush1.bf16.msra.mxu0 %v1314_v12  ;;  %1289 = vmatpush1.bf16.msra.mxu1 %v1314_v12  ;;  %v1410_v12 = vld [vmem:[%s1485_s28 + $0x1e0] ss:$8 sps:$4 sm:$0xff]  }
  0x2c   : > { %717 = vmatprep.subr.bf16.mxu0 %v1425_v1  ;;  %1274 = vmatprep.subr.bf16.mxu1 %v1425_v1 }
  0x2f   : > { %718 = vmatpush1.bf16.msra.mxu0 %v1315_v13  ;;  %1290 = vmatpush1.bf16.msra.mxu1 %v1315_v13  ;;  %v1411_v13 = vld [vmem:[%s1485_s28 + $0xf4] ss:$8 sps:$4 sm:$0xff]  }
  0x30   : > { %719 = vmatprep.subr.bf16.mxu0 %v1425_v1  ;;  %1275 = vmatprep.subr.bf16.mxu1 %v1425_v1 }
  0x33   : > { %720 = vmatpush1.bf16.msra.mxu0 %v1316_v14  ;;  %1291 = vmatpush1.bf16.msra.mxu1 %v1316_v14  ;;  %v1413_v14 = vld [vmem:[%s1485_s28 + $0x1f4] ss:$8 sps:$4 sm:$0xff]  }
  0x34   : > { %721 = vmatprep.subr.bf16.mxu0 %v1425_v1  ;;  %1276 = vmatprep.subr.bf16.mxu1 %v1425_v1 }
  0x37   : > { %722 = vmatpush1.bf16.msra.mxu0 %v1317_v15  ;;  %1292 = vmatpush1.bf16.msra.mxu1 %v1317_v15  ;;  %v1415_v15 = vld [vmem:[%s1485_s28 + $0xf0] ss:$8 sps:$4 sm:$0xff]  }
  0x38   : > { %723 = vmatprep.subr.bf16.mxu0 %v1425_v1  ;;  %1277 = vmatprep.subr.bf16.mxu1 %v1425_v1 }
  0x3b   : > { %724 = vmatpush1.bf16.msra.mxu0 %v1318_v16  ;;  %1293 = vmatpush1.bf16.msra.mxu1 %v1318_v16  ;;  %v1416_v16 = vld [vmem:[%s1485_s28 + $0x1f0] ss:$8 sps:$4 sm:$0xff]  }
  0x3c   : > { %725 = vmatprep.subr.bf16.mxu0 %v1425_v1  ;;  %1278 = vmatprep.subr.bf16.mxu1 %v1425_v1 }
  0x3f   : > { %726 = vmatpush1.bf16.msra.mxu0 %v1319_v17  ;;  %1294 = vmatpush1.bf16.msra.mxu1 %v1319_v17  ;;  %v1611_v17 = vld [vmem:[%s1753_s2] ss:$0 sm:$0xff] }
  0x40   : > { %727 = vmatprep.subr.bf16.mxu0 %v1425_v1  ;;  %1279 = vmatprep.subr.bf16.mxu1 %v1425_v1  ;;  %v1393_v1 = vld [vmem:[%s1485_s28 + $0xc4] ss:$8 sps:$4 sm:$0xff]   ;;  %s1620_s28 = scalar_lea.vmem %s1754_s3, %s1263_s23 }
  0x43   : > { %728 = vmatpush1.bf16.msra.mxu0 %v1320_v18  ;;  %1295 = vmatpush1.bf16.msra.mxu1 %v1320_v18 }
  0x46   : > { %730 = vmatmul.mubr.bf16.vlgmr.msra.gmra.mrb[0].mxu0 %v1321_v19  ;;  %858 = vmatmul.mubr.bf16.vlgmr.msra.gmra.mrb[0].mxu1 %v1324_v20 }
  0x47   : > { %737 = vmatprep.mubr.bf16.mxu0 %v1327_v21  ;;  %865 = vmatprep.mubr.bf16.mxu1 %v1329_v22 }
  0x4e   : > { %738 = vmatmul.mubr.bf16.gmra.mrb[4].mxu0 %v1331_v23  ;;  %866 = vmatmul.mubr.bf16.gmra.mrb[4].mxu1 %v1332_v24 }
  0x4f   : > { %745 = vmatprep.mubr.bf16.mxu0 %v1333_v25  ;;  %873 = vmatprep.mubr.bf16.mxu1 %v1335_v26 }
  0x56   : > { %746 = vmatmul.mubr.bf16.gmra.mrb[8].mxu0 %v1337_v27  ;;  %874 = vmatmul.mubr.bf16.gmra.mrb[8].mxu1 %v1338_v28 }
  0x57   : > { %753 = vmatprep.mubr.bf16.mxu0 %v1339_v29  ;;  %881 = vmatprep.mubr.bf16.mxu1 %v1341_v30 }
  0x5e   : > { %754 = vmatmul.mubr.bf16.gmra.mrb[12].mxu0 %v1343_v31  ;;  %882 = vmatmul.mubr.bf16.gmra.mrb[12].mxu1 %v1344_v32 }
  0x5f   : > { %761 = vmatprep.mubr.bf16.mxu0 %v1345_v33  ;;  %889 = vmatprep.mubr.bf16.mxu1 %v1347_v34 }
  0x66   : > { %762 = vmatmul.mubr.bf16.gmra.mrb[16].mxu0 %v1349_v35  ;;  %890 = vmatmul.mubr.bf16.gmra.mrb[16].mxu1 %v1350_v36 }
  0x67   : > { %769 = vmatprep.mubr.bf16.mxu0 %v1351_v37  ;;  %897 = vmatprep.mubr.bf16.mxu1 %v1353_v38 }
  0x6e   : > { %770 = vmatmul.mubr.bf16.gmra.mrb[20].mxu0 %v1355_v39  ;;  %898 = vmatmul.mubr.bf16.gmra.mrb[20].mxu1 %v1356_v40 }
  0x6f   : > { %777 = vmatprep.mubr.bf16.mxu0 %v1357_v41  ;;  %905 = vmatprep.mubr.bf16.mxu1 %v1359_v42 }
  0x76   : > { %778 = vmatmul.mubr.bf16.gmra.mrb[24].mxu0 %v1361_v43  ;;  %906 = vmatmul.mubr.bf16.gmra.mrb[24].mxu1 %v1362_v44 }
  0x77   : > { %785 = vmatprep.mubr.bf16.mxu0 %v1363_v45  ;;  %913 = vmatprep.mubr.bf16.mxu1 %v1365_v46 }
  0x7e   : > { %786 = vmatmul.mubr.bf16.gmra.mrb[28].mxu0 %v1367_v47  ;;  %914 = vmatmul.mubr.bf16.gmra.mrb[28].mxu1 %v1368_v48 }
  0x7f   : > { %793 = vmatprep.mubr.bf16.mxu0 %v1369_v49  ;;  %921 = vmatprep.mubr.bf16.mxu1 %v1371_v50 }
  0x86   : > { %794 = vmatmul.mubr.bf16.gmra.mrb[32].mxu0 %v1373_v51  ;;  %922 = vmatmul.mubr.bf16.gmra.mrb[32].mxu1 %v1374_v52 }
  0x87   : > { %801 = vmatprep.mubr.bf16.mxu0 %v1375_v53  ;;  %929 = vmatprep.mubr.bf16.mxu1 %v1377_v54 }
  0x8e   : > { %802 = vmatmul.mubr.bf16.gmra.mrb[36].mxu0 %v1379_v55  ;;  %930 = vmatmul.mubr.bf16.gmra.mrb[36].mxu1 %v1380_v56 }
  0x8f   : > { %809 = vmatprep.mubr.bf16.mxu0 %v1381_v57  ;;  %937 = vmatprep.mubr.bf16.mxu1 %v1383_v58 }
  0x96   : > { %810 = vmatmul.mubr.bf16.gmra.mrb[40].mxu0 %v1385_v59  ;;  %938 = vmatmul.mubr.bf16.gmra.mrb[40].mxu1 %v1386_v60 }
  0x97   : > { %817 = vmatprep.mubr.bf16.mxu0 %v1387_v61  ;;  %945 = vmatprep.mubr.bf16.mxu1 %v1389_v62 }
  0x9e   : > { %818 = vmatmul.mubr.bf16.gmra.mrb[44].mxu0 %v1391_v63  ;;  %946 = vmatmul.mubr.bf16.gmra.mrb[44].mxu1 %v1392_v0 }
  0x9f   : > { %825 = vmatprep.mubr.bf16.mxu0 %v1393_v1  ;;  %953 = vmatprep.mubr.bf16.mxu1 %v1395_v2 }
  0xa6   : > { %826 = vmatmul.mubr.bf16.gmra.mrb[48].mxu0 %v1397_v3  ;;  %954 = vmatmul.mubr.bf16.gmra.mrb[48].mxu1 %v1398_v4 }
  0xa7   : > { %833 = vmatprep.mubr.bf16.mxu0 %v1399_v5  ;;  %961 = vmatprep.mubr.bf16.mxu1 %v1401_v6 }
  0xae   : > { %834 = vmatmul.mubr.bf16.gmra.mrb[52].mxu0 %v1403_v7  ;;  %962 = vmatmul.mubr.bf16.gmra.mrb[52].mxu1 %v1404_v8 }
  0xaf   : > { %841 = vmatprep.mubr.bf16.mxu0 %v1405_v9  ;;  %969 = vmatprep.mubr.bf16.mxu1 %v1407_v10 }
  0xb6   : > { %842 = vmatmul.mubr.bf16.gmra.mrb[56].mxu0 %v1409_v11  ;;  %970 = vmatmul.mubr.bf16.gmra.mrb[56].mxu1 %v1410_v12 }
  0xb7   : > { %849 = vmatprep.mubr.bf16.mxu0 %v1411_v13  ;;  %977 = vmatprep.mubr.bf16.mxu1 %v1413_v14 }
  0xbe   : > { %850 = vmatmul.mubr.bf16.gmra.mrb[60].mxu0 %v1415_v15  ;;  %978 = vmatmul.mubr.bf16.gmra.mrb[60].mxu1 %v1416_v16 }
 0x119   : > { %v731_v18 = vpop.f32.mrb[0].mxu0  ;;  %v859_v19 = vpop.f32.mrb[0].mxu1 }
 0x11a   : > { %v732_v20 = vadd.f32 %v1611_v17, %v731_v18  ;;  %v860_v21 = vadd.f32 %v1611_v17, %v859_v19  ;;  %v733_v22 = vpop.f32.mrb[1].mxu0  ;;  %v861_v23 = vpop.f32.mrb[1].mxu1 }
 0x11b   : > { %v734_v24 = vpop.f32.mrb[2].mxu0  ;;  %v862_v25 = vpop.f32.mrb[2].mxu1 }
 0x11c   : > { %v986_v26 = vmax.f32 %v732_v20, 0.0  ;;  %v1018_v27 = vmax.f32 %v860_v21, 0.0  ;;  %v735_v28 = vadd.f32 %v1611_v17, %v734_v24  ;;  %v863_v29 = vadd.f32 %v1611_v17, %v862_v25  ;;  %v736_v30 = vpop.f32.mrb[3].mxu0  ;;  %v864_v31 = vpop.f32.mrb[3].mxu1 }
 0x11e   : > { %1050 = vst [vmem:[%s1620_s28] sm:$0xff] %v986_v26  ;;  %1082 = vst [vmem:[%s1620_s28 + $0x100] sm:$0xff] %v1018_v27  ;;  %v987_v32 = vmax.f32 %v735_v28, 0.0  ;;  %v1019_v33 = vmax.f32 %v863_v29, 0.0 }
 0x120   : > { %1051 = vst [vmem:[%s1620_s28 + $0x8] sm:$0xff] %v987_v32  ;;  %1083 = vst [vmem:[%s1620_s28 + $0x108] sm:$0xff] %v1019_v33 }
 0x121   : > { %v739_v34 = vpop.f32.mrb[4].mxu0  ;;  %v867_v35 = vpop.f32.mrb[4].mxu1 }
 0x122   : > { %v740_v36 = vadd.f32 %v1611_v17, %v739_v34  ;;  %v868_v37 = vadd.f32 %v1611_v17, %v867_v35  ;;  %v741_v38 = vpop.f32.mrb[5].mxu0  ;;  %v869_v39 = vpop.f32.mrb[5].mxu1 }
 0x123   : > { %v742_v40 = vpop.f32.mrb[6].mxu0  ;;  %v870_v41 = vpop.f32.mrb[6].mxu1 }
 0x124   : > { %v988_v42 = vmax.f32 %v740_v36, 0.0  ;;  %v1020_v43 = vmax.f32 %v868_v37, 0.0  ;;  %v743_v44 = vadd.f32 %v1611_v17, %v742_v40  ;;  %v871_v45 = vadd.f32 %v1611_v17, %v870_v41  ;;  %v744_v46 = vpop.f32.mrb[7].mxu0  ;;  %v872_v47 = vpop.f32.mrb[7].mxu1 }
 0x126   : > { %1052 = vst [vmem:[%s1620_s28 + $0x10] sm:$0xff] %v988_v42  ;;  %1084 = vst [vmem:[%s1620_s28 + $0x110] sm:$0xff] %v1020_v43  ;;  %v989_v48 = vmax.f32 %v743_v44, 0.0  ;;  %v1021_v49 = vmax.f32 %v871_v45, 0.0 }
 0x128   : > { %1053 = vst [vmem:[%s1620_s28 + $0x18] sm:$0xff] %v989_v48  ;;  %1085 = vst [vmem:[%s1620_s28 + $0x118] sm:$0xff] %v1021_v49 }
 0x129   : > { %v747_v50 = vpop.f32.mrb[8].mxu0  ;;  %v875_v51 = vpop.f32.mrb[8].mxu1 }
 0x12a   : > { %v748_v52 = vadd.f32 %v1611_v17, %v747_v50  ;;  %v876_v53 = vadd.f32 %v1611_v17, %v875_v51  ;;  %v749_v54 = vpop.f32.mrb[9].mxu0  ;;  %v877_v55 = vpop.f32.mrb[9].mxu1 }
 0x12b   : > { %v750_v56 = vpop.f32.mrb[10].mxu0  ;;  %v878_v57 = vpop.f32.mrb[10].mxu1 }
 0x12c   : > { %v990_v58 = vmax.f32 %v748_v52, 0.0  ;;  %v1022_v59 = vmax.f32 %v876_v53, 0.0  ;;  %v751_v60 = vadd.f32 %v1611_v17, %v750_v56  ;;  %v879_v61 = vadd.f32 %v1611_v17, %v878_v57  ;;  %v752_v62 = vpop.f32.mrb[11].mxu0  ;;  %v880_v63 = vpop.f32.mrb[11].mxu1 }
 0x12e   : > { %1054 = vst [vmem:[%s1620_s28 + $0x20] sm:$0xff] %v990_v58  ;;  %1086 = vst [vmem:[%s1620_s28 + $0x120] sm:$0xff] %v1022_v59  ;;  %v991_v0 = vmax.f32 %v751_v60, 0.0  ;;  %v1023_v1 = vmax.f32 %v879_v61, 0.0 }
 0x130   : > { %1055 = vst [vmem:[%s1620_s28 + $0x28] sm:$0xff] %v991_v0  ;;  %1087 = vst [vmem:[%s1620_s28 + $0x128] sm:$0xff] %v1023_v1 }
 0x131   : > { %v755_v2 = vpop.f32.mrb[12].mxu0  ;;  %v883_v3 = vpop.f32.mrb[12].mxu1 }
 0x132   : > { %v756_v4 = vadd.f32 %v1611_v17, %v755_v2  ;;  %v884_v5 = vadd.f32 %v1611_v17, %v883_v3  ;;  %v757_v6 = vpop.f32.mrb[13].mxu0  ;;  %v885_v7 = vpop.f32.mrb[13].mxu1 }
 0x133   : > { %v758_v8 = vpop.f32.mrb[14].mxu0  ;;  %v886_v9 = vpop.f32.mrb[14].mxu1 }
 0x134   : > { %v992_v10 = vmax.f32 %v756_v4, 0.0  ;;  %v1024_v11 = vmax.f32 %v884_v5, 0.0  ;;  %v759_v12 = vadd.f32 %v1611_v17, %v758_v8  ;;  %v887_v13 = vadd.f32 %v1611_v17, %v886_v9  ;;  %v760_v14 = vpop.f32.mrb[15].mxu0  ;;  %v888_v15 = vpop.f32.mrb[15].mxu1 }
 0x136   : > { %1056 = vst [vmem:[%s1620_s28 + $0x30] sm:$0xff] %v992_v10  ;;  %1088 = vst [vmem:[%s1620_s28 + $0x130] sm:$0xff] %v1024_v11  ;;  %v993_v16 = vmax.f32 %v759_v12, 0.0  ;;  %v1025_v18 = vmax.f32 %v887_v13, 0.0 }
 0x138   : > { %1057 = vst [vmem:[%s1620_s28 + $0x38] sm:$0xff] %v993_v16  ;;  %1089 = vst [vmem:[%s1620_s28 + $0x138] sm:$0xff] %v1025_v18 }
 0x139   : > { %v763_v19 = vpop.f32.mrb[16].mxu0  ;;  %v891_v20 = vpop.f32.mrb[16].mxu1 }
 0x13a   : > { %v764_v21 = vadd.f32 %v1611_v17, %v763_v19  ;;  %v892_v22 = vadd.f32 %v1611_v17, %v891_v20  ;;  %v765_v23 = vpop.f32.mrb[17].mxu0  ;;  %v893_v24 = vpop.f32.mrb[17].mxu1 }
 0x13b   : > { %v766_v25 = vpop.f32.mrb[18].mxu0  ;;  %v894_v26 = vpop.f32.mrb[18].mxu1 }
 0x13c   : > { %v994_v27 = vmax.f32 %v764_v21, 0.0  ;;  %v1026_v28 = vmax.f32 %v892_v22, 0.0  ;;  %v767_v29 = vadd.f32 %v1611_v17, %v766_v25  ;;  %v895_v30 = vadd.f32 %v1611_v17, %v894_v26  ;;  %v768_v31 = vpop.f32.mrb[19].mxu0  ;;  %v896_v32 = vpop.f32.mrb[19].mxu1 }
 0x13e   : > { %1058 = vst [vmem:[%s1620_s28 + $0x40] sm:$0xff] %v994_v27  ;;  %1090 = vst [vmem:[%s1620_s28 + $0x140] sm:$0xff] %v1026_v28  ;;  %v995_v33 = vmax.f32 %v767_v29, 0.0  ;;  %v1027_v34 = vmax.f32 %v895_v30, 0.0 }
 0x140   : > { %1059 = vst [vmem:[%s1620_s28 + $0x48] sm:$0xff] %v995_v33  ;;  %1091 = vst [vmem:[%s1620_s28 + $0x148] sm:$0xff] %v1027_v34 }
 0x141   : > { %v771_v35 = vpop.f32.mrb[20].mxu0  ;;  %v899_v36 = vpop.f32.mrb[20].mxu1 }
 0x142   : > { %v772_v37 = vadd.f32 %v1611_v17, %v771_v35  ;;  %v900_v38 = vadd.f32 %v1611_v17, %v899_v36  ;;  %v773_v39 = vpop.f32.mrb[21].mxu0  ;;  %v901_v40 = vpop.f32.mrb[21].mxu1 }
 0x143   : > { %v774_v41 = vpop.f32.mrb[22].mxu0  ;;  %v902_v42 = vpop.f32.mrb[22].mxu1 }
 0x144   : > { %v996_v43 = vmax.f32 %v772_v37, 0.0  ;;  %v1028_v44 = vmax.f32 %v900_v38, 0.0  ;;  %v775_v45 = vadd.f32 %v1611_v17, %v774_v41  ;;  %v903_v46 = vadd.f32 %v1611_v17, %v902_v42  ;;  %v776_v47 = vpop.f32.mrb[23].mxu0  ;;  %v904_v48 = vpop.f32.mrb[23].mxu1 }
 0x146   : > { %1060 = vst [vmem:[%s1620_s28 + $0x50] sm:$0xff] %v996_v43  ;;  %1092 = vst [vmem:[%s1620_s28 + $0x150] sm:$0xff] %v1028_v44  ;;  %v997_v49 = vmax.f32 %v775_v45, 0.0  ;;  %v1029_v50 = vmax.f32 %v903_v46, 0.0 }
 0x148   : > { %1061 = vst [vmem:[%s1620_s28 + $0x58] sm:$0xff] %v997_v49  ;;  %1093 = vst [vmem:[%s1620_s28 + $0x158] sm:$0xff] %v1029_v50 }
 0x149   : > { %v779_v51 = vpop.f32.mrb[24].mxu0  ;;  %v907_v52 = vpop.f32.mrb[24].mxu1 }
 0x14a   : > { %v780_v53 = vadd.f32 %v1611_v17, %v779_v51  ;;  %v908_v54 = vadd.f32 %v1611_v17, %v907_v52  ;;  %v781_v55 = vpop.f32.mrb[25].mxu0  ;;  %v909_v56 = vpop.f32.mrb[25].mxu1 }
 0x14b   : > { %v782_v57 = vpop.f32.mrb[26].mxu0  ;;  %v910_v58 = vpop.f32.mrb[26].mxu1 }
 0x14c   : > { %v998_v59 = vmax.f32 %v780_v53, 0.0  ;;  %v1030_v60 = vmax.f32 %v908_v54, 0.0  ;;  %v783_v61 = vadd.f32 %v1611_v17, %v782_v57  ;;  %v911_v62 = vadd.f32 %v1611_v17, %v910_v58  ;;  %v784_v63 = vpop.f32.mrb[27].mxu0  ;;  %v912_v0 = vpop.f32.mrb[27].mxu1 }
 0x14e   : > { %1062 = vst [vmem:[%s1620_s28 + $0x60] sm:$0xff] %v998_v59  ;;  %1094 = vst [vmem:[%s1620_s28 + $0x160] sm:$0xff] %v1030_v60  ;;  %v999_v1 = vmax.f32 %v783_v61, 0.0  ;;  %v1031_v2 = vmax.f32 %v911_v62, 0.0 }
 0x150   : > { %1063 = vst [vmem:[%s1620_s28 + $0x68] sm:$0xff] %v999_v1  ;;  %1095 = vst [vmem:[%s1620_s28 + $0x168] sm:$0xff] %v1031_v2 }
 0x151   : > { %v787_v3 = vpop.f32.mrb[28].mxu0  ;;  %v915_v4 = vpop.f32.mrb[28].mxu1 }
 0x152   : > { %v788_v5 = vadd.f32 %v1611_v17, %v787_v3  ;;  %v916_v6 = vadd.f32 %v1611_v17, %v915_v4  ;;  %v789_v7 = vpop.f32.mrb[29].mxu0  ;;  %v917_v8 = vpop.f32.mrb[29].mxu1 }
 0x153   : > { %v790_v9 = vpop.f32.mrb[30].mxu0  ;;  %v918_v10 = vpop.f32.mrb[30].mxu1 }
 0x154   : > { %v1000_v11 = vmax.f32 %v788_v5, 0.0  ;;  %v1032_v12 = vmax.f32 %v916_v6, 0.0  ;;  %v791_v13 = vadd.f32 %v1611_v17, %v790_v9  ;;  %v919_v14 = vadd.f32 %v1611_v17, %v918_v10  ;;  %v792_v15 = vpop.f32.mrb[31].mxu0  ;;  %v920_v16 = vpop.f32.mrb[31].mxu1 }
 0x156   : > { %1064 = vst [vmem:[%s1620_s28 + $0x70] sm:$0xff] %v1000_v11  ;;  %1096 = vst [vmem:[%s1620_s28 + $0x170] sm:$0xff] %v1032_v12  ;;  %v1001_v18 = vmax.f32 %v791_v13, 0.0  ;;  %v1033_v19 = vmax.f32 %v919_v14, 0.0 }
 0x158   : > { %1065 = vst [vmem:[%s1620_s28 + $0x78] sm:$0xff] %v1001_v18  ;;  %1097 = vst [vmem:[%s1620_s28 + $0x178] sm:$0xff] %v1033_v19 }
 0x159   : > { %v795_v20 = vpop.f32.mrb[32].mxu0  ;;  %v923_v21 = vpop.f32.mrb[32].mxu1 }
 0x15a   : > { %v796_v22 = vadd.f32 %v1611_v17, %v795_v20  ;;  %v924_v23 = vadd.f32 %v1611_v17, %v923_v21  ;;  %v797_v24 = vpop.f32.mrb[33].mxu0  ;;  %v925_v25 = vpop.f32.mrb[33].mxu1 }
 0x15b   : > { %v798_v26 = vpop.f32.mrb[34].mxu0  ;;  %v926_v27 = vpop.f32.mrb[34].mxu1 }
 0x15c   : > { %v1002_v28 = vmax.f32 %v796_v22, 0.0  ;;  %v1034_v29 = vmax.f32 %v924_v23, 0.0  ;;  %v799_v30 = vadd.f32 %v1611_v17, %v798_v26  ;;  %v927_v31 = vadd.f32 %v1611_v17, %v926_v27  ;;  %v800_v32 = vpop.f32.mrb[35].mxu0  ;;  %v928_v33 = vpop.f32.mrb[35].mxu1 }
 0x15e   : > { %1066 = vst [vmem:[%s1620_s28 + $0x80] sm:$0xff] %v1002_v28  ;;  %1098 = vst [vmem:[%s1620_s28 + $0x180] sm:$0xff] %v1034_v29  ;;  %v1003_v34 = vmax.f32 %v799_v30, 0.0  ;;  %v1035_v35 = vmax.f32 %v927_v31, 0.0 }
 0x160   : > { %1067 = vst [vmem:[%s1620_s28 + $0x88] sm:$0xff] %v1003_v34  ;;  %1099 = vst [vmem:[%s1620_s28 + $0x188] sm:$0xff] %v1035_v35 }
 0x161   : > { %v803_v36 = vpop.f32.mrb[36].mxu0  ;;  %v931_v37 = vpop.f32.mrb[36].mxu1 }
 0x162   : > { %v804_v38 = vadd.f32 %v1611_v17, %v803_v36  ;;  %v932_v39 = vadd.f32 %v1611_v17, %v931_v37  ;;  %v805_v40 = vpop.f32.mrb[37].mxu0  ;;  %v933_v41 = vpop.f32.mrb[37].mxu1 }
 0x163   : > { %v806_v42 = vpop.f32.mrb[38].mxu0  ;;  %v934_v43 = vpop.f32.mrb[38].mxu1 }
 0x164   : > { %v1004_v44 = vmax.f32 %v804_v38, 0.0  ;;  %v1036_v45 = vmax.f32 %v932_v39, 0.0  ;;  %v807_v46 = vadd.f32 %v1611_v17, %v806_v42  ;;  %v935_v47 = vadd.f32 %v1611_v17, %v934_v43  ;;  %v808_v48 = vpop.f32.mrb[39].mxu0  ;;  %v936_v49 = vpop.f32.mrb[39].mxu1 }
 0x166   : > { %1068 = vst [vmem:[%s1620_s28 + $0x90] sm:$0xff] %v1004_v44  ;;  %1100 = vst [vmem:[%s1620_s28 + $0x190] sm:$0xff] %v1036_v45  ;;  %v1005_v50 = vmax.f32 %v807_v46, 0.0  ;;  %v1037_v51 = vmax.f32 %v935_v47, 0.0 }
 0x168   : > { %1069 = vst [vmem:[%s1620_s28 + $0x98] sm:$0xff] %v1005_v50  ;;  %1101 = vst [vmem:[%s1620_s28 + $0x198] sm:$0xff] %v1037_v51 }
 0x169   : > { %v811_v52 = vpop.f32.mrb[40].mxu0  ;;  %v939_v53 = vpop.f32.mrb[40].mxu1 }
 0x16a   : > { %v812_v54 = vadd.f32 %v1611_v17, %v811_v52  ;;  %v940_v55 = vadd.f32 %v1611_v17, %v939_v53  ;;  %v813_v56 = vpop.f32.mrb[41].mxu0  ;;  %v941_v57 = vpop.f32.mrb[41].mxu1 }
 0x16b   : > { %v814_v58 = vpop.f32.mrb[42].mxu0  ;;  %v942_v59 = vpop.f32.mrb[42].mxu1 }
 0x16c   : > { %v1006_v60 = vmax.f32 %v812_v54, 0.0  ;;  %v1038_v61 = vmax.f32 %v940_v55, 0.0  ;;  %v815_v62 = vadd.f32 %v1611_v17, %v814_v58  ;;  %v943_v63 = vadd.f32 %v1611_v17, %v942_v59  ;;  %v816_v0 = vpop.f32.mrb[43].mxu0  ;;  %v944_v1 = vpop.f32.mrb[43].mxu1 }
 0x16e   : > { %1070 = vst [vmem:[%s1620_s28 + $0xa0] sm:$0xff] %v1006_v60  ;;  %1102 = vst [vmem:[%s1620_s28 + $0x1a0] sm:$0xff] %v1038_v61  ;;  %v1007_v2 = vmax.f32 %v815_v62, 0.0  ;;  %v1039_v3 = vmax.f32 %v943_v63, 0.0 }
 0x170   : > { %1071 = vst [vmem:[%s1620_s28 + $0xa8] sm:$0xff] %v1007_v2  ;;  %1103 = vst [vmem:[%s1620_s28 + $0x1a8] sm:$0xff] %v1039_v3 }
 0x171   : > { %v819_v4 = vpop.f32.mrb[44].mxu0  ;;  %v947_v5 = vpop.f32.mrb[44].mxu1 }
 0x172   : > { %v820_v6 = vadd.f32 %v1611_v17, %v819_v4  ;;  %v948_v7 = vadd.f32 %v1611_v17, %v947_v5  ;;  %v821_v8 = vpop.f32.mrb[45].mxu0  ;;  %v949_v9 = vpop.f32.mrb[45].mxu1 }
 0x173   : > { %v822_v10 = vpop.f32.mrb[46].mxu0  ;;  %v950_v11 = vpop.f32.mrb[46].mxu1 }
 0x174   : > { %v1008_v12 = vmax.f32 %v820_v6, 0.0  ;;  %v1040_v13 = vmax.f32 %v948_v7, 0.0  ;;  %v823_v14 = vadd.f32 %v1611_v17, %v822_v10  ;;  %v951_v15 = vadd.f32 %v1611_v17, %v950_v11  ;;  %v824_v16 = vpop.f32.mrb[47].mxu0  ;;  %v952_v18 = vpop.f32.mrb[47].mxu1 }
 0x176   : > { %1072 = vst [vmem:[%s1620_s28 + $0xb0] sm:$0xff] %v1008_v12  ;;  %1104 = vst [vmem:[%s1620_s28 + $0x1b0] sm:$0xff] %v1040_v13  ;;  %v1009_v19 = vmax.f32 %v823_v14, 0.0  ;;  %v1041_v20 = vmax.f32 %v951_v15, 0.0 }
 0x178   : > { %1073 = vst [vmem:[%s1620_s28 + $0xb8] sm:$0xff] %v1009_v19  ;;  %1105 = vst [vmem:[%s1620_s28 + $0x1b8] sm:$0xff] %v1041_v20 }
 0x179   : > { %v827_v21 = vpop.f32.mrb[48].mxu0  ;;  %v955_v22 = vpop.f32.mrb[48].mxu1 }
 0x17a   : > { %v828_v23 = vadd.f32 %v1611_v17, %v827_v21  ;;  %v956_v24 = vadd.f32 %v1611_v17, %v955_v22  ;;  %v829_v25 = vpop.f32.mrb[49].mxu0  ;;  %v957_v26 = vpop.f32.mrb[49].mxu1 }
 0x17b   : > { %v830_v27 = vpop.f32.mrb[50].mxu0  ;;  %v958_v28 = vpop.f32.mrb[50].mxu1 }
 0x17c   : > { %v1010_v29 = vmax.f32 %v828_v23, 0.0  ;;  %v1042_v30 = vmax.f32 %v956_v24, 0.0  ;;  %v831_v31 = vadd.f32 %v1611_v17, %v830_v27  ;;  %v959_v32 = vadd.f32 %v1611_v17, %v958_v28  ;;  %v832_v33 = vpop.f32.mrb[51].mxu0  ;;  %v960_v34 = vpop.f32.mrb[51].mxu1 }
 0x17e   : > { %1074 = vst [vmem:[%s1620_s28 + $0xc0] sm:$0xff] %v1010_v29  ;;  %1106 = vst [vmem:[%s1620_s28 + $0x1c0] sm:$0xff] %v1042_v30  ;;  %v1011_v35 = vmax.f32 %v831_v31, 0.0  ;;  %v1043_v36 = vmax.f32 %v959_v32, 0.0 }
 0x180   : > { %1075 = vst [vmem:[%s1620_s28 + $0xc8] sm:$0xff] %v1011_v35  ;;  %1107 = vst [vmem:[%s1620_s28 + $0x1c8] sm:$0xff] %v1043_v36 }
 0x181   : > { %v835_v37 = vpop.f32.mrb[52].mxu0  ;;  %v963_v38 = vpop.f32.mrb[52].mxu1 }
 0x182   : > { %v836_v39 = vadd.f32 %v1611_v17, %v835_v37  ;;  %v964_v40 = vadd.f32 %v1611_v17, %v963_v38  ;;  %v837_v41 = vpop.f32.mrb[53].mxu0  ;;  %v965_v42 = vpop.f32.mrb[53].mxu1 }
 0x183   : > { %v838_v43 = vpop.f32.mrb[54].mxu0  ;;  %v966_v44 = vpop.f32.mrb[54].mxu1 }
 0x184   : > { %v1012_v45 = vmax.f32 %v836_v39, 0.0  ;;  %v1044_v46 = vmax.f32 %v964_v40, 0.0  ;;  %v839_v47 = vadd.f32 %v1611_v17, %v838_v43  ;;  %v967_v48 = vadd.f32 %v1611_v17, %v966_v44  ;;  %v840_v49 = vpop.f32.mrb[55].mxu0  ;;  %v968_v50 = vpop.f32.mrb[55].mxu1 }
 0x186   : > { %1076 = vst [vmem:[%s1620_s28 + $0xd0] sm:$0xff] %v1012_v45  ;;  %1108 = vst [vmem:[%s1620_s28 + $0x1d0] sm:$0xff] %v1044_v46  ;;  %v1013_v51 = vmax.f32 %v839_v47, 0.0  ;;  %v1045_v52 = vmax.f32 %v967_v48, 0.0 }
 0x188   : > { %1077 = vst [vmem:[%s1620_s28 + $0xd8] sm:$0xff] %v1013_v51  ;;  %1109 = vst [vmem:[%s1620_s28 + $0x1d8] sm:$0xff] %v1045_v52 }
 0x189   : > { %v843_v53 = vpop.f32.mrb[56].mxu0  ;;  %v971_v54 = vpop.f32.mrb[56].mxu1 }
 0x18a   : > { %v844_v55 = vadd.f32 %v1611_v17, %v843_v53  ;;  %v972_v56 = vadd.f32 %v1611_v17, %v971_v54  ;;  %v845_v57 = vpop.f32.mrb[57].mxu0  ;;  %v973_v58 = vpop.f32.mrb[57].mxu1 }
 0x18b   : > { %v846_v59 = vpop.f32.mrb[58].mxu0  ;;  %v974_v60 = vpop.f32.mrb[58].mxu1 }
 0x18c   : > { %v1014_v61 = vmax.f32 %v844_v55, 0.0  ;;  %v1046_v62 = vmax.f32 %v972_v56, 0.0  ;;  %v847_v63 = vadd.f32 %v1611_v17, %v846_v59  ;;  %v975_v0 = vadd.f32 %v1611_v17, %v974_v60  ;;  %v848_v1 = vpop.f32.mrb[59].mxu0  ;;  %v976_v2 = vpop.f32.mrb[59].mxu1 }
 0x18e   : > { %1078 = vst [vmem:[%s1620_s28 + $0xe0] sm:$0xff] %v1014_v61  ;;  %1110 = vst [vmem:[%s1620_s28 + $0x1e0] sm:$0xff] %v1046_v62  ;;  %v1015_v3 = vmax.f32 %v847_v63, 0.0  ;;  %v1047_v4 = vmax.f32 %v975_v0, 0.0 }
 0x190   : > { %1079 = vst [vmem:[%s1620_s28 + $0xe8] sm:$0xff] %v1015_v3  ;;  %1111 = vst [vmem:[%s1620_s28 + $0x1e8] sm:$0xff] %v1047_v4 }
 0x191   : > { %v851_v5 = vpop.f32.mrb[60].mxu0  ;;  %v979_v6 = vpop.f32.mrb[60].mxu1 }
 0x192   : > { %v852_v7 = vadd.f32 %v1611_v17, %v851_v5  ;;  %v980_v8 = vadd.f32 %v1611_v17, %v979_v6  ;;  %v853_v9 = vpop.f32.mrb[61].mxu0  ;;  %v981_v10 = vpop.f32.mrb[61].mxu1 }
 0x193   : > { %v854_v11 = vpop.f32.mrb[62].mxu0  ;;  %v982_v12 = vpop.f32.mrb[62].mxu1 }
 0x194   : > { %v1016_v13 = vmax.f32 %v852_v7, 0.0  ;;  %v1048_v14 = vmax.f32 %v980_v8, 0.0  ;;  %v855_v15 = vadd.f32 %v1611_v17, %v854_v11  ;;  %v983_v16 = vadd.f32 %v1611_v17, %v982_v12  ;;  %v856_v18 = vpop.f32.mrb[63].mxu0  ;;  %v984_v19 = vpop.f32.mrb[63].mxu1 }
 0x196   : > { %1080 = vst [vmem:[%s1620_s28 + $0xf0] sm:$0xff] %v1016_v13  ;;  %1112 = vst [vmem:[%s1620_s28 + $0x1f0] sm:$0xff] %v1048_v14  ;;  %v1017_v20 = vmax.f32 %v855_v15, 0.0  ;;  %v1049_v21 = vmax.f32 %v983_v16, 0.0 }
 0x198   : > { %1081 = vst [vmem:[%s1620_s28 + $0xf8] sm:$0xff] %v1017_v20  ;;  %1113 = vst [vmem:[%s1620_s28 + $0x1f8] sm:$0xff] %v1049_v21 }
 0x199 PF: > { %s13_s12 = sadd.s32 1, %s1423_s12  }
 0x19a   : > { %p10_p4 = scmp.ge.s32.totalorder %s13_s12, 12  }
 0x19c   :  { %12 = sbr.rel (!%p10_p4) target bundleno = 1 (0x1), region = 62 }

// kernel: tsfn_forward.7
= control target key start
LH: loop header
LB: loop body
LE: loop exit
PB: predicated region body
PF: predicated region fallthrough
CT: control target
= control target key end

     0   :  { %v1604_v1 = vmov 0   ;;  %s2065_s1 = inlined_call_operand.vmem [shape: bf16[640,384], index: 1, kind: input, shape index: {}]   ;;  %s2066_s0 = inlined_call_operand.vmem [shape: bf16[24,640], index: 0, kind: input, shape index: {}]   ;;  %s2067_s2 = inlined_call_operand.vmem [shape: f32[1,384], index: 2, kind: input, shape index: {}]   ;;  %s2068_s3 = inlined_call_operand.vmem [shape: f32[24,384], index: 3, kind: output, shape index: {}]  }
   0x1   :  { %v1432_v0 = vld [vmem:[%s2065_s1 + $0x4] ss:$12 sps:$4 sm:$0xff]   ;;  %1019 = vmatprep.mubr.bf16.mxu1 %v1604_v1  ;;  %v1436_v3 = vld [vmem:[%s2065_s1] ss:$12 sps:$4 sm:$0xff]   ;;  %v1438_v5 = vld [vmem:[%s2065_s1 + $0x1c] ss:$12 sps:$4 sm:$0xff]  }
   0x2   :  { %v1434_v2 = vld [vmem:[%s2065_s1 + $0x304] ss:$12 sps:$4 sm:$0xff]   ;;  %885 = vmatprep.subr.bf16.mxu0 %v1432_v0  ;;  %v1437_v4 = vld [vmem:[%s2065_s1 + $0x300] ss:$12 sps:$4 sm:$0xff]   ;;  %v1440_v6 = vld [vmem:[%s2065_s1 + $0x31c] ss:$12 sps:$4 sm:$0xff]  }
   0x3   :  { %987 = vmatprep.subr.bf16.mxu1 %v1434_v2  ;;  %886 = vmatpush1.bf16.msra.mxu0 %v1436_v3  ;;  %v1442_v7 = vld [vmem:[%s2065_s1 + $0x18] ss:$12 sps:$4 sm:$0xff]   ;;  %v1444_v9 = vld [vmem:[%s2065_s1 + $0x34] ss:$12 sps:$4 sm:$0xff]   ;;  %v1448_v11 = vld [vmem:[%s2065_s1 + $0x30] ss:$12 sps:$4 sm:$0xff]  }
   0x4   :  { %988 = vmatpush1.bf16.msra.mxu1 %v1437_v4  ;;  %887 = vmatprep.subr.bf16.mxu0 %v1438_v5  ;;  %v1443_v8 = vld [vmem:[%s2065_s1 + $0x318] ss:$12 sps:$4 sm:$0xff]   ;;  %v1446_v10 = vld [vmem:[%s2065_s1 + $0x334] ss:$12 sps:$4 sm:$0xff]   ;;  %v1449_v12 = vld [vmem:[%s2065_s1 + $0x330] ss:$12 sps:$4 sm:$0xff]  }
   0x5   :  { %989 = vmatprep.subr.bf16.mxu1 %v1440_v6  ;;  %v1450_v13 = vld [vmem:[%s2065_s1 + $0x4c] ss:$12 sps:$4 sm:$0xff]   ;;  %v1454_v15 = vld [vmem:[%s2065_s1 + $0x48] ss:$12 sps:$4 sm:$0xff]   ;;  %v1456_v17 = vld [vmem:[%s2065_s1 + $0x64] ss:$12 sps:$4 sm:$0xff]  }
   0x6   :  { %v1452_v14 = vld [vmem:[%s2065_s1 + $0x34c] ss:$12 sps:$4 sm:$0xff]   ;;  %v1455_v16 = vld [vmem:[%s2065_s1 + $0x348] ss:$12 sps:$4 sm:$0xff]   ;;  %v1458_v18 = vld [vmem:[%s2065_s1 + $0x364] ss:$12 sps:$4 sm:$0xff]  }
   0x7   :  { %888 = vmatpush1.bf16.msra.mxu0 %v1442_v7  ;;  %v1460_v19 = vld [vmem:[%s2065_s1 + $0x60] ss:$12 sps:$4 sm:$0xff]   ;;  %v1462_v21 = vld [vmem:[%s2065_s1 + $0x7c] ss:$12 sps:$4 sm:$0xff]   ;;  %v1466_v23 = vld [vmem:[%s2065_s1 + $0x78] ss:$12 sps:$4 sm:$0xff]  }
   0x8   :  { %990 = vmatpush1.bf16.msra.mxu1 %v1443_v8  ;;  %889 = vmatprep.subr.bf16.mxu0 %v1444_v9  ;;  %v1461_v20 = vld [vmem:[%s2065_s1 + $0x360] ss:$12 sps:$4 sm:$0xff]   ;;  %v1464_v22 = vld [vmem:[%s2065_s1 + $0x37c] ss:$12 sps:$4 sm:$0xff]   ;;  %v1467_v24 = vld [vmem:[%s2065_s1 + $0x378] ss:$12 sps:$4 sm:$0xff]  }
   0x9   :  { %991 = vmatprep.subr.bf16.mxu1 %v1446_v10  ;;  %v1468_v25 = vld [vmem:[%s2065_s1 + $0x94] ss:$12 sps:$4 sm:$0xff]   ;;  %v1472_v27 = vld [vmem:[%s2065_s1 + $0x90] ss:$12 sps:$4 sm:$0xff]   ;;  %v1474_v29 = vld [vmem:[%s2065_s1 + $0xac] ss:$12 sps:$4 sm:$0xff]  }
   0xa   :  { %v1470_v26 = vld [vmem:[%s2065_s1 + $0x394] ss:$12 sps:$4 sm:$0xff]   ;;  %v1473_v28 = vld [vmem:[%s2065_s1 + $0x390] ss:$12 sps:$4 sm:$0xff]   ;;  %v1476_v30 = vld [vmem:[%s2065_s1 + $0x3ac] ss:$12 sps:$4 sm:$0xff]  }
   0xb   :  { %890 = vmatpush1.bf16.msra.mxu0 %v1448_v11  ;;  %v1478_v31 = vld [vmem:[%s2065_s1 + $0xa8] ss:$12 sps:$4 sm:$0xff]   ;;  %v1480_v33 = vld [vmem:[%s2065_s1 + $0xc4] ss:$12 sps:$4 sm:$0xff]   ;;  %v1483_v35 = vld [vmem:[%s2065_s1 + $0xc0] ss:$12 sps:$4 sm:$0xff]  }
   0xc   :  { %992 = vmatpush1.bf16.msra.mxu1 %v1449_v12  ;;  %891 = vmatprep.subr.bf16.mxu0 %v1450_v13  ;;  %v1479_v32 = vld [vmem:[%s2065_s1 + $0x3a8] ss:$12 sps:$4 sm:$0xff]   ;;  %v1734_v36 = vld [vmem:[%s2066_s0 + $0x10] ss:$20 sps:$4 sm:$0xff]   ;;  %v1488_v39 = vld [vmem:[%s2065_s1 + $0xe0] ss:$12 sps:$4 sm:$0xff]  }
   0xd   :  { %993 = vmatprep.subr.bf16.mxu1 %v1452_v14  ;;  %v1482_v34 = vld [vmem:[%s2065_s1 + $0xc8] ss:$12 sps:$4 sm:$0xff]   ;;  %v1489_v40 = vld [vmem:[%s2065_s1 + $0xd8] ss:$12 sps:$4 sm:$0xff]   ;;  %v1490_v41 = vld [vmem:[%s2065_s1 + $0x20] ss:$12 sps:$4 sm:$0xff]  }
   0xe   :  { %v1485_v37 = vld [vmem:[%s2065_s1 + $0x8] ss:$12 sps:$4 sm:$0xff]   ;;  %v1493_v43 = vld [vmem:[%s2065_s1 + $0xf8] ss:$12 sps:$4 sm:$0xff]   ;;  %v1494_v44 = vld [vmem:[%s2065_s1 + $0xf0] ss:$12 sps:$4 sm:$0xff]  }
   0xf   :  { %892 = vmatpush1.bf16.msra.mxu0 %v1454_v15  ;;  %v1486_v38 = vld [vmem:[%s2065_s1 + $0xdc] ss:$12 sps:$4 sm:$0xff]   ;;  %v1491_v42 = vld [vmem:[%s2065_s1 + $0xf4] ss:$12 sps:$4 sm:$0xff]   ;;  %v1495_v45 = vld [vmem:[%s2065_s1 + $0x38] ss:$12 sps:$4 sm:$0xff]  }
  0x10   :  { %994 = vmatpush1.bf16.msra.mxu1 %v1455_v16  ;;  %893 = vmatprep.subr.bf16.mxu0 %v1456_v17  ;;  %v1496_v46 = vld [vmem:[%s2065_s1 + $0x10c] ss:$12 sps:$4 sm:$0xff]   ;;  %v1498_v47 = vld [vmem:[%s2065_s1 + $0x110] ss:$12 sps:$4 sm:$0xff]   ;;  %v1499_v48 = vld [vmem:[%s2065_s1 + $0x108] ss:$12 sps:$4 sm:$0xff]  }
  0x11   :  { %995 = vmatprep.subr.bf16.mxu1 %v1458_v18  ;;  %v1500_v49 = vld [vmem:[%s2065_s1 + $0x50] ss:$12 sps:$4 sm:$0xff]   ;;  %v1503_v51 = vld [vmem:[%s2065_s1 + $0x128] ss:$12 sps:$4 sm:$0xff]   ;;  %v1786_v52 = vld [vmem:[%s2066_s0 + $0x38] ss:$0 sps:$4 sm:$0xff]  }
  0x12   :  { %v1501_v50 = vld [vmem:[%s2065_s1 + $0x124] ss:$12 sps:$4 sm:$0xff]   ;;  %v1504_v53 = vld [vmem:[%s2065_s1 + $0x120] ss:$12 sps:$4 sm:$0xff]   ;;  %v1505_v54 = vld [vmem:[%s2065_s1 + $0x68] ss:$12 sps:$4 sm:$0xff]  }
  0x13   :  { %894 = vmatpush1.bf16.msra.mxu0 %v1460_v19  ;;  %v1506_v55 = vld [vmem:[%s2065_s1 + $0x13c] ss:$12 sps:$4 sm:$0xff]   ;;  %v1508_v56 = vld [vmem:[%s2065_s1 + $0x140] ss:$12 sps:$4 sm:$0xff]   ;;  %v1509_v57 = vld [vmem:[%s2065_s1 + $0x138] ss:$12 sps:$4 sm:$0xff]  }
  0x14   :  { %996 = vmatpush1.bf16.msra.mxu1 %v1461_v20  ;;  %895 = vmatprep.subr.bf16.mxu0 %v1462_v21  ;;  %v1524_v58 = vld [vmem:[%s2066_s0 + $0x4] ss:$20 sps:$4 sm:$0xff]   ;;  %v1510_v59 = vld [vmem:[%s2065_s1 + $0x80] ss:$12 sps:$4 sm:$0xff]   ;;  %v1514_v62 = vld [vmem:[%s2065_s1 + $0x150] ss:$12 sps:$4 sm:$0xff]  }
  0x15   :  { %997 = vmatprep.subr.bf16.mxu1 %v1464_v22  ;;  %v1511_v60 = vld [vmem:[%s2065_s1 + $0x154] ss:$12 sps:$4 sm:$0xff]   ;;  %v1513_v61 = vld [vmem:[%s2065_s1 + $0x158] ss:$12 sps:$4 sm:$0xff]   ;;  %917 = vmatprep.mubr.bf16.mxu0 %v1524_v58  ;;  %v1521_v3 = vld [vmem:[%s2065_s1 + $0xb0] ss:$12 sps:$4 sm:$0xff]  }
  0x16   :  { %v1516_v63 = vld [vmem:[%s2065_s1 + $0x98] ss:$12 sps:$4 sm:$0xff]   ;;  %v1520_v2 = vld [vmem:[%s2065_s1 + $0x168] ss:$12 sps:$4 sm:$0xff]   ;;  %v1525_v7 = vld [vmem:[%s2065_s1 + $0x180] ss:$12 sps:$4 sm:$0xff]  }
  0x17   :  { %896 = vmatpush1.bf16.msra.mxu0 %v1466_v23  ;;  %v1517_v0 = vld [vmem:[%s2065_s1 + $0x16c] ss:$12 sps:$4 sm:$0xff]   ;;  %v1527_v4 = vld [vmem:[%s2065_s1 + $0x184] ss:$12 sps:$4 sm:$0xff]   ;;  %v1528_v5 = vld [vmem:[%s2065_s1 + $0x248] ss:$12 sps:$4 sm:$0xff]  }
  0x18   :  { %998 = vmatpush1.bf16.msra.mxu1 %v1467_v24  ;;  %897 = vmatprep.subr.bf16.mxu0 %v1468_v25  ;;  %v1522_v6 = vld [vmem:[%s2066_s0] ss:$20 sps:$4 sm:$0xff]   ;;  %v1532_v9 = vld [vmem:[%s2065_s1 + $0x19c] ss:$12 sps:$4 sm:$0xff]   ;;  %v1530_v11 = vld [vmem:[%s2065_s1 + $0x198] ss:$12 sps:$4 sm:$0xff]  }
  0x19   :  { %999 = vmatprep.subr.bf16.mxu1 %v1470_v26  ;;  %v1529_v8 = vld [vmem:[%s2065_s1 + $0x188] ss:$12 sps:$4 sm:$0xff]   ;;  %v1533_v10 = vld [vmem:[%s2065_s1 + $0x260] ss:$12 sps:$4 sm:$0xff]   ;;  %v1538_v14 = vld [vmem:[%s2065_s1 + $0x278] ss:$12 sps:$4 sm:$0xff]  }
  0x1a   :  { %v1534_v12 = vld [vmem:[%s2065_s1 + $0x1a0] ss:$12 sps:$4 sm:$0xff]   ;;  %v1535_v15 = vld [vmem:[%s2065_s1 + $0x1b0] ss:$12 sps:$4 sm:$0xff]   ;;  %v1539_v17 = vld [vmem:[%s2065_s1 + $0x1b8] ss:$12 sps:$4 sm:$0xff]  }
  0x1b   :  { %898 = vmatpush1.bf16.msra.mxu0 %v1472_v27  ;;  %v1537_v13 = vld [vmem:[%s2065_s1 + $0x1b4] ss:$12 sps:$4 sm:$0xff]   ;;  %v21_v16 = vld [vmem:[%s2066_s0 + $0x28] sm:$0xff]  ;;  %v1543_v21 = vld [vmem:[%s2065_s1 + $0x290] ss:$12 sps:$4 sm:$0xff]  }
  0x1c   :  { %1000 = vmatpush1.bf16.msra.mxu1 %v1473_v28  ;;  %899 = vmatprep.subr.bf16.mxu0 %v1474_v29  ;;  %v1542_v18 = vld [vmem:[%s2065_s1 + $0x1cc] ss:$12 sps:$4 sm:$0xff]   ;;  %v1201_v19 = vcombine.high %v21_v16, %v21_v16  ;;  %v1200_v20 = vcombine.low %v21_v16, %v21_v16  ;;  %v1540_v22 = vld [vmem:[%s2065_s1 + $0x1c8] ss:$12 sps:$4 sm:$0xff]   ;;  %v1544_v23 = vld [vmem:[%s2065_s1 + $0x1d0] ss:$12 sps:$4 sm:$0xff]  }
  0x1d   :  { %1001 = vmatprep.subr.bf16.mxu1 %v1476_v30  ;;  %v1547_v24 = vld [vmem:[%s2065_s1 + $0x1e4] ss:$12 sps:$4 sm:$0xff]   ;;  %v1548_v25 = vld [vmem:[%s2065_s1 + $0x2a8] ss:$12 sps:$4 sm:$0xff]   ;;  %v1545_v26 = vld [vmem:[%s2065_s1 + $0x1e0] ss:$12 sps:$4 sm:$0xff]  }
  0x1e   :  { %v1569_v27 = vld [vmem:[%s2066_s0 + $0xc] ss:$20 sps:$4 sm:$0xff]   ;;  %v1549_v28 = vld [vmem:[%s2065_s1 + $0x1e8] ss:$12 sps:$4 sm:$0xff]  }
  0x1f   :  { %900 = vmatpush1.bf16.msra.mxu0 %v1478_v31  ;;  %v1552_v29 = vld [vmem:[%s2065_s1 + $0x1fc] ss:$12 sps:$4 sm:$0xff]   ;;  %v1553_v30 = vld [vmem:[%s2065_s1 + $0x2c0] ss:$12 sps:$4 sm:$0xff]   ;;  %v1550_v31 = vld [vmem:[%s2065_s1 + $0x1f8] ss:$12 sps:$4 sm:$0xff]  }
  0x20   :  { %1002 = vmatpush1.bf16.msra.mxu1 %v1479_v32  ;;  %901 = vmatprep.subr.bf16.mxu0 %v1480_v33  ;;  %v1554_v32 = vld [vmem:[%s2065_s1 + $0x200] ss:$12 sps:$4 sm:$0xff]  }
  0x21   :  { %1325 = vmatprep.subr.bf16.mxu1 %v1482_v34  ;;  %v1558_v33 = vld [vmem:[%s2065_s1 + $0x214] ss:$12 sps:$4 sm:$0xff]   ;;  %v1560_v34 = vld [vmem:[%s2065_s1 + $0x2d8] ss:$12 sps:$4 sm:$0xff]  }
  0x23   :  { %1020 = vmatmul.mubr.bf16.vlgmr.msra.gmra.mrb[0].mxu1 %v1734_v36  ;;  %902 = vmatpush1.bf16.msra.mxu0 %v1483_v35  ;;  %v1556_v35 = vld [vmem:[%s2065_s1 + $0x210] ss:$12 sps:$4 sm:$0xff]  }
  0x24   :  { %1326 = vmatpush3.bf16.msra.mxu1 %v1485_v37  ;;  %903 = vmatprep.subr.bf16.mxu0 %v1486_v38  ;;  %v1561_v37 = vld [vmem:[%s2065_s1 + $0x218] ss:$12 sps:$4 sm:$0xff]  }
  0x25   :  { %1327 = vmatprep.subr.bf16.mxu1 %v1488_v39  ;;  %1029 = vmatprep.mubr.bf16.mxu1 %v1604_v1  ;;  %v1519_v1 = vld [vmem:[%s2065_s1 + $0x170] ss:$12 sps:$4 sm:$0xff]   ;;  %v1564_v38 = vld [vmem:[%s2065_s1 + $0x22c] ss:$12 sps:$4 sm:$0xff]  }
  0x26   :  { %v1565_v39 = vld [vmem:[%s2065_s1 + $0x2f0] ss:$12 sps:$4 sm:$0xff]  }
  0x27   :  { %904 = vmatpush1.bf16.msra.mxu0 %v1489_v40  ;;  %v1562_v40 = vld [vmem:[%s2065_s1 + $0x228] ss:$12 sps:$4 sm:$0xff]  }
  0x28   :  { %1328 = vmatpush3.bf16.msra.mxu1 %v1490_v41  ;;  %905 = vmatprep.subr.bf16.mxu0 %v1491_v42  ;;  %v1566_v41 = vld [vmem:[%s2065_s1 + $0x230] ss:$12 sps:$4 sm:$0xff]  }
  0x29   :  { %1329 = vmatprep.subr.bf16.mxu1 %v1493_v43  ;;  %v1572_v42 = vld [vmem:[%s2065_s1 + $0x244] ss:$12 sps:$4 sm:$0xff]   ;;  %v1573_v43 = vld [vmem:[%s2065_s1 + $0x308] ss:$12 sps:$4 sm:$0xff]  }
  0x2b   :  { %906 = vmatpush1.bf16.msra.mxu0 %v1494_v44  ;;  %1030 = vmatmul.mubr.bf16.gmra.mrb[4].mxu1 %v1786_v52  ;;  %v1948_v44 = vld [vmem:[%s2066_s0 + $0x8] ss:$20 sps:$4 sm:$0xff]  }
  0x2c   :  { %1330 = vmatpush3.bf16.msra.mxu1 %v1495_v45  ;;  %907 = vmatprep.subr.bf16.mxu0 %v1496_v46  ;;  %v1570_v45 = vld [vmem:[%s2065_s1 + $0x240] ss:$12 sps:$4 sm:$0xff]   ;;  %v22_v46 = vld [vmem:[%s2066_s0 + $0x30] sm:$0xff] }
  0x2d   :  { %1331 = vmatprep.subr.bf16.mxu1 %v1498_v47  ;;  %1070 = vmatprep.mubr.bf16.mxu1 %v1524_v58  ;;  %v1576_v47 = vld [vmem:[%s2065_s1 + $0x25c] ss:$12 sps:$4 sm:$0xff]  }
  0x2e   :  { %v1584_v58 = vld [vmem:[%s2065_s1 + $0x288] ss:$12 sps:$4 sm:$0xff]  }
  0x2f   :  { %908 = vmatpush1.bf16.msra.mxu0 %v1499_v48  ;;  %v1577_v48 = vld [vmem:[%s2065_s1 + $0x320] ss:$12 sps:$4 sm:$0xff]  }
  0x30   :  { %1332 = vmatpush3.bf16.msra.mxu1 %v1500_v49  ;;  %909 = vmatprep.subr.bf16.mxu0 %v1501_v50  ;;  %v1203_v49 = vcombine.high %v22_v46, %v22_v46  ;;  %v1574_v50 = vld [vmem:[%s2065_s1 + $0x258] ss:$12 sps:$4 sm:$0xff]  }
  0x31   :  { %1333 = vmatprep.subr.bf16.mxu1 %v1503_v51  ;;  %v1581_v51 = vld [vmem:[%s2065_s1 + $0x274] ss:$12 sps:$4 sm:$0xff]  }
  0x33   :  { %910 = vmatpush1.bf16.msra.mxu0 %v1504_v53  ;;  %v1583_v53 = vld [vmem:[%s2065_s1 + $0x338] ss:$12 sps:$4 sm:$0xff]  }
  0x34   :  { %1334 = vmatpush3.bf16.msra.mxu1 %v1505_v54  ;;  %911 = vmatprep.subr.bf16.mxu0 %v1506_v55  ;;  %v1202_v54 = vcombine.low %v22_v46, %v22_v46  ;;  %v1579_v55 = vld [vmem:[%s2065_s1 + $0x270] ss:$12 sps:$4 sm:$0xff]  }
  0x35   :  { %1335 = vmatprep.subr.bf16.mxu1 %v1508_v56  ;;  %v1586_v56 = vld [vmem:[%s2065_s1 + $0x28c] ss:$12 sps:$4 sm:$0xff]  }
  0x37   :  { %912 = vmatpush1.bf16.msra.mxu0 %v1509_v57  ;;  %v1587_v57 = vld [vmem:[%s2065_s1 + $0x350] ss:$12 sps:$4 sm:$0xff]  }
  0x38   :  { %1336 = vmatpush3.bf16.msra.mxu1 %v1510_v59  ;;  %913 = vmatprep.subr.bf16.mxu0 %v1511_v60  ;;  %v1590_v59 = vld [vmem:[%s2065_s1 + $0x2a4] ss:$12 sps:$4 sm:$0xff]   ;;  %v1591_v60 = vld [vmem:[%s2065_s1 + $0x368] ss:$12 sps:$4 sm:$0xff]  }
  0x39   :  { %1337 = vmatprep.subr.bf16.mxu1 %v1513_v61  ;;  %v1588_v61 = vld [vmem:[%s2065_s1 + $0x2a0] ss:$12 sps:$4 sm:$0xff]  }
  0x3b   :  { %914 = vmatpush1.bf16.msra.mxu0 %v1514_v62  ;;  %v1594_v62 = vld [vmem:[%s2065_s1 + $0x2bc] ss:$12 sps:$4 sm:$0xff]  }
  0x3c   :  { %1338 = vmatpush3.bf16.msra.mxu1 %v1516_v63  ;;  %915 = vmatprep.subr.bf16.mxu0 %v1517_v0  ;;  %v1595_v63 = vld [vmem:[%s2065_s1 + $0x380] ss:$12 sps:$4 sm:$0xff]  }
  0x3d   :  { %1339 = vmatprep.subr.bf16.mxu1 %v1519_v1  ;;  %v1598_v0 = vld [vmem:[%s2065_s1 + $0x2d4] ss:$12 sps:$4 sm:$0xff]   ;;  %v1599_v1 = vld [vmem:[%s2065_s1 + $0x398] ss:$12 sps:$4 sm:$0xff]  }
  0x3f   :  { %916 = vmatpush1.bf16.msra.mxu0 %v1520_v2  ;;  %v1596_v2 = vld [vmem:[%s2065_s1 + $0x2d0] ss:$12 sps:$4 sm:$0xff]  }
  0x40   :  { %1340 = vmatpush3.bf16.msra.mxu1 %v1521_v3  ;;  %936 = vmatprep.subr.bf16.mxu0 %v1527_v4  ;;  %v1602_v3 = vld [vmem:[%s2065_s1 + $0x2ec] ss:$12 sps:$4 sm:$0xff]   ;;  %v1603_v4 = vld [vmem:[%s2065_s1 + $0x3b0] ss:$12 sps:$4 sm:$0xff]  }
  0x41   :  { %1353 = vmatprep.subr.bf16.mxu1 %v1528_v5  ;;  %v1600_v5 = vld [vmem:[%s2065_s1 + $0x2e8] ss:$12 sps:$4 sm:$0xff]  }
  0x42   :  { %918 = vmatmul.mubr.bf16.vlgmr.msra.gmra.mrb[0].mxu0 %v1522_v6 }
  0x43   :  { %1071 = vmatmul.mubr.bf16.vlgmr.msra.gmra.mrb[8].mxu1 %v1522_v6  ;;  %937 = vmatpush1.bf16.msra.mxu0 %v1525_v7 }
  0x44   :  { %1354 = vmatpush3.bf16.msra.mxu1 %v1529_v8  ;;  %938 = vmatprep.subr.bf16.mxu0 %v1532_v9 }
  0x45   :  { %1355 = vmatprep.subr.bf16.mxu1 %v1533_v10  ;;  %1078 = vmatprep.mubr.bf16.mxu1 %v1201_v19 }
  0x46   :  { %927 = vmatprep.mubr.bf16.mxu0 %v1201_v19 }
  0x47   :  { %939 = vmatpush1.bf16.msra.mxu0 %v1530_v11 }
  0x48   :  { %1356 = vmatpush3.bf16.msra.mxu1 %v1534_v12  ;;  %940 = vmatprep.subr.bf16.mxu0 %v1537_v13 }
  0x49   :  { %1357 = vmatprep.subr.bf16.mxu1 %v1538_v14 }
  0x4a   :  { %928 = vmatmul.mubr.bf16.gmra.mrb[4].mxu0 %v1200_v20 }
  0x4b   :  { %1079 = vmatmul.mubr.bf16.gmra.mrb[12].mxu1 %v1200_v20  ;;  %941 = vmatpush1.bf16.msra.mxu0 %v1535_v15 }
  0x4c   :  { %1358 = vmatpush3.bf16.msra.mxu1 %v1539_v17  ;;  %942 = vmatprep.subr.bf16.mxu0 %v1542_v18 }
  0x4d   :  { %1359 = vmatprep.subr.bf16.mxu1 %v1543_v21  ;;  %1118 = vmatprep.mubr.bf16.mxu1 %v1569_v27 }
  0x4e   :  { %968 = vmatprep.mubr.bf16.mxu0 %v1569_v27  ;;  %v184_v27 = vld [vmem:[%s2067_s2] sm:$0x7] }
  0x4f   :  { %943 = vmatpush1.bf16.msra.mxu0 %v1540_v22 }
  0x50   :  { %1360 = vmatpush3.bf16.msra.mxu1 %v1544_v23  ;;  %944 = vmatprep.subr.bf16.mxu0 %v1547_v24  ;;  %v186_v24 = vlaneseq }
  0x51   :  { %1361 = vmatprep.subr.bf16.mxu1 %v1548_v25 }
  0x52   :  { %v187_v25 = vshrl.u32 %v186_v24, 7 }
  0x53   :  { %945 = vmatpush1.bf16.msra.mxu0 %v1545_v26 }
  0x54   :  { %1362 = vmatpush3.bf16.msra.mxu1 %v1549_v28  ;;  %946 = vmatprep.subr.bf16.mxu0 %v1552_v29  ;;  %v196_v26 = vsub.s32 2, %v187_v25 }
  0x55   :  { %1363 = vmatprep.subr.bf16.mxu1 %v1553_v30 }
  0x56   :  { %v197_v28 = vrot.slane %v184_v27, %v196_v26 }
  0x57   :  { %947 = vmatpush1.bf16.msra.mxu0 %v1550_v31 }
  0x58   :  { %1364 = vmatpush3.bf16.msra.mxu1 %v1554_v32  ;;  %948 = vmatprep.subr.bf16.mxu0 %v1558_v33 }
  0x59   :  { %1365 = vmatprep.subr.bf16.mxu1 %v1560_v34 }
  0x5b   :  { %949 = vmatpush1.bf16.msra.mxu0 %v1556_v35 }
  0x5c   :  { %1366 = vmatpush3.bf16.msra.mxu1 %v1561_v37  ;;  %950 = vmatprep.subr.bf16.mxu0 %v1564_v38 }
  0x5d   :  { %1367 = vmatprep.subr.bf16.mxu1 %v1565_v39 }
  0x5f   :  { %951 = vmatpush1.bf16.msra.mxu0 %v1562_v40 }
  0x60   :  { %1368 = vmatpush3.bf16.msra.mxu1 %v1566_v41  ;;  %952 = vmatprep.subr.bf16.mxu0 %v1572_v42 }
  0x61   :  { %1391 = vmatprep.subr.bf16.mxu1 %v1573_v43 }
  0x63   :  { %1119 = vmatmul.mubr.bf16.vlgmr.msra.gmra.mrb[16].mxu1 %v1948_v44  ;;  %953 = vmatpush1.bf16.msra.mxu0 %v1570_v45 }
  0x64   :  { %1392 = vmatpush3.bf16.msra.mxu1 %v1573_v43  ;;  %954 = vmatprep.subr.bf16.mxu0 %v1576_v47  ;;  %v188_v47 = vsub.s32 0, %v187_v25 }
  0x65   :  { %1393 = vmatprep.subr.bf16.mxu1 %v1577_v48  ;;  %1126 = vmatprep.mubr.bf16.mxu1 %v1203_v49 }
  0x67   :  { %955 = vmatpush1.bf16.msra.mxu0 %v1574_v50 }
  0x68   :  { %1394 = vmatpush3.bf16.msra.mxu1 %v1577_v48  ;;  %956 = vmatprep.subr.bf16.mxu0 %v1581_v51  ;;  %v192_v48 = vsub.s32 1, %v187_v25 }
  0x69   :  { %1395 = vmatprep.subr.bf16.mxu1 %v1583_v53 }
  0x6a   :  { %v193_v50 = vrot.slane %v184_v27, %v192_v48 }
  0x6b   :  { %1127 = vmatmul.mubr.bf16.gmra.mrb[20].mxu1 %v1202_v54  ;;  %957 = vmatpush1.bf16.msra.mxu0 %v1579_v55 }
  0x6c   :  { %1396 = vmatpush3.bf16.msra.mxu1 %v1583_v53  ;;  %958 = vmatprep.subr.bf16.mxu0 %v1586_v56 }
  0x6d   :  { %1397 = vmatprep.subr.bf16.mxu1 %v1587_v57  ;;  %1407 = vmatprep.mubr.bf16.mxu1 %v1734_v36  ;;  %v1592_v36 = vld [vmem:[%s2065_s1 + $0x2b8] ss:$12 sps:$4 sm:$0xff]  }
  0x6f   :  { %959 = vmatpush1.bf16.msra.mxu0 %v1584_v58 }
  0x70   :  { %1398 = vmatpush3.bf16.msra.mxu1 %v1587_v57  ;;  %960 = vmatprep.subr.bf16.mxu0 %v1590_v59 }
  0x71   :  { %1399 = vmatprep.subr.bf16.mxu1 %v1591_v60 }
  0x73   :  { %961 = vmatpush1.bf16.msra.mxu0 %v1588_v61 }
  0x74   :  { %1400 = vmatpush3.bf16.msra.mxu1 %v1591_v60  ;;  %962 = vmatprep.subr.bf16.mxu0 %v1594_v62 }
  0x75   :  { %1401 = vmatprep.subr.bf16.mxu1 %v1595_v63 }
  0x77   :  { %963 = vmatpush1.bf16.msra.mxu0 %v1592_v36 }
  0x78   :  { %1402 = vmatpush3.bf16.msra.mxu1 %v1595_v63  ;;  %964 = vmatprep.subr.bf16.mxu0 %v1598_v0 }
  0x79   :  { %1403 = vmatprep.subr.bf16.mxu1 %v1599_v1 }
  0x7b   :  { %965 = vmatpush1.bf16.msra.mxu0 %v1596_v2 }
  0x7c   :  { %1404 = vmatpush3.bf16.msra.mxu1 %v1599_v1  ;;  %966 = vmatprep.subr.bf16.mxu0 %v1602_v3 }
  0x7d   :  { %1405 = vmatprep.subr.bf16.mxu1 %v1603_v4 }
  0x7f   :  { %967 = vmatpush1.bf16.msra.mxu0 %v1600_v5 }
  0x80   :  { %1406 = vmatpush3.bf16.msra.mxu1 %v1603_v4 }
  0x82   :  { %969 = vmatmul.mubr.bf16.vlgmr.msra.gmra.mrb[0].mxu0 %v1948_v44 }
  0x83   :  { %1408 = vmatmul.mubr.bf16.vlgmr.msra.gmra.mrb[24].mxu1 %v1786_v52  ;;  %978 = vmatprep.mubr.bf16.mxu0 %v1203_v49  ;;  %v189_v49 = vrot.slane %v184_v27, %v188_v47 }
  0x8a   :  { %979 = vmatmul.mubr.bf16.gmra.mrb[4].mxu0 %v1202_v54 }
  0xf6   :  { %v1021_v6 = vpop.f32.mrb[0].mxu1 }
  0xf7   :  { %v1023_v7 = vpop.f32.mrb[1].mxu1 }
  0xf8   :  { %v2023_v8 = vpop.f32.mrb[2].mxu1 }
  0xf9   :  { %v2025_v9 = vpop.f32.mrb[3].mxu1 }
  0xfe   :  { %v2027_v10 = vpop.f32.mrb[4].mxu1 }
  0xff   :  { %v2029_v11 = vpop.f32.mrb[5].mxu1 }
 0x100   :  { %v1035_v12 = vpop.f32.mrb[6].mxu1 }
 0x101   :  { %v1036_v13 = vpop.f32.mrb[7].mxu1 }
 0x116   :  { %v1341_v14 = vpop.f32.mrb[8].mxu1 }
 0x117   :  { %v1342_v15 = vpop.f32.mrb[9].mxu1 }
 0x118   :  { %v1343_v16 = vadd.f32 %v1342_v15, %v1341_v14  ;;  %v1344_v17 = vpop.f32.mrb[10].mxu1 }
 0x119   :  { %v1345_v18 = vpop.f32.mrb[11].mxu1 }
 0x11a   :  { %v1346_v52 = vadd.f32 %v1345_v18, %v1344_v17  ;;  %v1073_v31 = vadd.f32 %v1343_v16, %v197_v28 }
 0x11c   :  { %v1076_v35 = vadd.f32 %v1346_v52, %v197_v28 }
 0x11e   :  { %v1347_v19 = vpop.f32.mrb[12].mxu1 }
 0x11f   :  { %v1348_v20 = vpop.f32.mrb[13].mxu1 }
 0x120   :  { %v1349_v21 = vadd.f32 %v1348_v20, %v1347_v19  ;;  %v1350_v22 = vpop.f32.mrb[14].mxu1 }
 0x121   :  { %v1351_v23 = vpop.f32.mrb[15].mxu1 }
 0x122   :  { %v1081_v42 = vadd.f32 %v1349_v21, %v197_v28 }
 0x136   :  { %v1369_v29 = vpop.f32.mrb[16].mxu1 }
 0x137   :  { %v1370_v30 = vpop.f32.mrb[17].mxu1 }
 0x138   :  { %v1371_v32 = vadd.f32 %v1370_v30, %v1369_v29  ;;  %v1372_v33 = vpop.f32.mrb[18].mxu1 }
 0x139   :  { %v1373_v34 = vpop.f32.mrb[19].mxu1 }
 0x13a   :  { %v1374_v37 = vadd.f32 %v1373_v34, %v1372_v33  ;;  %v1121_v38 = vadd.f32 %v1371_v32, %v1073_v31 }
 0x13c   :  { %v1124_v39 = vadd.f32 %v1374_v37, %v1076_v35 }
 0x13e   :  { %v1375_v40 = vpop.f32.mrb[20].mxu1 }
 0x13f   :  { %v1376_v41 = vpop.f32.mrb[21].mxu1 }
 0x140   :  { %v1377_v43 = vadd.f32 %v1376_v41, %v1375_v40  ;;  %v1378_v44 = vpop.f32.mrb[22].mxu1 }
 0x141   :  { %v1379_v45 = vpop.f32.mrb[23].mxu1 }
 0x142   :  { %v1129_v46 = vadd.f32 %v1377_v43, %v1081_v42 }
 0x155   :  { %v970_v51 = vpop.f32.mrb[0].mxu0 }
 0x156   :  { %v1409_v53 = vpop.f32.mrb[24].mxu1  ;;  %v1411_v54 = vadd.f32 %v970_v51, %v189_v49  ;;  %v972_v56 = vpop.f32.mrb[1].mxu0 }
 0x157   :  { %v1177_v55 = vadd.f32 %v1409_v53, %v1129_v46  ;;  %v1168_v57 = vpop.f32.mrb[25].mxu1  ;;  %v1413_v58 = vadd.f32 %v972_v56, %v193_v50  ;;  %v974_v60 = vpop.f32.mrb[2].mxu0 }
 0x158   :  { %v1169_v59 = vadd.f32 %v1168_v57, %v1121_v38  ;;  %v1410_v61 = vpop.f32.mrb[26].mxu1  ;;  %v1412_v62 = vadd.f32 %v1411_v54, %v1021_v6  ;;  %v1415_v63 = vadd.f32 %v974_v60, %v189_v49  ;;  %v976_v36 = vpop.f32.mrb[3].mxu0 }
 0x159   :  { %1190 = vst [vmem:[%s2068_s3 + $0x40] sm:$0xff] %v1177_v55  ;;  %v1171_v0 = vpop.f32.mrb[27].mxu1  ;;  %v1414_v1 = vadd.f32 %v1413_v58, %v1023_v7  ;;  %v1417_v2 = vadd.f32 %v976_v36, %v193_v50 }
 0x15a   :  { %1184 = vst [vmem:[%s2068_s3 + $0x10] sm:$0xff] %v1169_v59  ;;  %v1172_v3 = vadd.f32 %v1171_v0, %v1124_v39  ;;  %1182 = vst [vmem:[%s2068_s3] sm:$0xff] %v1412_v62  ;;  %v1416_v4 = vadd.f32 %v1415_v63, %v2023_v8 }
 0x15b   :  { %1183 = vst [vmem:[%s2068_s3 + $0x8] sm:$0xff] %v1414_v1  ;;  %v1418_v5 = vadd.f32 %v1417_v2, %v2025_v9 }
 0x15c   :  { %1187 = vst [vmem:[%s2068_s3 + $0x28] sm:$0xff] %v1172_v3  ;;  %1185 = vst [vmem:[%s2068_s3 + $0x18] sm:$0xff] %v1416_v4 }
 0x15d   :  { %1186 = vst [vmem:[%s2068_s3 + $0x20] sm:$0xff] %v1418_v5  ;;  %v980_v6 = vpop.f32.mrb[4].mxu0 }
 0x15e   :  { %v1419_v7 = vadd.f32 %v980_v6, %v189_v49  ;;  %v982_v8 = vpop.f32.mrb[5].mxu0 }
 0x15f   :  { %v1421_v12 = vadd.f32 %v982_v8, %v193_v50  ;;  %v984_v13 = vpop.f32.mrb[6].mxu0 }
 0x160   :  { %v1420_v14 = vadd.f32 %v1419_v7, %v2027_v10  ;;  %v985_v9 = vpop.f32.mrb[7].mxu0 }
 0x161   :  { %v1422_v15 = vadd.f32 %v1421_v12, %v2029_v11 }
 0x162   :  { %1188 = vst [vmem:[%s2068_s3 + $0x30] sm:$0xff] %v1420_v14 }
 0x163   :  { %1189 = vst [vmem:[%s2068_s3 + $0x38] sm:$0xff] %v1422_v15 }

// kernel: tsfn_forward.8
= control target key start
LH: loop header
LB: loop body
LE: loop exit
PB: predicated region body
PF: predicated region fallthrough
CT: control target
= control target key end

     0   :  { %s1589_s27 = smov 0   ;;  %s1902_s0 = inlined_call_operand.vmem [shape: f32[4,8,384], index: 0, kind: input, shape index: {}]   ;;  %s1903_s1 = inlined_call_operand.vmem [shape: bf16[128,384], index: 1, kind: input, shape index: {}]   ;;  %s1904_s2 = inlined_call_operand.vmem [shape: f32[1,384], index: 2, kind: input, shape index: {}]   ;;  %s1905_s3 = inlined_call_operand.vmem [shape: bf16[128,384], index: 3, kind: input, shape index: {}]   ;;  %s1906_s4 = inlined_call_operand.vmem [shape: bf16[128,384], index: 4, kind: input, shape index: {}]   ;;  %s1907_s5 = inlined_call_operand.vmem [shape: f32[1,384], index: 5, kind: input, shape index: {}]   ;;  %s1908_s6 = inlined_call_operand.vmem [shape: f32[1,384], index: 6, kind: input, shape index: {}]   ;;  %s1909_s7 = inlined_call_operand.vmem [shape: f32[1,128], index: 7, kind: input, shape index: {}]   ;;  %s1910_s8 = inlined_call_operand.vmem [shape: f32[8,128], index: 8, kind: output, shape index: {}]  }
   0x1 LB: > { %s1595_s28 = sadd.s32 4294967295, %s1536_s27   ;;  %p1212_p0 = scmp.ge.s32.totalorder %s1536_s27, 1  ;;  %s1536_s27 = sphi %s1589_s27, %s18_s27  }
   0x2   : > { %p257_p1 = scmp.lt.s32.totalorder %s1536_s27, 5 }
   0x4   : > { %p258_p2 = pnand %p1212_p0, %p257_p1 }
   0x5   : > { %p286_p3 = scmp.lt.s32.totalorder (!%p258_p2), %s1595_s28, 3  ;;  %p1214_p4 = scmp.ne.s32.totalorder (!%p258_p2), %s1595_s28, 0 }
   0x6   : > { %261 = sbr.rel (%p258_p2) target bundleno = 924 (0x39c), region = 52 }
   0xd   : > { %s287_s29 = scalar_select %p286_p3, %s1595_s28, 3 }
   0xe   : > { %295 = sbr.rel (%p1214_p4) target bundleno = 21 (0x15), region = 56  ;;  %vm298_vm0 = vcmask (!%p1214_p4), 7168   ;;  %v1538_v0 = vmov (!%p1214_p4), 0.0   ;;  %v1539_v1 = vmov (!%p1214_p4), -inf  }
   0xf   : > { %s1390_s30 = smul.u32 24, %s287_s29  ;;  %296 = vst [vmem:[#allocation2] sm:$0xff] (!%p1214_p4), %v1538_v0  ;;  %297 = vst [vmem:[#allocation3] sm:$0xff] (!%p1214_p4), %v1538_v0 }
  0x10   : > { %301 = vst [vmem:[#allocation6] sm:$0xff] (!%p1214_p4), %v1538_v0  ;;  %299 = vst.msk [vmem:[#allocation4] sm:$0xff] (!%p1214_p4), %vm298_vm0, %v1539_v1 }
  0x11   : > { %s1604_s11 = scalar_lea.vmem %s1902_s0, %s1390_s30  ;;  %300 = vst.msk [vmem:[#allocation5] sm:$0xff] (!%p1214_p4), %vm298_vm0, %v1538_v0 }
  0x15 PF: > { %v1407_v2 = vld [vmem:[%s1903_s1 + $0x4] ss:$12 sps:$4 sm:$0xff]   ;;  %v1409_v3 = vld [vmem:[%s1903_s1] ss:$12 sps:$4 sm:$0xff]   ;;  %v1540_v4 = vmov 0.0   ;;  %v1541_v5 = vmov 0   ;;  %v338_v55 = vlaneseq }
  0x16   : > { %1322 = vmatprep.subr.bf16.mxu1 %v1540_v4  ;;  %513 = vmatprep.mubr.bf16.mxu0 %v1541_v5  ;;  %v1410_v6 = vld [vmem:[%s1903_s1 + $0x1c] ss:$12 sps:$4 sm:$0xff]   ;;  %vm1542_vm1 = vmmov 0   ;;  %v1412_v7 = vld [vmem:[%s1903_s1 + $0x18] ss:$12 sps:$4 sm:$0xff]   ;;  %vm1149_vm2 = vcmask 7168  }
  0x17   : > { %481 = vmatprep.subr.bf16.mxu0 %v1407_v2  ;;  %1338 = vmatprep.mubr.msk.bf16.mxu1 %vm1542_vm1, %v1540_v4  ;;  %v1413_v8 = vld [vmem:[%s1903_s1 + $0x34] ss:$12 sps:$4 sm:$0xff]   ;;  %v1415_v9 = vld [vmem:[%s1903_s1 + $0x30] ss:$12 sps:$4 sm:$0xff]   ;;  %v1416_v10 = vld [vmem:[%s1903_s1 + $0x4c] ss:$12 sps:$4 sm:$0xff]  }
  0x18   : > { %482 = vmatpush1.bf16.msra.mxu0 %v1409_v3  ;;  %1406 = vset.pattern.permute.xlu1 %v1541_v5  ;;  %v1428_v11 = vld [vmem:[%s1903_s1 + $0x8] ss:$12 sps:$4 sm:$0xff]   ;;  %v1419_v13 = vld [vmem:[%s1903_s1 + $0x64] ss:$12 sps:$4 sm:$0xff]   ;;  %v1432_v14 = vld [vmem:[%s1903_s1 + $0x20] ss:$12 sps:$4 sm:$0xff]  }
  0x19   : > { %483 = vmatprep.subr.bf16.mxu0 %v1410_v6  ;;  %1405 = vset.pattern.permute.xlu0 %v1541_v5  ;;  %v1418_v12 = vld [vmem:[%s1903_s1 + $0x48] ss:$12 sps:$4 sm:$0xff]   ;;  %v1421_v15 = vld [vmem:[%s1903_s1 + $0x60] ss:$12 sps:$4 sm:$0xff]   ;;  %v1433_v17 = vld [vmem:[%s1903_s1 + $0x38] ss:$12 sps:$4 sm:$0xff]  }
  0x1a   : > { %1323 = vmatpush3.bf16.msra.mxu1 %v1428_v11  ;;  %v1422_v16 = vld [vmem:[%s1903_s1 + $0x7c] ss:$12 sps:$4 sm:$0xff]   ;;  %v1424_v18 = vld [vmem:[%s1903_s1 + $0x78] ss:$12 sps:$4 sm:$0xff]   ;;  %v1425_v19 = vld [vmem:[%s1903_s1 + $0x94] ss:$12 sps:$4 sm:$0xff]  }
  0x1b   : > { %1324 = vmatprep.subr.bf16.mxu1 %v1540_v4  ;;  %v1434_v20 = vld [vmem:[%s1903_s1 + $0x50] ss:$12 sps:$4 sm:$0xff]   ;;  %v1429_v22 = vld [vmem:[%s1903_s1 + $0xac] ss:$12 sps:$4 sm:$0xff]   ;;  %v1435_v23 = vld [vmem:[%s1903_s1 + $0x68] ss:$12 sps:$4 sm:$0xff]  }
  0x1c   : > { %484 = vmatpush1.bf16.msra.mxu0 %v1412_v7  ;;  %v1427_v21 = vld [vmem:[%s1903_s1 + $0x90] ss:$12 sps:$4 sm:$0xff]   ;;  %v1431_v24 = vld [vmem:[%s1903_s1 + $0xa8] ss:$12 sps:$4 sm:$0xff]   ;;  %v1679_v25 = vld [vmem:[#allocation2] sm:$0xff]  ;;  %v339_v56 = vshrl.u32 %v338_v55, 7 }
  0x1d   : > { %485 = vmatprep.subr.bf16.mxu0 %v1413_v8  ;;  %v1436_v26 = vld [vmem:[%s1903_s1 + $0x80] ss:$12 sps:$4 sm:$0xff]   ;;  %v303_v27 = vpack.c.bf16 %v1679_v25, %v1679_v25  ;;  %v1437_v28 = vld [vmem:[%s1903_s1 + $0x98] ss:$12 sps:$4 sm:$0xff]   ;;  %v1438_v29 = vld [vmem:[%s1903_s1 + $0xb0] ss:$12 sps:$4 sm:$0xff]  }
  0x1e   : > { %1325 = vmatpush3.bf16.msra.mxu1 %v1432_v14  ;;  %v1441_v30 = vld [vmem:[%s1905_s3 + $0x4] ss:$12 sps:$4 sm:$0xff]   ;;  %v1439_v31 = vld [vmem:[%s1905_s3] ss:$12 sps:$4 sm:$0xff]   ;;  %v1442_v32 = vld [vmem:[%s1905_s3 + $0x8] ss:$12 sps:$4 sm:$0xff]  }
  0x1f   : > { %1326 = vmatprep.subr.bf16.mxu1 %v1540_v4  ;;  %v1443_v33 = vld [vmem:[%s1905_s3 + $0x18] ss:$12 sps:$4 sm:$0xff]   ;;  %v1445_v34 = vld [vmem:[%s1905_s3 + $0x1c] ss:$12 sps:$4 sm:$0xff]   ;;  %v1446_v35 = vld [vmem:[%s1905_s3 + $0x20] ss:$12 sps:$4 sm:$0xff]  }
  0x20   : > { %486 = vmatpush1.bf16.msra.mxu0 %v1415_v9  ;;  %v1449_v36 = vld [vmem:[%s1905_s3 + $0x34] ss:$12 sps:$4 sm:$0xff]   ;;  %v1447_v37 = vld [vmem:[%s1905_s3 + $0x30] ss:$12 sps:$4 sm:$0xff]   ;;  %v1450_v38 = vld [vmem:[%s1905_s3 + $0x38] ss:$12 sps:$4 sm:$0xff]  }
  0x21   : > { %487 = vmatprep.subr.bf16.mxu0 %v1416_v10  ;;  %v1453_v39 = vld [vmem:[%s1905_s3 + $0x4c] ss:$12 sps:$4 sm:$0xff]   ;;  %v1451_v40 = vld [vmem:[%s1905_s3 + $0x48] ss:$12 sps:$4 sm:$0xff]   ;;  %v1454_v41 = vld [vmem:[%s1905_s3 + $0x50] ss:$12 sps:$4 sm:$0xff]  }
  0x22   : > { %1327 = vmatpush3.bf16.msra.mxu1 %v1433_v17  ;;  %v1457_v42 = vld [vmem:[%s1905_s3 + $0x64] ss:$12 sps:$4 sm:$0xff]   ;;  %v1455_v43 = vld [vmem:[%s1905_s3 + $0x60] ss:$12 sps:$4 sm:$0xff]   ;;  %v1458_v44 = vld [vmem:[%s1905_s3 + $0x68] ss:$12 sps:$4 sm:$0xff]  }
  0x23   : > { %1328 = vmatprep.subr.bf16.mxu1 %v1540_v4  ;;  %v1461_v45 = vld [vmem:[%s1905_s3 + $0x7c] ss:$12 sps:$4 sm:$0xff]   ;;  %v1459_v46 = vld [vmem:[%s1905_s3 + $0x78] ss:$12 sps:$4 sm:$0xff]   ;;  %v1462_v47 = vld [vmem:[%s1905_s3 + $0x80] ss:$12 sps:$4 sm:$0xff]  }
  0x24   : > { %488 = vmatpush1.bf16.msra.mxu0 %v1418_v12  ;;  %v1465_v48 = vld [vmem:[%s1905_s3 + $0x94] ss:$12 sps:$4 sm:$0xff]   ;;  %v1463_v49 = vld [vmem:[%s1905_s3 + $0x90] ss:$12 sps:$4 sm:$0xff]   ;;  %v1466_v50 = vld [vmem:[%s1905_s3 + $0x98] ss:$12 sps:$4 sm:$0xff]  }
  0x25   : > { %489 = vmatprep.subr.bf16.mxu0 %v1419_v13  ;;  %v1469_v51 = vld [vmem:[%s1905_s3 + $0xac] ss:$12 sps:$4 sm:$0xff]   ;;  %v1467_v52 = vld [vmem:[%s1905_s3 + $0xa8] ss:$12 sps:$4 sm:$0xff]   ;;  %v1470_v53 = vld [vmem:[%s1905_s3 + $0xb0] ss:$12 sps:$4 sm:$0xff]  }
  0x26   : > { %1329 = vmatpush3.bf16.msra.mxu1 %v1434_v20  ;;  %v1473_v54 = vld [vmem:[%s1906_s4 + $0x4] ss:$12 sps:$4 sm:$0xff]   ;;  %v1783_v57 = vsub.s32 0, %v339_v56  ;;  %v336_v58 = vld [vmem:[%s1904_s2] sm:$0x7]  ;;  %v1788_v59 = vsub.s32 1, %v339_v56 }
  0x27   : > { %1330 = vmatprep.subr.bf16.mxu1 %v1540_v4  ;;  %v562_v63 = vld [vmem:[%s1604_s11] sm:$0xff]  ;;  %v563_v7 = vld [vmem:[%s1604_s11 + $0x8] sm:$0xff]  ;;  %p1292_p5 = scmp.ne.s32.totalorder %s1595_s28, 3 }
  0x28   : > { %490 = vmatpush1.bf16.msra.mxu0 %v1421_v15  ;;  %v341_v60 = vrot.slane %v336_v58, %v1783_v57  ;;  %v345_v61 = vrot.slane %v336_v58, %v1788_v59  ;;  %v587_v55 = vld [vmem:[#allocation3] sm:$0xff] }
  0x29   : > { %491 = vmatprep.subr.bf16.mxu0 %v1422_v16 }
  0x2a   : > { %1331 = vmatpush3.bf16.msra.mxu1 %v1435_v23 }
  0x2b   : > { %1332 = vmatprep.subr.bf16.mxu1 %v1540_v4 }
  0x2c   : > { %492 = vmatpush1.bf16.msra.mxu0 %v1424_v18  ;;  %v1794_v18 = vsub.s32 2, %v339_v56  ;;  %v1502_v56 = vld [vmem:[%s1906_s4 + $0xb0] ss:$12 sps:$4 sm:$0xff]  }
  0x2d   : > { %493 = vmatprep.subr.bf16.mxu0 %v1425_v19 }
  0x2e   : > { %1333 = vmatpush3.bf16.msra.mxu1 %v1436_v26  ;;  %v349_v19 = vrot.slane %v336_v58, %v1794_v18  ;;  %v847_v58 = vpack.c.bf16 %v587_v55, %v587_v55 }
  0x2f   : > { %1334 = vmatprep.subr.bf16.mxu1 %v1540_v4 }
  0x30   : > { %494 = vmatpush1.bf16.msra.mxu0 %v1427_v21 }
  0x31   : > { %495 = vmatprep.subr.bf16.mxu0 %v1429_v22 }
  0x32   : > { %1335 = vmatpush3.bf16.msra.mxu1 %v1437_v28 }
  0x33   : > { %1336 = vmatprep.subr.bf16.mxu1 %v1540_v4 }
  0x34   : > { %496 = vmatpush1.bf16.msra.mxu0 %v1431_v24  ;;  %v564_v24 = vld [vmem:[%s1604_s11 + $0x10] sm:$0xff] }
  0x35   : > { %766 = vmatprep.subr.bf16.mxu0 %v1441_v30 }
  0x36   : > { %1337 = vmatpush3.bf16.msra.mxu1 %v1438_v29 }
  0x37   : > { %514 = vmatmul.mubr.bf16.vlgmr.msra.gmra.mrb[0].mxu0 %v303_v27  ;;  %1342 = vmatprep.subr.bf16.mxu1 %v1540_v4 }
  0x38   : > { %798 = vmatprep.mubr.bf16.mxu0 %v1541_v5  ;;  %767 = vmatpush1.bf16.msra.mxu0 %v1439_v31 }
  0x39   : > { %1339 = vmatmul.mubr.bf16.vlgmr.msra.gmra.mrb[0].mxu1 %v303_v27  ;;  %768 = vmatprep.subr.bf16.mxu0 %v1445_v34  ;;  %v1471_v34 = vld [vmem:[%s1906_s4] ss:$12 sps:$4 sm:$0xff]  }
  0x3a   : > { %1358 = vmatprep.mubr.msk.bf16.mxu1 %vm1542_vm1, %v1540_v4  ;;  %1343 = vmatpush3.bf16.msra.mxu1 %v1442_v32 }
  0x3b   : > { %1344 = vmatprep.subr.bf16.mxu1 %v1540_v4 }
  0x3c   : > { %769 = vmatpush1.bf16.msra.mxu0 %v1443_v33 }
  0x3d   : > { %770 = vmatprep.subr.bf16.mxu0 %v1449_v36 }
  0x3e   : > { %1345 = vmatpush3.bf16.msra.mxu1 %v1446_v35  ;;  %v1492_v35 = vld [vmem:[%s1906_s4 + $0x8] ss:$12 sps:$4 sm:$0xff]  }
  0x3f   : > { %1346 = vmatprep.subr.bf16.mxu1 %v1540_v4 }
  0x40   : > { %771 = vmatpush1.bf16.msra.mxu0 %v1447_v37  ;;  %v1476_v37 = vld [vmem:[%s1906_s4 + $0x1c] ss:$12 sps:$4 sm:$0xff]  }
  0x41   : > { %772 = vmatprep.subr.bf16.mxu0 %v1453_v39  ;;  %v1479_v39 = vld [vmem:[%s1906_s4 + $0x34] ss:$12 sps:$4 sm:$0xff]  }
  0x42   : > { %1347 = vmatpush3.bf16.msra.mxu1 %v1450_v38  ;;  %v1496_v38 = vld [vmem:[%s1906_s4 + $0x20] ss:$12 sps:$4 sm:$0xff]  }
  0x43   : > { %1348 = vmatprep.subr.bf16.mxu1 %v1540_v4 }
  0x44   : > { %773 = vmatpush1.bf16.msra.mxu0 %v1451_v40  ;;  %v1477_v40 = vld [vmem:[%s1906_s4 + $0x30] ss:$12 sps:$4 sm:$0xff]  }
  0x45   : > { %774 = vmatprep.subr.bf16.mxu0 %v1457_v42  ;;  %v1482_v42 = vld [vmem:[%s1906_s4 + $0x4c] ss:$12 sps:$4 sm:$0xff]  }
  0x46   : > { %1349 = vmatpush3.bf16.msra.mxu1 %v1454_v41  ;;  %v1497_v41 = vld [vmem:[%s1906_s4 + $0x38] ss:$12 sps:$4 sm:$0xff]  }
  0x47   : > { %1350 = vmatprep.subr.bf16.mxu1 %v1540_v4 }
  0x48   : > { %775 = vmatpush1.bf16.msra.mxu0 %v1455_v43  ;;  %v1498_v43 = vld [vmem:[%s1906_s4 + $0x50] ss:$12 sps:$4 sm:$0xff]  }
  0x49   : > { %776 = vmatprep.subr.bf16.mxu0 %v1461_v45  ;;  %v1483_v45 = vld [vmem:[%s1906_s4 + $0x60] ss:$12 sps:$4 sm:$0xff]  }
  0x4a   : > { %1351 = vmatpush3.bf16.msra.mxu1 %v1458_v44  ;;  %v1485_v44 = vld [vmem:[%s1906_s4 + $0x64] ss:$12 sps:$4 sm:$0xff]  }
  0x4b   : > { %1352 = vmatprep.subr.bf16.mxu1 %v1540_v4 }
  0x4c   : > { %777 = vmatpush1.bf16.msra.mxu0 %v1459_v46  ;;  %v1499_v46 = vld [vmem:[%s1906_s4 + $0x68] ss:$12 sps:$4 sm:$0xff]  }
  0x4d   : > { %778 = vmatprep.subr.bf16.mxu0 %v1465_v48  ;;  %v1486_v48 = vld [vmem:[%s1906_s4 + $0x78] ss:$12 sps:$4 sm:$0xff]  }
  0x4e   : > { %1353 = vmatpush3.bf16.msra.mxu1 %v1462_v47  ;;  %v1488_v47 = vld [vmem:[%s1906_s4 + $0x7c] ss:$12 sps:$4 sm:$0xff]  }
  0x4f   : > { %1354 = vmatprep.subr.bf16.mxu1 %v1540_v4 }
  0x50   : > { %779 = vmatpush1.bf16.msra.mxu0 %v1463_v49  ;;  %v1500_v49 = vld [vmem:[%s1906_s4 + $0x80] ss:$12 sps:$4 sm:$0xff]  }
  0x51   : > { %780 = vmatprep.subr.bf16.mxu0 %v1469_v51  ;;  %v1489_v51 = vld [vmem:[%s1906_s4 + $0x90] ss:$12 sps:$4 sm:$0xff]  }
  0x52   : > { %1355 = vmatpush3.bf16.msra.mxu1 %v1466_v50  ;;  %v1491_v50 = vld [vmem:[%s1906_s4 + $0x94] ss:$12 sps:$4 sm:$0xff]  }
  0x53   : > { %1356 = vmatprep.subr.bf16.mxu1 %v1540_v4 }
  0x54   : > { %781 = vmatpush1.bf16.msra.mxu0 %v1467_v52  ;;  %v1501_v52 = vld [vmem:[%s1906_s4 + $0x98] ss:$12 sps:$4 sm:$0xff]  }
  0x55   : > { %1025 = vmatprep.subr.bf16.mxu0 %v1473_v54  ;;  %v1493_v54 = vld [vmem:[%s1906_s4 + $0xa8] ss:$12 sps:$4 sm:$0xff]  }
  0x56   : > { %1357 = vmatpush3.bf16.msra.mxu1 %v1470_v53  ;;  %v1495_v53 = vld [vmem:[%s1906_s4 + $0xac] ss:$12 sps:$4 sm:$0xff]  }
  0x57   : > { %1362 = vmatprep.subr.bf16.mxu1 %v1540_v4 }
 0x10a   : > { %v515_v62 = vpop.f32.mrb[0].mxu0 }
 0x10b   : > { %v516_v0 = vadd.f32 %v515_v62, %v341_v60  ;;  %v517_v1 = vpop.f32.mrb[1].mxu0 }
 0x10c   : > { %v518_v2 = vadd.f32 %v517_v1, %v345_v61  ;;  %v519_v3 = vpop.f32.mrb[2].mxu0  ;;  %v556_v11 = vpop.f32.mrb[0].mxu1  ;;  %v621_v1 = vld [vmem:[%s1907_s5] sm:$0x7] }
 0x10d   : > { %v565_v6 = vadd.f32 %v562_v63, %v516_v0  ;;  %v520_v8 = vpop.f32.mrb[3].mxu0  ;;  %v1340_v13 = vpop.f32.mrb[1].mxu1  ;;  %v557_v22 = vadd.f32 %v556_v11, %v349_v19  ;;  %v880_v0 = vld [vmem:[%s1908_s6] sm:$0x7]  ;;  %v630_v3 = vrot.slane %v621_v1, %v1788_v59 }
 0x10e   : > { %v572_v10 = vadd.f32 %v563_v7, %v518_v2  ;;  %v559_v14 = vpop.f32.mrb[2].mxu1  ;;  %v626_v2 = vrot.slane %v621_v1, %v1783_v57 }
 0x10f   : > { %v1239_v9 = vmul.f32 -1.442695, %v565_v6  ;;  %v1341_v15 = vpop.f32.mrb[3].mxu1  ;;  %v889_v6 = vrot.slane %v880_v0, %v1788_v59  ;;  %v893_v59 = vrot.slane %v880_v0, %v1794_v18 }
 0x110   : > { %v1240_v12 = vmul.f32 -1.442695, %v572_v10 }
 0x111   : > { %1503 = vpow2.f32 %v1239_v9  ;;  %v1384_v9 = vadd.f32 %v889_v6, %v630_v3 }
 0x112   : > { %1505 = vpow2.f32 %v1240_v12 }
 0x11b   : > { %v1504_v16 = vpop.eup %1503 }
 0x11c   : > { %v569_v17 = vadd.f32 1.0, %v1504_v16  ;;  %v1506_v20 = vpop.eup %1505 }
 0x11d   : > { %v576_v21 = vadd.f32 1.0, %v1506_v20 }
 0x11e   : > { %1507 = vrcp.f32 %v569_v17 }
 0x11f   : > { %1509 = vrcp.f32 %v576_v21 }
 0x128   : > { %v1508_v23 = vpop.eup %1507 }
 0x129   : > { %v579_v26 = vmul.f32 %v1508_v23, %v557_v22  ;;  %v1510_v28 = vpop.eup %1509 }
 0x12a   : > { %v582_v29 = vsub.f32 1.0, %v1510_v28  ;;  %v584_v32 = vmul.f32 %v1510_v28, %v1679_v25  ;;  %v1474_v25 = vld [vmem:[%s1906_s4 + $0x18] ss:$12 sps:$4 sm:$0xff]  }
 0x12b   : > { %v580_v27 = vadd.f32 %v579_v26, %v564_v24  ;;  %v634_v24 = vrot.slane %v621_v1, %v1794_v18  ;;  %v1138_v18 = vld [vmem:[#allocation4] sm:$0xff] }
 0x12d   : > { %1511 = vtanh.f32 %v580_v27 }
 0x137   : > { %v1512_v30 = vpop.eup %1511 }
 0x138   : > { %v583_v31 = vmul.f32 %v1512_v30, %v582_v29 }
 0x13a   : > { %v585_v33 = vadd.f32 %v584_v32, %v583_v31 }
 0x13c   : > { %586 = vst [vmem:[#allocation2] sm:$0xff] %v585_v33  ;;  %v588_v36 = vpack.c.bf16 %v585_v33, %v585_v33 }
 0x13e   : > { %799 = vmatmul.mubr.bf16.vlgmr.msra.gmra.mrb[4].mxu0 %v588_v36  ;;  %1359 = vmatmul.mubr.bf16.vlgmr.msra.gmra.mrb[4].mxu1 %v588_v36 }
 0x13f   : > { %1026 = vmatpush1.bf16.msra.mxu0 %v1471_v34  ;;  %1363 = vmatpush3.bf16.msra.mxu1 %v1492_v35 }
 0x140   : > { %1027 = vmatprep.subr.bf16.mxu0 %v1476_v37  ;;  %1364 = vmatprep.subr.bf16.mxu1 %v1540_v4  ;;  %v1291_v37 = vld [vmem:[%s1909_s7] ss:$0 sm:$0xff] }
 0x141   : > { %1057 = vmatprep.mubr.bf16.mxu0 %v1541_v5  ;;  %1378 = vmatprep.mubr.msk.bf16.mxu1 %vm1542_vm1, %v1540_v4  ;;  %v1480_v5 = vld [vmem:[%s1906_s4 + $0x48] ss:$12 sps:$4 sm:$0xff]  }
 0x143   : > { %1028 = vmatpush1.bf16.msra.mxu0 %v1474_v25  ;;  %1365 = vmatpush3.bf16.msra.mxu1 %v1496_v38 }
 0x144   : > { %1029 = vmatprep.subr.bf16.mxu0 %v1479_v39  ;;  %1366 = vmatprep.subr.bf16.mxu1 %v1540_v4 }
 0x147   : > { %1030 = vmatpush1.bf16.msra.mxu0 %v1477_v40  ;;  %1367 = vmatpush3.bf16.msra.mxu1 %v1497_v41 }
 0x148   : > { %1031 = vmatprep.subr.bf16.mxu0 %v1482_v42  ;;  %1368 = vmatprep.subr.bf16.mxu1 %v1540_v4 }
 0x14b   : > { %1032 = vmatpush1.bf16.msra.mxu0 %v1480_v5  ;;  %1369 = vmatpush3.bf16.msra.mxu1 %v1498_v43 }
 0x14c   : > { %1033 = vmatprep.subr.bf16.mxu0 %v1485_v44  ;;  %1370 = vmatprep.subr.bf16.mxu1 %v1540_v4  ;;  %v1146_v44 = vld [vmem:[#allocation5] sm:$0xff] }
 0x14f   : > { %1034 = vmatpush1.bf16.msra.mxu0 %v1483_v45  ;;  %1371 = vmatpush3.bf16.msra.mxu1 %v1499_v46 }
 0x150   : > { %1035 = vmatprep.subr.bf16.mxu0 %v1488_v47  ;;  %1372 = vmatprep.subr.bf16.mxu1 %v1540_v4 }
 0x153   : > { %1036 = vmatpush1.bf16.msra.mxu0 %v1486_v48  ;;  %1373 = vmatpush3.bf16.msra.mxu1 %v1500_v49  ;;  %v1151_v49 = vld [vmem:[#allocation6] sm:$0xff] }
 0x154   : > { %1037 = vmatprep.subr.bf16.mxu0 %v1491_v50  ;;  %1374 = vmatprep.subr.bf16.mxu1 %v1540_v4 }
 0x157   : > { %1038 = vmatpush1.bf16.msra.mxu0 %v1489_v51  ;;  %1375 = vmatpush3.bf16.msra.mxu1 %v1501_v52 }
 0x158   : > { %1039 = vmatprep.subr.bf16.mxu0 %v1495_v53  ;;  %1376 = vmatprep.subr.bf16.mxu1 %v1540_v4  ;;  %v885_v4 = vrot.slane %v880_v0, %v1783_v57 }
 0x15a   : > { %v1382_v7 = vadd.f32 %v885_v4, %v626_v2 }
 0x15b   : > { %1040 = vmatpush1.bf16.msra.mxu0 %v1493_v54  ;;  %1377 = vmatpush3.bf16.msra.mxu1 %v1502_v56  ;;  %v1543_v56 = vmov (!%p1292_p5), 0  }
 0x15e   : > { %1058 = vmatmul.mubr.bf16.vlgmr.msra.gmra.mrb[4].mxu0 %v847_v58  ;;  %1379 = vmatmul.mubr.bf16.vlgmr.msra.gmra.mrb[8].mxu1 %v847_v58 }
 0x211   : > { %v841_v60 = vpop.f32.mrb[4].mxu1 }
 0x212   : > { %v1360_v61 = vpop.f32.mrb[5].mxu1  ;;  %v842_v29 = vadd.f32 %v841_v60, %v634_v24 }
 0x213   : > { %v844_v62 = vpop.f32.mrb[6].mxu1 }
 0x214   : > { %v1361_v63 = vpop.f32.mrb[7].mxu1 }
 0x231   : > { %v1059_v8 = vpop.f32.mrb[4].mxu0  ;;  %v1100_v10 = vpop.f32.mrb[8].mxu1 }
 0x232   : > { %v1383_v11 = vadd.f32 %v1382_v7, %v1059_v8  ;;  %v1061_v12 = vpop.f32.mrb[5].mxu0  ;;  %v1380_v13 = vpop.f32.mrb[9].mxu1  ;;  %v1101_v27 = vadd.f32 %v1100_v10, %v893_v59 }
 0x233   : > { %v1063_v14 = vpop.f32.mrb[6].mxu0  ;;  %v1103_v15 = vpop.f32.mrb[10].mxu1  ;;  %v1385_v20 = vadd.f32 %v1384_v9, %v1061_v12 }
 0x234   : > { %v1289_v16 = vmul.f32 -1.442695, %v1383_v11  ;;  %v1064_v17 = vpop.f32.mrb[7].mxu0  ;;  %v1381_v19 = vpop.f32.mrb[11].mxu1 }
 0x235   : > { %v1290_v21 = vmul.f32 -1.442695, %v1385_v20 }
 0x236   : > { %1513 = vpow2.f32 %v1289_v16 }
 0x237   : > { %1515 = vpow2.f32 %v1290_v21 }
 0x240   : > { %v1514_v57 = vpop.eup %1513 }
 0x241   : > { %v1110_v22 = vadd.f32 1.0, %v1514_v57  ;;  %v1516_v23 = vpop.eup %1515 }
 0x242   : > { %v1117_v26 = vadd.f32 1.0, %v1516_v23 }
 0x243   : > { %1517 = vrcp.f32 %v1110_v22 }
 0x244   : > { %1519 = vrcp.f32 %v1117_v26 }
 0x24d   : > { %v1518_v28 = vpop.eup %1517 }
 0x24e   : > { %v1120_v30 = vmul.f32 %v1518_v28, %v1101_v27  ;;  %v1520_v32 = vpop.eup %1519 }
 0x24f   : > { %v1123_v33 = vsub.f32 1.0, %v1520_v32  ;;  %v1125_v36 = vmul.f32 %v1520_v32, %v587_v55 }
 0x250   : > { %v1121_v31 = vadd.f32 %v1120_v30, %v842_v29 }
 0x252   : > { %1521 = vtanh.f32 %v1121_v31 }
 0x25c   : > { %v1522_v34 = vpop.eup %1521 }
 0x25d   : > { %v1124_v35 = vmul.f32 %v1522_v34, %v1123_v33 }
 0x25f   : > { %v1126_v25 = vadd.f32 %v1125_v36, %v1124_v35 }
 0x261   : > { %v1135_v38 = vmul.f32 %v1291_v37, %v1126_v25  ;;  %1127 = vst [vmem:[#allocation3] sm:$0xff] %v1126_v25 }
 0x263   : > { %1136 = vadd.xlane.f32.xlu0 %v1135_v38 }
 0x2f0   : > { %v1137_v39 = vpop.xlane.xlu0 %1136 }
 0x2f1   : > { %v1139_v40 = vmax.f32 %v1138_v18, %v1137_v39 }
 0x2f3   : > { %v1140_v41 = vsub.f32 %v1138_v18, %v1139_v40  ;;  %v1143_v42 = vsub.f32 %v1137_v39, %v1139_v40  ;;  %1166 = vst.msk [vmem:[#allocation4] sm:$0xff] %vm1149_vm2, %v1139_v40 }
 0x2f5   : > { %v1141_v5 = vmul.f32 1.442695, %v1140_v41  ;;  %v1144_v43 = vmul.f32 1.442695, %v1143_v42 }
 0x2f7   : > { %1523 = vpow2.f32 %v1141_v5 }
 0x2f8   : > { %1525 = vpow2.f32 %v1144_v43 }
 0x301   : > { %v1524_v45 = vpop.eup %1523 }
 0x302   : > { %v1526_v46 = vpop.eup %1525  ;;  %v1147_v47 = vmul.f32 %v1524_v45, %v1146_v44  ;;  %1154 = vperm.xlu0 %1405, %v1524_v45  }
 0x303   : > { %1160 = vperm.xlu1 %1406, %v1526_v46  }
 0x304   : > { %v1148_v48 = vadd.f32 %v1526_v46, %v1147_v47 }
 0x306   : > { %1150 = vst.msk [vmem:[#allocation5] sm:$0xff] %vm1149_vm2, %v1148_v48  ;;  %1527 = vset.pattern.permute.xlu0 (!%p1292_p5), %v1543_v56 }
 0x30d   : > { %v1172_v55 = vld [vmem:[#allocation5] sm:$0xff] (!%p1292_p5) }
 0x30e   : > { %1175 = vperm.xlu0 (!%p1292_p5), %1527, %v1172_v55  }
 0x381   : > { %v1155_v50 = vpop.permute.xlu0 %1154  ;;  %1170 = sbr.rel (%p1292_p5) target bundleno = 924 (0x39c), region = 60 }
 0x382   : > { %v1161_v51 = vpop.permute.xlu1 %1160  ;;  %v1157_v52 = vmul.f32 %v1155_v50, %v1151_v49 }
 0x383   : > { %v1163_v53 = vmul.f32 %v1161_v51, %v1126_v25 }
 0x385   : > { %v1164_v54 = vadd.f32 %v1163_v53, %v1157_v52 }
 0x387   : > { %1165 = vst [vmem:[#allocation6] sm:$0xff] %v1164_v54 }
 0x38d   : > { %v1176_v58 = vpop.permute.xlu0 %1175 }
 0x38e   : > { %1528 = vrcp.f32 %v1176_v58  ;;  %v1171_v60 = vld [vmem:[#allocation6] sm:$0xff] }
 0x398   : > { %v1529_v61 = vpop.eup %1528 }
 0x399   : > { %v1179_v62 = vmul.f32 %v1529_v61, %v1171_v60 }
 0x39b   : > { %1180 = vst [vmem:[%s1910_s8] sm:$0xff] %v1179_v62 }
 0x39c PF: > { %s18_s27 = sadd.s32 1, %s1536_s27  }
 0x39d   : > { %p15_p6 = scmp.ge.s32.totalorder %s18_s27, 6  }
 0x39f   :  { %17 = sbr.rel (!%p15_p6) target bundleno = 1 (0x1), region = 86 }

// kernel: tsfn_forward.9
= control target key start
LH: loop header
LB: loop body
LE: loop exit
PB: predicated region body
PF: predicated region fallthrough
CT: control target
= control target key end

     0   :  { %v1101_v0 = vmov 0   ;;  %v1102_v2 = vmov 2   ;;  %v1103_v10 = vmov 1   ;;  %v1104_v11 = vmov 3   ;;  %s1490_s0 = inlined_call_operand.vmem [shape: f32[8,128], index: 0, kind: input, shape index: {}]   ;;  %s1491_s2 = inlined_call_operand.vmem [shape: bf16[512,128], index: 2, kind: input, shape index: {}]   ;;  %s1492_s1 = inlined_call_operand.vmem [shape: f32[8,256], index: 1, kind: input, shape index: {}]   ;;  %s1493_s4 = inlined_call_operand.vmem [shape: bf16[256,128], index: 4, kind: input, shape index: {}]   ;;  %s1494_s6 = inlined_call_operand.vmem [shape: bf16[128,128], index: 6, kind: input, shape index: {}]   ;;  %s1495_s3 = inlined_call_operand.vmem [shape: f32[1,128], index: 3, kind: input, shape index: {}]   ;;  %s1496_s5 = inlined_call_operand.vmem [shape: f32[1,128], index: 5, kind: input, shape index: {}]   ;;  %s1497_s7 = inlined_call_operand.vmem [shape: f32[1,128], index: 7, kind: input, shape index: {}]   ;;  %s1498_s8 = inlined_call_operand.vmem [shape: f32[8,128], index: 8, kind: output, shape index: {}]  }
   0x1   :  { %1036 = vset.pattern.permute.xlu0 %v1101_v0  ;;  %v30_v1 = vld [vmem:[%s1490_s0] sm:$0xff]  ;;  %1038 = vset.pattern.permute.xlu1 %v1102_v2  ;;  %v1049_v8 = vld [vmem:[%s1491_s2 + $0xc8] sm:$0xff]   ;;  %v1053_v14 = vld [vmem:[%s1491_s2 + $0xd0] sm:$0xff]   ;;  %v1105_v16 = vmov 4   ;;  %v1106_v17 = vmov 5   ;;  %v1107_v23 = vmov 6   ;;  %v34_v46 = vlaneseq }
   0x2   :  { %v1045_v3 = vld [vmem:[%s1491_s2 + $0xc0] sm:$0xff]   ;;  %vm33_vm0 = vcmp.gt.f32.partialorder %v30_v1, 0.0  ;;  %v1050_v9 = vld [vmem:[%s1491_s2 + $0x48] sm:$0xff]   ;;  %v1054_v15 = vld [vmem:[%s1491_s2 + $0x50] sm:$0xff]   ;;  %v1108_v26 = vmov 7  }
   0x3   :  { %v1046_v4 = vld [vmem:[%s1491_s2 + $0x40] sm:$0xff]   ;;  %v42_v5 = vsel %vm33_vm0, 1, %v1101_v0  ;;  %953 = vmatprep.subr.bf16.mxu1 %v1045_v3  ;;  %v1051_v12 = vld [vmem:[%s1491_s2 + $0x88] sm:$0xff]   ;;  %v1055_v18 = vld [vmem:[%s1491_s2 + $0x90] sm:$0xff]   ;;  %v35_v47 = vshrl.u32 %v34_v46, 7 }
   0x4   :  { %v1047_v6 = vld [vmem:[%s1491_s2 + $0x80] sm:$0xff]   ;;  %44 = vperm.xlu0 %1036, %v42_v5   ;;  %76 = vperm.xlu1 %1038, %v42_v5   ;;  %v1052_v13 = vld [vmem:[%s1491_s2 + $0x8] sm:$0xff]   ;;  %v1056_v19 = vld [vmem:[%s1491_s2 + $0x10] sm:$0xff]  }
   0x5   :  { %931 = vmatprep.subr.bf16.mxu0 %v1046_v4  ;;  %954 = vmatpush3.bf16.msra.mxu1 %v1047_v6  ;;  %v1048_v7 = vld [vmem:[%s1491_s2] sm:$0xff]   ;;  %v1057_v20 = vld [vmem:[%s1491_s2 + $0xd8] sm:$0xff]   ;;  %v1065_v30 = vld [vmem:[%s1491_s2 + $0xe8] sm:$0xff]   ;;  %v1269_v48 = vsub.s32 0, %v35_v47  ;;  %v1271_v49 = vsub.s32 1, %v35_v47  ;;  %v1281_v54 = vsub.s32 2, %v35_v47 }
   0x6   :  { %932 = vmatpush3.bf16.msra.mxu0 %v1048_v7  ;;  %955 = vmatprep.subr.bf16.mxu1 %v1049_v8  ;;  %v1058_v21 = vld [vmem:[%s1491_s2 + $0x58] sm:$0xff]   ;;  %v1061_v25 = vld [vmem:[%s1491_s2 + $0xe0] sm:$0xff]   ;;  %v1066_v31 = vld [vmem:[%s1491_s2 + $0x68] sm:$0xff]   ;;  %v1292_v59 = vsub.s32 3, %v35_v47  ;;  %v1303_v2 = vsub.s32 4, %v35_v47 }
   0x7   :  { %933 = vmatprep.subr.bf16.mxu0 %v1050_v9  ;;  %v1059_v22 = vld [vmem:[%s1491_s2 + $0x98] sm:$0xff]   ;;  %v1062_v27 = vld [vmem:[%s1491_s2 + $0x60] sm:$0xff]   ;;  %v1067_v32 = vld [vmem:[%s1491_s2 + $0xa8] sm:$0xff]   ;;  %v1313_v9 = vsub.s32 5, %v35_v47 }
   0x8   :  { %1037 = vset.pattern.permute.xlu0 %v1103_v10  ;;  %1039 = vset.pattern.permute.xlu1 %v1104_v11  ;;  %v1060_v24 = vld [vmem:[%s1491_s2 + $0x18] sm:$0xff]   ;;  %v1063_v28 = vld [vmem:[%s1491_s2 + $0xa0] sm:$0xff]   ;;  %v1231_v33 = vld [vmem:[%s1492_s1 + $0x8] sm:$0xff] }
   0x9   :  { %60 = vperm.xlu0 %1037, %v42_v5   ;;  %92 = vperm.xlu1 %1039, %v42_v5   ;;  %v1064_v29 = vld [vmem:[%s1491_s2 + $0x20] sm:$0xff]   ;;  %v1068_v34 = vld [vmem:[%s1491_s2 + $0x28] sm:$0xff]   ;;  %v1069_v35 = vld [vmem:[%s1491_s2 + $0xf0] sm:$0xff]   ;;  %v168_v38 = vpack.c.bf16 %v1231_v33, %v1231_v33  ;;  %v41_v51 = vrot.slane %v1231_v33, %v1269_v48  ;;  %v56_v56 = vrot.slane %v1231_v33, %v1271_v49 }
   0xa   :  { %956 = vmatpush3.bf16.msra.mxu1 %v1051_v12  ;;  %934 = vmatpush3.bf16.msra.mxu0 %v1052_v13  ;;  %v1070_v36 = vld [vmem:[%s1491_s2 + $0x70] sm:$0xff]   ;;  %v1073_v40 = vld [vmem:[%s1491_s2 + $0xf8] sm:$0xff]   ;;  %v1262_v43 = vld [vmem:[%s1492_s1] sm:$0xff]  ;;  %v72_v61 = vrot.slane %v1231_v33, %v1281_v54  ;;  %v88_v6 = vrot.slane %v1231_v33, %v1292_v59  ;;  %v104_v11 = vrot.slane %v1231_v33, %v1303_v2 }
   0xb   :  { %957 = vmatprep.subr.bf16.mxu1 %v1053_v14  ;;  %935 = vmatprep.subr.bf16.mxu0 %v1054_v15  ;;  %v1071_v37 = vld [vmem:[%s1491_s2 + $0xb0] sm:$0xff]   ;;  %v1074_v41 = vld [vmem:[%s1491_s2 + $0x78] sm:$0xff]   ;;  %v167_v45 = vpack.c.bf16 %v1262_v43, %v1262_v43  ;;  %v37_v50 = vrot.slane %v1262_v43, %v1269_v48  ;;  %v52_v55 = vrot.slane %v1262_v43, %v1271_v49 }
   0xc   :  { %v1072_v39 = vld [vmem:[%s1491_s2 + $0x30] sm:$0xff]   ;;  %504 = vmatprep.mubr.bf16.mxu1 %v168_v38  ;;  %v1075_v42 = vld [vmem:[%s1491_s2 + $0xb8] sm:$0xff]   ;;  %v68_v60 = vrot.slane %v1262_v43, %v1281_v54  ;;  %v100_v10 = vrot.slane %v1262_v43, %v1303_v2 }
   0xd   :  { %1040 = vset.pattern.permute.xlu1 %v1105_v16  ;;  %1041 = vset.pattern.permute.xlu0 %v1106_v17  ;;  %v1076_v44 = vld [vmem:[%s1491_s2 + $0x38] sm:$0xff]   ;;  %v1326_v17 = vsub.s32 6, %v35_v47 }
   0xe   :  { %108 = vperm.xlu1 %1040, %v42_v5   ;;  %124 = vperm.xlu0 %1041, %v42_v5  }
   0xf   :  { %958 = vmatpush3.bf16.msra.mxu1 %v1055_v18  ;;  %936 = vmatpush3.bf16.msra.mxu0 %v1056_v19  ;;  %v116_v18 = vrot.slane %v1262_v43, %v1313_v9 }
  0x10   :  { %959 = vmatprep.subr.bf16.mxu1 %v1057_v20  ;;  %937 = vmatprep.subr.bf16.mxu0 %v1058_v21  ;;  %v120_v21 = vrot.slane %v1231_v33, %v1313_v9 }
  0x12   :  { %1042 = vset.pattern.permute.xlu1 %v1107_v23  ;;  %1044 = vset.pattern.permute.xlu0 %v1108_v26 }
  0x13   :  { %140 = vperm.xlu1 %1042, %v42_v5   ;;  %960 = vmatpush3.bf16.msra.mxu1 %v1059_v22 }
  0x14   :  { %938 = vmatpush3.bf16.msra.mxu0 %v1060_v24  ;;  %961 = vmatprep.subr.bf16.mxu1 %v1061_v25  ;;  %v132_v25 = vrot.slane %v1262_v43, %v1326_v17 }
  0x15   :  { %939 = vmatprep.subr.bf16.mxu0 %v1062_v27 }
  0x17   :  { %1043 = vset.pattern.permute.xlu1 %v1108_v26  ;;  %962 = vmatpush3.bf16.msra.mxu1 %v1063_v28  ;;  %v1342_v26 = vsub.s32 7, %v35_v47 }
  0x18   :  { %156 = vperm.xlu1 %1043, %v42_v5   ;;  %940 = vmatpush3.bf16.msra.mxu0 %v1064_v29  ;;  %v84_v5 = vrot.slane %v1262_v43, %v1292_v59 }
  0x19   :  { %963 = vmatprep.subr.bf16.mxu1 %v1065_v30  ;;  %941 = vmatprep.subr.bf16.mxu0 %v1066_v31  ;;  %v136_v30 = vrot.slane %v1231_v33, %v1326_v17 }
  0x1b   :  { %964 = vmatpush3.bf16.msra.mxu1 %v1067_v32 }
  0x1c   :  { %942 = vmatpush3.bf16.msra.mxu0 %v1068_v34  ;;  %965 = vmatprep.subr.bf16.mxu1 %v1069_v35 }
  0x1d   :  { %943 = vmatprep.subr.bf16.mxu0 %v1070_v36  ;;  %v148_v36 = vrot.slane %v1262_v43, %v1342_v26 }
  0x1f   :  { %966 = vmatpush3.bf16.msra.mxu1 %v1071_v37  ;;  %v152_v37 = vrot.slane %v1231_v33, %v1342_v26 }
  0x20   :  { %944 = vmatpush3.bf16.msra.mxu0 %v1072_v39  ;;  %967 = vmatprep.subr.bf16.mxu1 %v1073_v40 }
  0x21   :  { %945 = vmatprep.subr.bf16.mxu0 %v1074_v41 }
  0x23   :  { %968 = vmatpush3.bf16.msra.mxu1 %v1075_v42 }
  0x24   :  { %946 = vmatpush3.bf16.msra.mxu0 %v1076_v44 }
  0x26   :  { %505 = vmatmul.mubr.bf16.vlgmr.msra.gmra.mrb[0].mxu1 %v167_v45 }
  0x83   :  { %v1277_v52 = vpop.permute.xlu0 %44  ;;  %v1279_v53 = vpop.permute.xlu1 %76 }
  0x84   :  { %vm46_vm1 = vcmp.eq.s32.totalorder %v1277_v52, 1  ;;  %vm78_vm3 = vcmp.eq.s32.totalorder %v1279_v53, 1 }
  0x85   :  { %v47_v57 = vsel %vm46_vm1, %v37_v50, -inf  ;;  %v48_v58 = vsel %vm46_vm1, %v41_v51, -inf  ;;  %v1077_v50 = vld [vmem:[%s1493_s4 + $0x40] sm:$0xff]  }
  0x86   :  { %v57_v62 = vmax.f32 %v47_v57, %v52_v55  ;;  %v58_v63 = vmax.f32 %v48_v58, %v56_v56  ;;  %v1078_v55 = vld [vmem:[%s1493_s4] sm:$0xff]   ;;  %975 = vmatprep.subr.bf16.mxu0 %v1077_v50 }
  0x88   :  { %v1298_v0 = vpop.permute.xlu0 %60  ;;  %v1300_v1 = vpop.permute.xlu1 %92 }
  0x89   :  { %vm62_vm2 = vcmp.eq.s32.totalorder %v1298_v0, 1  ;;  %vm94_vm4 = vcmp.eq.s32.totalorder %v1300_v1, 1 }
  0x8a   :  { %v63_v3 = vsel %vm62_vm2, %v57_v62, %v47_v57  ;;  %v64_v4 = vsel %vm62_vm2, %v58_v63, %v48_v58  ;;  %v1080_v62 = vld [vmem:[%s1493_s4 + $0x8] sm:$0xff]   ;;  %v1081_v63 = vld [vmem:[%s1493_s4 + $0x50] sm:$0xff]  }
  0x8b   :  { %v73_v7 = vmax.f32 %v63_v3, %v68_v60  ;;  %v74_v8 = vmax.f32 %v64_v4, %v72_v61  ;;  %v1079_v61 = vld [vmem:[%s1493_s4 + $0x48] sm:$0xff]  }
  0x8d   :  { %v79_v12 = vsel %vm78_vm3, %v73_v7, %v63_v3  ;;  %v80_v13 = vsel %vm78_vm3, %v74_v8, %v64_v4  ;;  %v1324_v14 = vpop.permute.xlu1 %108  ;;  %v1338_v22 = vpop.permute.xlu0 %124  ;;  %v1082_v3 = vld [vmem:[%s1493_s4 + $0x10] sm:$0xff]   ;;  %v1083_v4 = vld [vmem:[%s1493_s4 + $0x58] sm:$0xff]   ;;  %v1086_v7 = vld [vmem:[%s1493_s4 + $0x20] sm:$0xff]  }
  0x8e   :  { %v89_v15 = vmax.f32 %v79_v12, %v84_v5  ;;  %v90_v16 = vmax.f32 %v80_v13, %v88_v6  ;;  %vm110_vm5 = vcmp.eq.s32.totalorder %v1324_v14, 1  ;;  %vm126_vm6 = vcmp.eq.s32.totalorder %v1338_v22, 1  ;;  %v1084_v5 = vld [vmem:[%s1493_s4 + $0x18] sm:$0xff]   ;;  %v1085_v6 = vld [vmem:[%s1493_s4 + $0x60] sm:$0xff]   ;;  %v1087_v8 = vld [vmem:[%s1493_s4 + $0x68] sm:$0xff]  }
  0x8f   :  { %v1099_v14 = vld [vmem:[%s1494_s6 + $0x30] sm:$0xff]  }
  0x90   :  { %v95_v19 = vsel %vm94_vm4, %v89_v15, %v79_v12  ;;  %v96_v20 = vsel %vm94_vm4, %v90_v16, %v80_v13  ;;  %v1090_v12 = vld [vmem:[%s1493_s4 + $0x30] sm:$0xff]   ;;  %v1091_v13 = vld [vmem:[%s1493_s4 + $0x78] sm:$0xff]   ;;  %v1109_v16 = vmov 0.0  }
  0x91   :  { %v105_v23 = vmax.f32 %v95_v19, %v100_v10  ;;  %v106_v24 = vmax.f32 %v96_v20, %v104_v11  ;;  %v1088_v10 = vld [vmem:[%s1493_s4 + $0x28] sm:$0xff]   ;;  %v1089_v11 = vld [vmem:[%s1493_s4 + $0x70] sm:$0xff]   ;;  %v1092_v15 = vld [vmem:[%s1493_s4 + $0x38] sm:$0xff]   ;;  %1006 = vmatprep.subr.bf16.mxu1 %v1109_v16 }
  0x92   :  { %v1344_v27 = vpop.permute.xlu1 %140 }
  0x93   :  { %v111_v28 = vsel %vm110_vm5, %v105_v23, %v95_v19  ;;  %v112_v29 = vsel %vm110_vm5, %v106_v24, %v96_v20  ;;  %vm142_vm7 = vcmp.eq.s32.totalorder %v1344_v27, 1  ;;  %v1094_v19 = vld [vmem:[%s1494_s6 + $0x8] sm:$0xff]   ;;  %v1095_v20 = vld [vmem:[%s1494_s6 + $0x10] sm:$0xff]   ;;  %v1097_v23 = vld [vmem:[%s1494_s6 + $0x20] sm:$0xff]  }
  0x94   :  { %v121_v31 = vmax.f32 %v111_v28, %v116_v18  ;;  %v122_v32 = vmax.f32 %v112_v29, %v120_v21  ;;  %v1093_v18 = vld [vmem:[%s1494_s6] sm:$0xff]   ;;  %v1096_v21 = vld [vmem:[%s1494_s6 + $0x18] sm:$0xff]   ;;  %v1098_v24 = vld [vmem:[%s1494_s6 + $0x28] sm:$0xff]  }
  0x95   :  { %1007 = vmatpush3.bf16.msra.mxu1 %v1093_v18 }
  0x96   :  { %v127_v34 = vsel %vm126_vm6, %v121_v31, %v111_v28  ;;  %v128_v35 = vsel %vm126_vm6, %v122_v32, %v112_v29  ;;  %1008 = vmatprep.subr.bf16.mxu1 %v1109_v16  ;;  %v857_v28 = vld [vmem:[%s1495_s3] ss:$0 sm:$0xff] }
  0x97   :  { %v137_v38 = vmax.f32 %v127_v34, %v132_v25  ;;  %v138_v39 = vmax.f32 %v128_v35, %v136_v30  ;;  %v1361_v40 = vpop.permute.xlu1 %156 }
  0x98   :  { %vm158_vm8 = vcmp.eq.s32.totalorder %v1361_v40, 1 }
  0x99   :  { %v143_v41 = vsel %vm142_vm7, %v137_v38, %v127_v34  ;;  %v144_v42 = vsel %vm142_vm7, %v138_v39, %v128_v35  ;;  %1009 = vmatpush3.bf16.msra.mxu1 %v1094_v19 }
  0x9a   :  { %v153_v44 = vmax.f32 %v143_v41, %v148_v36  ;;  %v154_v45 = vmax.f32 %v144_v42, %v152_v37  ;;  %1010 = vmatprep.subr.bf16.mxu1 %v1109_v16 }
  0x9c   :  { %v159_v43 = vsel %vm158_vm8, %v153_v44, %v143_v41  ;;  %v160_v33 = vsel %vm158_vm8, %v154_v45, %v144_v42 }
  0x9d   :  { %vm161_vm9 = vcmp.eq.f32.partialorder %v159_v43, -inf  ;;  %vm162_vm10 = vcmp.eq.f32.partialorder %v160_v33, -inf  ;;  %v893_v46 = vpack.c.bf16 %v160_v33, %v160_v33  ;;  %v898_v47 = vpack.c.bf16 %v159_v43, %v159_v43  ;;  %1011 = vmatpush3.bf16.msra.mxu1 %v1095_v20 }
  0x9e   :  { %vm895_vm11 = vmneg %vm161_vm9  ;;  %1012 = vmatprep.subr.bf16.mxu1 %v1109_v16 }
  0x9f   :  { %vm890_vm12 = vmneg %vm162_vm10 }
  0xa0   :  { %vm892_vm13 = vmpackc.low %vm890_vm12, %vm890_vm12 }
  0xa1   :  { %894 = vmatprep.mubr.msk.bf16.mxu0 %vm892_vm13, %v893_v46  ;;  %vm897_vm14 = vmpackc.low %vm895_vm11, %vm895_vm11  ;;  %1013 = vmatpush3.bf16.msra.mxu1 %v1096_v21 }
  0xa2   :  { %899 = vmatmul.mubr.msk.bf16.vlgmr.msra.gmra.mrb[0].mxu0 %vm897_vm14, %v898_v47  ;;  %1014 = vmatprep.subr.bf16.mxu1 %v1109_v16 }
  0xa3   :  { %976 = vmatpush3.bf16.msra.mxu0 %v1078_v55 }
  0xa4   :  { %977 = vmatprep.subr.bf16.mxu0 %v1079_v61 }
  0xa5   :  { %1015 = vmatpush3.bf16.msra.mxu1 %v1097_v23 }
  0xa6   :  { %1016 = vmatprep.subr.bf16.mxu1 %v1109_v16 }
  0xa7   :  { %978 = vmatpush3.bf16.msra.mxu0 %v1080_v62 }
  0xa8   :  { %979 = vmatprep.subr.bf16.mxu0 %v1081_v63  ;;  %v922_v63 = vld [vmem:[%s1497_s7] ss:$0 sm:$0xff] }
  0xa9   :  { %1017 = vmatpush3.bf16.msra.mxu1 %v1098_v24 }
  0xaa   :  { %1018 = vmatprep.subr.bf16.mxu1 %v1109_v16 }
  0xab   :  { %980 = vmatpush3.bf16.msra.mxu0 %v1082_v3 }
  0xac   :  { %981 = vmatprep.subr.bf16.mxu0 %v1083_v4 }
  0xad   :  { %1019 = vmatpush3.bf16.msra.mxu1 %v1099_v14 }
  0xae   :  { %1020 = vmatprep.subr.bf16.mxu1 %v1109_v16 }
  0xaf   :  { %982 = vmatpush3.bf16.msra.mxu0 %v1084_v5 }
  0xb0   :  { %983 = vmatprep.subr.bf16.mxu0 %v1085_v6 }
  0xb3   :  { %984 = vmatpush3.bf16.msra.mxu0 %v1086_v7 }
  0xb4   :  { %985 = vmatprep.subr.bf16.mxu0 %v1087_v8 }
  0xb7   :  { %986 = vmatpush3.bf16.msra.mxu0 %v1088_v10 }
  0xb8   :  { %987 = vmatprep.subr.bf16.mxu0 %v1089_v11 }
  0xbb   :  { %988 = vmatpush3.bf16.msra.mxu0 %v1090_v12 }
  0xbc   :  { %989 = vmatprep.subr.bf16.mxu0 %v1091_v13 }
  0xbf   :  { %990 = vmatpush3.bf16.msra.mxu0 %v1092_v15 }
  0xf9   :  { %v969_v51 = vpop.f32.mrb[0].mxu1 }
  0xfa   :  { %v970_v56 = vpop.f32.mrb[1].mxu1 }
  0xfb   :  { %v971_v57 = vadd.f32 %v970_v56, %v969_v51  ;;  %v972_v58 = vpop.f32.mrb[2].mxu1 }
  0xfc   :  { %v973_v60 = vpop.f32.mrb[3].mxu1 }
 0x175   :  { %v947_v25 = vpop.f32.mrb[0].mxu0 }
 0x176   :  { %v948_v29 = vpop.f32.mrb[1].mxu0 }
 0x177   :  { %v949_v30 = vadd.f32 %v948_v29, %v947_v25  ;;  %v950_v31 = vpop.f32.mrb[2].mxu0 }
 0x178   :  { %v951_v32 = vpop.f32.mrb[3].mxu0 }
 0x179   :  { %v467_v34 = vadd.f32 %v949_v30, %v857_v28 }
 0x17b   :  { %v507_v35 = vadd.f32 %v971_v57, %v467_v34 }
 0x17d   :  { %v512_v36 = vmax.f32 %v507_v35, 0.0 }
 0x17f   :  { %v563_v37 = vpack.c.bf16 %v512_v36, %v512_v36  ;;  %v516_v38 = vrot.slane %v512_v36, %v1269_v48  ;;  %v521_v39 = vrot.slane %v512_v36, %v1271_v49  ;;  %v527_v44 = vrot.slane %v512_v36, %v1281_v54 }
 0x180   :  { %v533_v33 = vrot.slane %v512_v36, %v1292_v59  ;;  %v539_v48 = vrot.slane %v512_v36, %v1303_v2  ;;  %v545_v50 = vrot.slane %v512_v36, %v1313_v9  ;;  %v551_v51 = vrot.slane %v512_v36, %v1326_v17  ;;  %v1100_v17 = vld [vmem:[%s1494_s6 + $0x38] sm:$0xff]  }
 0x181   :  { %731 = vmatprep.mubr.bf16.mxu0 %v563_v37  ;;  %v517_v41 = vsel %vm46_vm1, %v516_v38, -inf  ;;  %v557_v55 = vrot.slane %v512_v36, %v1342_v26  ;;  %1021 = vmatpush3.bf16.msra.mxu1 %v1100_v17  ;;  %v900_v26 = vld [vmem:[%s1496_s5] ss:$0 sm:$0xff] }
 0x182   :  { %v522_v42 = vmax.f32 %v517_v41, %v521_v39 }
 0x184   :  { %v523_v45 = vsel %vm62_vm2, %v522_v42, %v517_v41  ;;  %vm1110_vm2 = vmmov 0  }
 0x185   :  { %v528_v43 = vmax.f32 %v523_v45, %v527_v44  ;;  %1022 = vmatprep.mubr.msk.bf16.mxu1 %vm1110_vm2, %v1109_v16 }
 0x187   :  { %v529_v46 = vsel %vm78_vm3, %v528_v43, %v523_v45 }
 0x188   :  { %v534_v47 = vmax.f32 %v529_v46, %v533_v33 }
 0x18a   :  { %v535_v49 = vsel %vm94_vm4, %v534_v47, %v529_v46 }
 0x18b   :  { %v540_v52 = vmax.f32 %v535_v49, %v539_v48 }
 0x18d   :  { %v541_v54 = vsel %vm110_vm5, %v540_v52, %v535_v49 }
 0x18e   :  { %v546_v0 = vmax.f32 %v541_v54, %v545_v50 }
 0x190   :  { %v547_v59 = vsel %vm126_vm6, %v546_v0, %v541_v54 }
 0x191   :  { %v552_v53 = vmax.f32 %v547_v59, %v551_v51 }
 0x193   :  { %v553_v2 = vsel %vm142_vm7, %v552_v53, %v547_v59 }
 0x194   :  { %v558_v1 = vmax.f32 %v553_v2, %v557_v55 }
 0x196   :  { %v559_v56 = vsel %vm158_vm8, %v558_v1, %v553_v2 }
 0x197   :  { %vm560_vm15 = vcmp.eq.f32.partialorder %v559_v56, -inf  ;;  %v920_v9 = vpack.c.bf16 %v559_v56, %v559_v56 }
 0x198   :  { %vm917_vm0 = vmneg %vm560_vm15 }
 0x199   :  { %vm919_vm1 = vmpackc.low %vm917_vm0, %vm917_vm0 }
 0x19a   :  { %921 = vmatmul.mubr.msk.bf16.vlgmr.msra.gmra.mrb[4].mxu0 %vm919_vm1, %v920_v9 }
 0x26d   :  { %v991_v22 = vpop.f32.mrb[4].mxu0 }
 0x26e   :  { %v992_v27 = vpop.f32.mrb[5].mxu0 }
 0x26f   :  { %v993_v40 = vadd.f32 %v992_v27, %v991_v22  ;;  %v994_v57 = vpop.f32.mrb[6].mxu0 }
 0x270   :  { %v995_v58 = vpop.f32.mrb[7].mxu0 }
 0x271   :  { %v734_v60 = vadd.f32 %v993_v40, %v900_v26 }
 0x273   :  { %v739_v61 = vmax.f32 %v734_v60, 0.0 }
 0x275   :  { %v740_v62 = vpack.c.bf16 %v739_v61, %v739_v61 }
 0x277   :  { %1023 = vmatmul.mubr.bf16.vlgmr.msra.gmra.mrb[4].mxu1 %v740_v62 }
 0x34a   :  { %v846_v3 = vpop.f32.mrb[4].mxu1 }
 0x34b   :  { %v847_v4 = vadd.f32 %v922_v63, %v846_v3  ;;  %v1024_v5 = vpop.f32.mrb[5].mxu1 }
 0x34c   :  { %v849_v6 = vpop.f32.mrb[6].mxu1 }
 0x34d   :  { %852 = vst [vmem:[%s1498_s8] sm:$0xff] %v847_v4  ;;  %v1025_v7 = vpop.f32.mrb[7].mxu1 }

</bundles_post_ra>
